<compile_context>
chip_gen: v7x
topology: tpu7x:2x2x1
jax: 0.10.0
libtpu: 0.0.40
codegen_flags: <defaults>
</compile_context>

<pallas_src>
import functools
import math

import numpy as np
import jax
import jax.numpy as jnp
from jax import lax
from jax.experimental import pallas as pl
from jax.experimental.pallas import tpu as pltpu


_WEIGHT_ORDER = (
    "wqk", "bqk", "wv", "bv", "wo", "bo", "norm2_g", "norm2_b",
    "w_value", "b_value", "w_ow", "b_ow", "w_out", "b_out",
    "norm1_g", "norm1_b",
    "ffn_w1", "ffn_b1", "ffn_w2", "ffn_b2", "norm3_g", "norm3_b",
)
# Large matmul weights streamed as bf16; the sampling-offset / attention
# weight projection (w_ow) stays f32, biases / norm params stay f32.
_BF16_WEIGHTS = frozenset(
    {"wqk", "wv", "wo", "w_value", "w_out", "ffn_w1", "ffn_w2"})


# -----------------------------------------------------------------------------
# In-kernel helpers
# -----------------------------------------------------------------------------
def _mm(a, b):
    """bf16 MXU matmul with f32 accumulation."""
    return jnp.dot(a.astype(jnp.bfloat16), b.astype(jnp.bfloat16),
                   preferred_element_type=jnp.float32)


def _mm_f32(a, b):
    """f32 matmul for small operands whose output feeds non-linear math."""
    return jnp.dot(a.astype(jnp.float32), b.astype(jnp.float32),
                   preferred_element_type=jnp.float32)


def _layer_norm(x, g, b, eps=1e-5):
    mu = jnp.mean(x, axis=-1, keepdims=True)
    var = jnp.mean(jnp.square(x - mu), axis=-1, keepdims=True)
    return (x - mu) * lax.rsqrt(var + eps) * g + b


def _softmax_last(x):
    x = x - jnp.max(x, axis=-1, keepdims=True)
    e = jnp.exp(x)
    return e / jnp.sum(e, axis=-1, keepdims=True)


# -----------------------------------------------------------------------------
# Fused decoder kernel: grid = (batch, layer); layer axis carries the residual
# -----------------------------------------------------------------------------
def _decoder_kernel(
    # per-batch activations (VMEM-resident across the layer grid axis)
    tgt_ref, pos_ref, src_ref, mask_ref, rpi_ref, grid_ref,
    # per-layer weights (streamed/pipelined along the layer grid axis)
    wqk_ref, bqk_ref, wv_ref, bv_ref, wo_ref, bo_ref, g2_ref, b2_ref,
    wval_ref, bval_ref, wow_ref, bow_ref, wout_ref, bout_ref, g1_ref, b1_ref,
    fw1_ref, fb1_ref, fw2_ref, fb2_ref, g3_ref, b3_ref,
    # output + scratch
    out_ref, carry_ref, head_buf,
    *, Q, D, H, L, P, spatial_shapes):
    hd = D // H
    scale = 1.0 / math.sqrt(hd)
    layer = pl.program_id(1)

    @pl.when(layer == 0)
    def _():
        carry_ref[...] = tgt_ref[...].astype(jnp.float32)

    x = carry_ref[...]                                   # (Q, D) f32 residual
    pos = pos_ref[...].astype(jnp.float32)               # (Q, D)

    # ------------------ self attention + residual + norm2 -------------------
    qk = _mm(x + pos, wqk_ref[...]) + bqk_ref[...]       # (Q, 2D): [q | k]
    v = _mm(x, wv_ref[...]) + bv_ref[...]                # (Q, D)
    k_t = qk[:, D:].T                                    # (D, Q): one transpose
    for h in range(H):
        sl = slice(h * hd, (h + 1) * hd)
        s = _mm(qk[:, sl] * scale, k_t[sl, :])           # (Q, Q)
        head_buf[:, sl] = _mm(_softmax_last(s), v[:, sl])
    proj = _mm(head_buf[...], wo_ref[...]) + bo_ref[...]   # fused head merge
    x = _layer_norm(x + proj, g2_ref[...], b2_ref[...])

    # ------- multi-scale deformable cross attention + residual + norm1 ------
    q = x + pos
    val = _mm(src_ref[...], wval_ref[...]) + bval_ref[...]  # (S, D) f32
    val = val * mask_ref[...]                                # zero padded tokens
    # offsets + attention logits: small matmul kept in f32 (non-linear use)
    ow = _mm_f32(q, wow_ref[...]) + bow_ref[...]             # (Q, H*L*P*3)
    off_cols = H * L * P * 2
    LP = L * P

    # grouped softmax over each head's L*P logits: one lane-dense max+exp pass
    # (the global row max is a valid shift for every per-head group).
    logits = ow[:, off_cols:]                                # (Q, H*L*P)
    e_all = jnp.exp(logits - jnp.max(logits, axis=-1, keepdims=True))
    aw = []
    for h in range(H):
        e_h = e_all[:, h * LP:(h + 1) * LP]
        aw.append(e_h / jnp.sum(e_h, axis=-1, keepdims=True))

    rpi = rpi_ref[...].astype(jnp.float32)                   # (Q, 2L)
    grid_xy = grid_ref[...]                                  # (2, S): [ix; iy]
    o_heads = [jnp.zeros((Q, hd), jnp.float32) for _ in range(H)]
    start = 0
    for l, (hl, wl) in enumerate(spatial_shapes):
        n_l = hl * wl
        # ---- level geometry, hoisted out of the head / point loops ----
        ix = grid_xy[0:1, start:start + n_l]                 # (1, n_l)
        iy = grid_xy[1:2, start:start + n_l]
        # reference point in pixel coords (align_corners=False):
        # px = loc*W - 0.5; the /offset_normalizer * W cancels, so the raw
        # sampling offsets are already in pixels.
        base_x = rpi[:, 2 * l:2 * l + 1] * wl - 0.5          # (Q, 1)
        base_y = rpi[:, 2 * l + 1:2 * l + 2] * hl - 0.5
        v_l = val[start:start + n_l, :]                      # (n_l, D)
        for h in range(H):
            # Dense bilinear weights (per-point attention weight folded in),
            # contracted on the MXU == grid_sample(zeros padding) + aggregate.
            # TODO(synk): replace with true 4-tap gather at production sizes.
            m = jnp.zeros((Q, n_l), jnp.float32)
            for pt in range(P):
                c = ((h * L + l) * P + pt) * 2
                sx = base_x + ow[:, c:c + 1]
                sy = base_y + ow[:, c + 1:c + 2]
                wgt = (jnp.maximum(1.0 - jnp.abs(sx - ix), 0.0)
                       * jnp.maximum(1.0 - jnp.abs(sy - iy), 0.0))  # (Q, n_l)
                m = m + aw[h][:, l * P + pt:l * P + pt + 1] * wgt
            o_heads[h] = o_heads[h] + _mm(m, v_l[:, h * hd:(h + 1) * hd])
        start += n_l
    for h in range(H):
        head_buf[:, h * hd:(h + 1) * hd] = o_heads[h]
    cproj = _mm(head_buf[...], wout_ref[...]) + bout_ref[...]  # fused head merge
    x = _layer_norm(x + cproj, g1_ref[...], b1_ref[...])

    # ------------------------ FFN + residual + norm3 ------------------------
    hid = jnp.maximum(_mm(x, fw1_ref[...]) + fb1_ref[...], 0.0)
    x = _layer_norm(x + _mm(hid, fw2_ref[...]) + fb2_ref[...],
                    g3_ref[...], b3_ref[...])

    carry_ref[...] = x
    out_ref[...] = x.astype(out_ref.dtype)


# -----------------------------------------------------------------------------
# BlockSpec helpers
# -----------------------------------------------------------------------------
def _batch_spec(a):
    nd = a.ndim
    return pl.BlockSpec((None,) + a.shape[1:],
                        lambda b, l: (b,) + (0,) * (nd - 1))


def _layer_spec(a):
    nd = a.ndim
    return pl.BlockSpec((None,) + a.shape[1:],
                        lambda b, l: (l,) + (0,) * (nd - 1))


def _const_spec(a):
    nd = a.ndim
    return pl.BlockSpec(a.shape, lambda b, l: (0,) * nd)


# -----------------------------------------------------------------------------
# Decoder wrapper
# -----------------------------------------------------------------------------
def deformable_transformer_decoder(params, tgt, reference_points, src,
                                   src_spatial_shapes, src_level_start_index,
                                   src_valid_ratios, query_pos=None,
                                   src_padding_mask=None, roi_features=None,
                                   return_intermediate=True, dims=None):
    # src_level_start_index kept for interface parity; level splitting uses the
    # static src_spatial_shapes tuple inside the fused kernel.
    del src_level_start_index
    B, Q, D, H, L, P, _ = dims
    S = src.shape[1]
    layers = params["layers"]
    NL = len(layers)
    assert sum(h * w for h, w in src_spatial_shapes) == S

    if reference_points.shape[-1] == 4:
        # TODO(synk): 4-d (box) reference points use a different offset scaling
        # (off / P * wh * 0.5); only the 2-d rule is kernelized.
        raise NotImplementedError("4-d reference points not supported")
    assert reference_points.shape[-1] == 2

    output = tgt.astype(jnp.float32)
    if roi_features is not None:
        output = output + roi_features.astype(jnp.float32)
    if query_pos is None:
        query_pos = jnp.zeros_like(tgt)
    if src_padding_mask is None:
        maskf = jnp.ones((B, S, 1), jnp.float32)
    else:
        maskf = 1.0 - src_padding_mask.astype(jnp.float32)[..., None]

    # reference points scaled by per-level valid ratios (fixed across layers
    # because bbox_embed is None in the reference __init__)
    rpi = reference_points[:, :, None, :] * src_valid_ratios[:, None]  # (B,Q,L,2)
    rpi_flat = rpi.reshape(B, Q, L * 2).astype(jnp.float32)

    # exact integer pixel-index tables per flattened source location (host side)
    ix_all, iy_all = [], []
    for hl, wl in src_spatial_shapes:
        ix_all.append(np.tile(np.arange(wl, dtype=np.float32), hl))
        iy_all.append(np.repeat(np.arange(hl, dtype=np.float32), wl))
    grid_xy = jnp.asarray(np.stack([np.concatenate(ix_all),
                                    np.concatenate(iy_all)]))           # (2, S)

    # bf16 for the dominant HBM streams; residual stream stays f32
    src_bf = src.astype(jnp.bfloat16)
    pos_bf = query_pos.astype(jnp.bfloat16)

    # stack per-layer weights along a leading layer axis; biases / norm params
    # as (1, N) rows so features sit on the lane axis
    def _prep(name, v):
        if v.ndim == 1:
            v = v.reshape(1, -1)
        if name in _BF16_WEIGHTS:
            v = v.astype(jnp.bfloat16)
        return v

    stacked = {name: jnp.stack([_prep(name, lp[name]) for lp in layers])
               for name in _WEIGHT_ORDER}

    batch_args = [output, pos_bf, src_bf, maskf, rpi_flat]
    weight_args = [stacked[name] for name in _WEIGHT_ORDER]
    in_specs = ([_batch_spec(a) for a in batch_args]
                + [_const_spec(grid_xy)]
                + [_layer_spec(a) for a in weight_args])

    kernel = functools.partial(
        _decoder_kernel, Q=Q, D=D, H=H, L=L, P=P,
        spatial_shapes=tuple(tuple(int(x) for x in s)
                             for s in src_spatial_shapes))

    outs = pl.pallas_call(
        kernel,
        grid=(B, NL),
        in_specs=in_specs,
        out_specs=pl.BlockSpec((None, None, Q, D), lambda b, l: (l, b, 0, 0)),
        out_shape=jax.ShapeDtypeStruct((NL, B, Q, D), jnp.float32),
        scratch_shapes=[pltpu.VMEM((Q, D), jnp.float32),   # residual carry
                        pltpu.VMEM((Q, D), jnp.float32)],  # fused head buffer
        compiler_params=pltpu.CompilerParams(
            dimension_semantics=("parallel", "arbitrary"),
            # raised above the v5e/v6e defaults; production sizes need S-tiling
            vmem_limit_bytes=32 * 1024 * 1024),
    )(*batch_args, grid_xy, *weight_args)

    if return_intermediate:
        refs = jnp.stack([reference_points] * NL)
        return outs, refs
    # Non-intermediate path: return final output / reference points (the
    # checkpoint's literal code returns empty lists here; this mirrors the
    # canonical DeformableTransformerDecoder intent).
    return outs[-1], reference_points


# -----------------------------------------------------------------------------
# Deterministic parameter init (q/k and offset/attw projections pre-fused)
# -----------------------------------------------------------------------------
def _init(key, shape, scale=0.05):
    return (scale * jax.random.normal(key, shape)).astype(jnp.float32)


def init_params(key, num_layers, D, H, L, P, d_ffn):
    layers = []
    for _ in range(num_layers):
        key, *ks = jax.random.split(key, 17)
        ks = iter(ks)
        layers.append(dict(
            # self attention: q/k projections fused into one (D, 2D) weight
            wqk=_init(next(ks), (D, 2 * D)), bqk=_init(next(ks), (2 * D,)),
            wv=_init(next(ks), (D, D)), bv=_init(next(ks), (D,)),
            wo=_init(next(ks), (D, D)), bo=_init(next(ks), (D,)),
            # deformable cross attention: sampling-offset + attention-weight
            # projections fused into one (D, H*L*P*3) weight
            w_value=_init(next(ks), (D, D)), b_value=_init(next(ks), (D,)),
            w_ow=_init(next(ks), (D, H * L * P * 3), scale=0.02),
            b_ow=_init(next(ks), (H * L * P * 3,), scale=0.02),
            w_out=_init(next(ks), (D, D)), b_out=_init(next(ks), (D,)),
            # FFN
            ffn_w1=_init(next(ks), (D, d_ffn)), ffn_b1=_init(next(ks), (d_ffn,)),
            ffn_w2=_init(next(ks), (d_ffn, D)), ffn_b2=_init(next(ks), (D,)),
            # layer norms
            norm1_g=jnp.ones((D,), jnp.float32), norm1_b=jnp.zeros((D,), jnp.float32),
            norm2_g=jnp.ones((D,), jnp.float32), norm2_b=jnp.zeros((D,), jnp.float32),
            norm3_g=jnp.ones((D,), jnp.float32), norm3_b=jnp.zeros((D,), jnp.float32),
        ))
    return dict(layers=layers)


# -----------------------------------------------------------------------------
if __name__ == "__main__":
    B, Q, D = 2, 8, 32          # batch, num_queries, d_model
    H, L, P = 4, 2, 2           # heads, feature levels, sampling points
    d_ffn = 64
    num_layers = 2
    spatial_shapes = ((8, 8), (4, 4))
    S = sum(h * w for h, w in spatial_shapes)   # flattened multi-level src len

    key = jax.random.PRNGKey(0)
    kp, k1, k2, k3, k4, k5 = jax.random.split(key, 6)
    params = init_params(kp, num_layers, D, H, L, P, d_ffn)

    tgt = jax.random.normal(k1, (B, Q, D), jnp.float32)
    query_pos = jax.random.normal(k2, (B, Q, D), jnp.float32)
    roi_features = jax.random.normal(k3, (B, Q, D), jnp.float32)
    src = jax.random.normal(k4, (B, S, D), jnp.float32)
    reference_points = jax.random.uniform(k5, (B, Q, 2), jnp.float32, 0.1, 0.9)
    src_valid_ratios = jnp.full((B, L, 2), 0.9, jnp.float32)
    src_padding_mask = jnp.zeros((B, S), jnp.bool_).at[:, S - 4:].set(True)
    src_level_start_index = jnp.array(
        [0, spatial_shapes[0][0] * spatial_shapes[0][1]], jnp.int32)

    fwd = jax.jit(functools.partial(
        deformable_transformer_decoder,
        src_spatial_shapes=spatial_shapes,
        return_intermediate=True,
        dims=(B, Q, D, H, L, P, d_ffn)))

    outs, refs = fwd(params, tgt, reference_points, src,
                     src_level_start_index=src_level_start_index,
                     src_valid_ratios=src_valid_ratios,
                     query_pos=query_pos,
                     src_padding_mask=src_padding_mask,
                     roi_features=roi_features)

    jax.block_until_ready((outs, refs))
    assert outs.shape == (num_layers, B, Q, D)
    assert refs.shape == (num_layers, B, Q, 2)
    assert bool(jnp.all(jnp.isfinite(outs)))
    print("KERNEL_OK")
</pallas_src>

<mosaic_0001>
module attributes {stable_mosaic.version = 11 : i64} {
  func.func @_decoder_kernel(%arg0: i32, %arg1: i32, %arg2: memref<1x8x32xf32, #tpu.memory_space<vmem>>, %arg3: memref<1x8x32xbf16, #tpu.memory_space<vmem>>, %arg4: memref<1x80x32xbf16, #tpu.memory_space<vmem>>, %arg5: memref<1x80x1xf32, #tpu.memory_space<vmem>>, %arg6: memref<1x8x4xf32, #tpu.memory_space<vmem>>, %arg7: memref<2x80xf32, #tpu.memory_space<vmem>>, %arg8: memref<1x32x64xbf16, #tpu.memory_space<vmem>>, %arg9: memref<1x1x64xf32, #tpu.memory_space<vmem>>, %arg10: memref<1x32x32xbf16, #tpu.memory_space<vmem>>, %arg11: memref<1x1x32xf32, #tpu.memory_space<vmem>>, %arg12: memref<1x32x32xbf16, #tpu.memory_space<vmem>>, %arg13: memref<1x1x32xf32, #tpu.memory_space<vmem>>, %arg14: memref<1x1x32xf32, #tpu.memory_space<vmem>>, %arg15: memref<1x1x32xf32, #tpu.memory_space<vmem>>, %arg16: memref<1x32x32xbf16, #tpu.memory_space<vmem>>, %arg17: memref<1x1x32xf32, #tpu.memory_space<vmem>>, %arg18: memref<1x32x48xf32, #tpu.memory_space<vmem>>, %arg19: memref<1x1x48xf32, #tpu.memory_space<vmem>>, %arg20: memref<1x32x32xbf16, #tpu.memory_space<vmem>>, %arg21: memref<1x1x32xf32, #tpu.memory_space<vmem>>, %arg22: memref<1x1x32xf32, #tpu.memory_space<vmem>>, %arg23: memref<1x1x32xf32, #tpu.memory_space<vmem>>, %arg24: memref<1x32x64xbf16, #tpu.memory_space<vmem>>, %arg25: memref<1x1x64xf32, #tpu.memory_space<vmem>>, %arg26: memref<1x64x32xbf16, #tpu.memory_space<vmem>>, %arg27: memref<1x1x32xf32, #tpu.memory_space<vmem>>, %arg28: memref<1x1x32xf32, #tpu.memory_space<vmem>>, %arg29: memref<1x1x32xf32, #tpu.memory_space<vmem>>, %arg30: memref<1x1x8x32xf32, #tpu.memory_space<vmem>>, %arg31: memref<8x32xf32, #tpu.memory_space<vmem>>, %arg32: memref<8x32xf32, #tpu.memory_space<vmem>>) attributes {dimension_semantics = [#tpu.dimension_semantics<parallel>, #tpu.dimension_semantics<arbitrary>], iteration_bounds = array<i64: 2, 2>, scalar_prefetch = 0 : i64, scratch_operands = 2 : i64, tpu.core_type = #tpu.core_type<tc>, window_params = [{transform_indices = @transform_0, window_bounds = array<i64: 1, 8, 32>}, {transform_indices = @transform_1, window_bounds = array<i64: 1, 8, 32>}, {transform_indices = @transform_2, window_bounds = array<i64: 1, 80, 32>}, {transform_indices = @transform_3, window_bounds = array<i64: 1, 80, 1>}, {transform_indices = @transform_4, window_bounds = array<i64: 1, 8, 4>}, {pipeline_mode = #tpu.pipeline_mode<synchronous>, transform_indices = @transform_5, window_bounds = array<i64: 2, 80>}, {transform_indices = @transform_6, window_bounds = array<i64: 1, 32, 64>}, {transform_indices = @transform_7, window_bounds = array<i64: 1, 1, 64>}, {transform_indices = @transform_8, window_bounds = array<i64: 1, 32, 32>}, {transform_indices = @transform_9, window_bounds = array<i64: 1, 1, 32>}, {transform_indices = @transform_10, window_bounds = array<i64: 1, 32, 32>}, {transform_indices = @transform_11, window_bounds = array<i64: 1, 1, 32>}, {transform_indices = @transform_12, window_bounds = array<i64: 1, 1, 32>}, {transform_indices = @transform_13, window_bounds = array<i64: 1, 1, 32>}, {transform_indices = @transform_14, window_bounds = array<i64: 1, 32, 32>}, {transform_indices = @transform_15, window_bounds = array<i64: 1, 1, 32>}, {transform_indices = @transform_16, window_bounds = array<i64: 1, 32, 48>}, {transform_indices = @transform_17, window_bounds = array<i64: 1, 1, 48>}, {transform_indices = @transform_18, window_bounds = array<i64: 1, 32, 32>}, {transform_indices = @transform_19, window_bounds = array<i64: 1, 1, 32>}, {transform_indices = @transform_20, window_bounds = array<i64: 1, 1, 32>}, {transform_indices = @transform_21, window_bounds = array<i64: 1, 1, 32>}, {transform_indices = @transform_22, window_bounds = array<i64: 1, 32, 64>}, {transform_indices = @transform_23, window_bounds = array<i64: 1, 1, 64>}, {transform_indices = @transform_24, window_bounds = array<i64: 1, 64, 32>}, {transform_indices = @transform_25, window_bounds = array<i64: 1, 1, 32>}, {transform_indices = @transform_26, window_bounds = array<i64: 1, 1, 32>}, {transform_indices = @transform_27, window_bounds = array<i64: 1, 1, 32>}, {transform_indices = @transform_28, window_bounds = array<i64: 1, 1, 8, 32>}]} {
    %c0_i32 = arith.constant 0 : i32
    %0 = arith.cmpi eq, %arg1, %c0_i32 : i32
    %1 = arith.extui %0 : i1 to i32
    %c0_i32_0 = arith.constant 0 : i32
    %2 = arith.cmpi ne, %1, %c0_i32_0 : i32
    scf.if %2 {
      %c0_245 = arith.constant 0 : index
      %c0_246 = arith.constant 0 : index
      %c0_247 = arith.constant 0 : index
      %763 = vector.load %arg2[%c0_245, %c0_246, %c0_247] : memref<1x8x32xf32, #tpu.memory_space<vmem>>, vector<1x8x32xf32>
      %764 = vector.shape_cast %763 : vector<1x8x32xf32> to vector<8x32xf32>
      %c0_248 = arith.constant 0 : index
      %c0_249 = arith.constant 0 : index
      %765 = vector.load %arg31[%c0_248, %c0_249] : memref<8x32xf32, #tpu.memory_space<vmem>>, vector<8x32xf32>
      tpu.vector_store %arg31[%c0_248, %c0_249], %764 {strides = array<i32>} : memref<8x32xf32, #tpu.memory_space<vmem>>, vector<8x32xf32>,
    } else {
    }
    %c0 = arith.constant 0 : index
    %c0_1 = arith.constant 0 : index
    %3 = vector.load %arg31[%c0, %c0_1] : memref<8x32xf32, #tpu.memory_space<vmem>>, vector<8x32xf32>
    %c0_2 = arith.constant 0 : index
    %c0_3 = arith.constant 0 : index
    %c0_4 = arith.constant 0 : index
    %4 = vector.load %arg3[%c0_2, %c0_3, %c0_4] : memref<1x8x32xbf16, #tpu.memory_space<vmem>>, vector<1x8x32xbf16>
    %5 = vector.shape_cast %4 : vector<1x8x32xbf16> to vector<8x32xbf16>
    %6 = arith.extf %5 : vector<8x32xbf16> to vector<8x32xf32>
    %7 = arith.addf %3, %6 : vector<8x32xf32>
    %c0_5 = arith.constant 0 : index
    %c0_6 = arith.constant 0 : index
    %c0_7 = arith.constant 0 : index
    %8 = vector.load %arg8[%c0_5, %c0_6, %c0_7] : memref<1x32x64xbf16, #tpu.memory_space<vmem>>, vector<1x32x64xbf16>
    %9 = vector.shape_cast %8 : vector<1x32x64xbf16> to vector<32x64xbf16>
    %10 = arith.truncf %7 : vector<8x32xf32> to vector<8x32xbf16>
    %cst = arith.constant dense<0.000000e+00> : vector<8x64xf32>
    %11 = tpu.matmul %10, %9, %cst {dimension_numbers = #tpu.dot_dimension_numbers<[1], [0], [0], [1], [0, 0, 1, 1], [], []>} : vector<8x32xbf16>, vector<32x64xbf16>, vector<8x64xf32> -> vector<8x64xf32>
    %c0_8 = arith.constant 0 : index
    %c0_9 = arith.constant 0 : index
    %c0_10 = arith.constant 0 : index
    %12 = vector.load %arg9[%c0_8, %c0_9, %c0_10] : memref<1x1x64xf32, #tpu.memory_space<vmem>>, vector<1x1x64xf32>
    %13 = vector.shape_cast %12 : vector<1x1x64xf32> to vector<1x64xf32>
    %14 = vector.broadcast %13 : vector<1x64xf32> to vector<8x64xf32>
    %15 = arith.addf %11, %14 : vector<8x64xf32>
    %c0_11 = arith.constant 0 : index
    %c0_12 = arith.constant 0 : index
    %c0_13 = arith.constant 0 : index
    %16 = vector.load %arg10[%c0_11, %c0_12, %c0_13] : memref<1x32x32xbf16, #tpu.memory_space<vmem>>, vector<1x32x32xbf16>
    %17 = vector.shape_cast %16 : vector<1x32x32xbf16> to vector<32x32xbf16>
    %18 = arith.truncf %3 : vector<8x32xf32> to vector<8x32xbf16>
    %cst_14 = arith.constant dense<0.000000e+00> : vector<8x32xf32>
    %19 = tpu.matmul %18, %17, %cst_14 {dimension_numbers = #tpu.dot_dimension_numbers<[1], [0], [0], [1], [0, 0, 1, 1], [], []>} : vector<8x32xbf16>, vector<32x32xbf16>, vector<8x32xf32> -> vector<8x32xf32>
    %c0_15 = arith.constant 0 : index
    %c0_16 = arith.constant 0 : index
    %c0_17 = arith.constant 0 : index
    %20 = vector.load %arg11[%c0_15, %c0_16, %c0_17] : memref<1x1x32xf32, #tpu.memory_space<vmem>>, vector<1x1x32xf32>
    %21 = vector.shape_cast %20 : vector<1x1x32xf32> to vector<1x32xf32>
    %22 = vector.broadcast %21 : vector<1x32xf32> to vector<8x32xf32>
    %23 = arith.addf %19, %22 : vector<8x32xf32>
    %24 = vector.extract_strided_slice %15 {offsets = [0, 32], sizes = [8, 32], strides = [1, 1]} : vector<8x64xf32> to vector<8x32xf32>
    %25 = tpu.transpose %24, [1, 0] : vector<8x32xf32> -> vector<32x8xf32>
    %26 = vector.extract_strided_slice %15 {offsets = [0, 0], sizes = [8, 8], strides = [1, 1]} : vector<8x64xf32> to vector<8x8xf32>
    %cst_18 = arith.constant 0.353553385 : f32
    %27 = vector.broadcast %cst_18 : f32 to vector<8x8xf32>
    %28 = arith.mulf %26, %27 : vector<8x8xf32>
    %29 = vector.extract_strided_slice %25 {offsets = [0, 0], sizes = [8, 8], strides = [1, 1]} : vector<32x8xf32> to vector<8x8xf32>
    %30 = arith.truncf %28 : vector<8x8xf32> to vector<8x8xbf16>
    %31 = arith.truncf %29 : vector<8x8xf32> to vector<8x8xbf16>
    %cst_19 = arith.constant dense<0.000000e+00> : vector<8x8xf32>
    %32 = tpu.matmul %30, %31, %cst_19 {dimension_numbers = #tpu.dot_dimension_numbers<[1], [0], [0], [1], [0, 0, 1, 1], [], []>} : vector<8x8xbf16>, vector<8x8xbf16>, vector<8x8xf32> -> vector<8x8xf32>
    %cst_20 = arith.constant dense<0xFF800000> : vector<8xf32>
    %33 = vector.multi_reduction <maximumf>, %32, %cst_20 [1] : vector<8x8xf32> to vector<8xf32>
    %34 = vector.shape_cast %33 : vector<8xf32> to vector<8x1xf32>
    %35 = vector.broadcast %34 : vector<8x1xf32> to vector<8x8xf32>
    %36 = arith.subf %32, %35 : vector<8x8xf32>
    %37 = math.exp %36 : vector<8x8xf32>
    %cst_21 = arith.constant dense<0.000000e+00> : vector<8xf32>
    %38 = vector.multi_reduction <add>, %37, %cst_21 [1] : vector<8x8xf32> to vector<8xf32>
    %39 = vector.shape_cast %38 : vector<8xf32> to vector<8x1xf32>
    %40 = vector.broadcast %39 : vector<8x1xf32> to vector<8x8xf32>
    %41 = arith.divf %37, %40 : vector<8x8xf32>
    %42 = vector.extract_strided_slice %23 {offsets = [0, 0], sizes = [8, 8], strides = [1, 1]} : vector<8x32xf32> to vector<8x8xf32>
    %43 = arith.truncf %41 : vector<8x8xf32> to vector<8x8xbf16>
    %44 = arith.truncf %42 : vector<8x8xf32> to vector<8x8xbf16>
    %cst_22 = arith.constant dense<0.000000e+00> : vector<8x8xf32>
    %45 = tpu.matmul %43, %44, %cst_22 {dimension_numbers = #tpu.dot_dimension_numbers<[1], [0], [0], [1], [0, 0, 1, 1], [], []>} : vector<8x8xbf16>, vector<8x8xbf16>, vector<8x8xf32> -> vector<8x8xf32>
    %c0_23 = arith.constant 0 : index
    %c0_24 = arith.constant 0 : index
    %46 = vector.load %arg32[%c0_23, %c0_24] : memref<8x32xf32, #tpu.memory_space<vmem>>, vector<8x8xf32>
    tpu.vector_store %arg32[%c0_23, %c0_24], %45 {strides = array<i32>} : memref<8x32xf32, #tpu.memory_space<vmem>>, vector<8x8xf32>,
    %47 = vector.extract_strided_slice %15 {offsets = [0, 8], sizes = [8, 8], strides = [1, 1]} : vector<8x64xf32> to vector<8x8xf32>
    %cst_25 = arith.constant 0.353553385 : f32
    %48 = vector.broadcast %cst_25 : f32 to vector<8x8xf32>
    %49 = arith.mulf %47, %48 : vector<8x8xf32>
    %50 = vector.extract_strided_slice %25 {offsets = [8, 0], sizes = [8, 8], strides = [1, 1]} : vector<32x8xf32> to vector<8x8xf32>
    %51 = arith.truncf %49 : vector<8x8xf32> to vector<8x8xbf16>
    %52 = arith.truncf %50 : vector<8x8xf32> to vector<8x8xbf16>
    %cst_26 = arith.constant dense<0.000000e+00> : vector<8x8xf32>
    %53 = tpu.matmul %51, %52, %cst_26 {dimension_numbers = #tpu.dot_dimension_numbers<[1], [0], [0], [1], [0, 0, 1, 1], [], []>} : vector<8x8xbf16>, vector<8x8xbf16>, vector<8x8xf32> -> vector<8x8xf32>
    %cst_27 = arith.constant dense<0xFF800000> : vector<8xf32>
    %54 = vector.multi_reduction <maximumf>, %53, %cst_27 [1] : vector<8x8xf32> to vector<8xf32>
    %55 = vector.shape_cast %54 : vector<8xf32> to vector<8x1xf32>
    %56 = vector.broadcast %55 : vector<8x1xf32> to vector<8x8xf32>
    %57 = arith.subf %53, %56 : vector<8x8xf32>
    %58 = math.exp %57 : vector<8x8xf32>
    %cst_28 = arith.constant dense<0.000000e+00> : vector<8xf32>
    %59 = vector.multi_reduction <add>, %58, %cst_28 [1] : vector<8x8xf32> to vector<8xf32>
    %60 = vector.shape_cast %59 : vector<8xf32> to vector<8x1xf32>
    %61 = vector.broadcast %60 : vector<8x1xf32> to vector<8x8xf32>
    %62 = arith.divf %58, %61 : vector<8x8xf32>
    %63 = vector.extract_strided_slice %23 {offsets = [0, 8], sizes = [8, 8], strides = [1, 1]} : vector<8x32xf32> to vector<8x8xf32>
    %64 = arith.truncf %62 : vector<8x8xf32> to vector<8x8xbf16>
    %65 = arith.truncf %63 : vector<8x8xf32> to vector<8x8xbf16>
    %cst_29 = arith.constant dense<0.000000e+00> : vector<8x8xf32>
    %66 = tpu.matmul %64, %65, %cst_29 {dimension_numbers = #tpu.dot_dimension_numbers<[1], [0], [0], [1], [0, 0, 1, 1], [], []>} : vector<8x8xbf16>, vector<8x8xbf16>, vector<8x8xf32> -> vector<8x8xf32>
    %c0_30 = arith.constant 0 : index
    %c8 = arith.constant 8 : index
    %67 = vector.load %arg32[%c0_30, %c8] : memref<8x32xf32, #tpu.memory_space<vmem>>, vector<8x8xf32>
    tpu.vector_store %arg32[%c0_30, %c8], %66 {strides = array<i32>} : memref<8x32xf32, #tpu.memory_space<vmem>>, vector<8x8xf32>,
    %68 = vector.extract_strided_slice %15 {offsets = [0, 16], sizes = [8, 8], strides = [1, 1]} : vector<8x64xf32> to vector<8x8xf32>
    %cst_31 = arith.constant 0.353553385 : f32
    %69 = vector.broadcast %cst_31 : f32 to vector<8x8xf32>
    %70 = arith.mulf %68, %69 : vector<8x8xf32>
    %71 = vector.extract_strided_slice %25 {offsets = [16, 0], sizes = [8, 8], strides = [1, 1]} : vector<32x8xf32> to vector<8x8xf32>
    %72 = arith.truncf %70 : vector<8x8xf32> to vector<8x8xbf16>
    %73 = arith.truncf %71 : vector<8x8xf32> to vector<8x8xbf16>
    %cst_32 = arith.constant dense<0.000000e+00> : vector<8x8xf32>
    %74 = tpu.matmul %72, %73, %cst_32 {dimension_numbers = #tpu.dot_dimension_numbers<[1], [0], [0], [1], [0, 0, 1, 1], [], []>} : vector<8x8xbf16>, vector<8x8xbf16>, vector<8x8xf32> -> vector<8x8xf32>
    %cst_33 = arith.constant dense<0xFF800000> : vector<8xf32>
    %75 = vector.multi_reduction <maximumf>, %74, %cst_33 [1] : vector<8x8xf32> to vector<8xf32>
    %76 = vector.shape_cast %75 : vector<8xf32> to vector<8x1xf32>
    %77 = vector.broadcast %76 : vector<8x1xf32> to vector<8x8xf32>
    %78 = arith.subf %74, %77 : vector<8x8xf32>
    %79 = math.exp %78 : vector<8x8xf32>
    %cst_34 = arith.constant dense<0.000000e+00> : vector<8xf32>
    %80 = vector.multi_reduction <add>, %79, %cst_34 [1] : vector<8x8xf32> to vector<8xf32>
    %81 = vector.shape_cast %80 : vector<8xf32> to vector<8x1xf32>
    %82 = vector.broadcast %81 : vector<8x1xf32> to vector<8x8xf32>
    %83 = arith.divf %79, %82 : vector<8x8xf32>
    %84 = vector.extract_strided_slice %23 {offsets = [0, 16], sizes = [8, 8], strides = [1, 1]} : vector<8x32xf32> to vector<8x8xf32>
    %85 = arith.truncf %83 : vector<8x8xf32> to vector<8x8xbf16>
    %86 = arith.truncf %84 : vector<8x8xf32> to vector<8x8xbf16>
    %cst_35 = arith.constant dense<0.000000e+00> : vector<8x8xf32>
    %87 = tpu.matmul %85, %86, %cst_35 {dimension_numbers = #tpu.dot_dimension_numbers<[1], [0], [0], [1], [0, 0, 1, 1], [], []>} : vector<8x8xbf16>, vector<8x8xbf16>, vector<8x8xf32> -> vector<8x8xf32>
    %c0_36 = arith.constant 0 : index
    %c16 = arith.constant 16 : index
    %88 = vector.load %arg32[%c0_36, %c16] : memref<8x32xf32, #tpu.memory_space<vmem>>, vector<8x8xf32>
    tpu.vector_store %arg32[%c0_36, %c16], %87 {strides = array<i32>} : memref<8x32xf32, #tpu.memory_space<vmem>>, vector<8x8xf32>,
    %89 = vector.extract_strided_slice %15 {offsets = [0, 24], sizes = [8, 8], strides = [1, 1]} : vector<8x64xf32> to vector<8x8xf32>
    %cst_37 = arith.constant 0.353553385 : f32
    %90 = vector.broadcast %cst_37 : f32 to vector<8x8xf32>
    %91 = arith.mulf %89, %90 : vector<8x8xf32>
    %92 = vector.extract_strided_slice %25 {offsets = [24, 0], sizes = [8, 8], strides = [1, 1]} : vector<32x8xf32> to vector<8x8xf32>
    %93 = arith.truncf %91 : vector<8x8xf32> to vector<8x8xbf16>
    %94 = arith.truncf %92 : vector<8x8xf32> to vector<8x8xbf16>
    %cst_38 = arith.constant dense<0.000000e+00> : vector<8x8xf32>
    %95 = tpu.matmul %93, %94, %cst_38 {dimension_numbers = #tpu.dot_dimension_numbers<[1], [0], [0], [1], [0, 0, 1, 1], [], []>} : vector<8x8xbf16>, vector<8x8xbf16>, vector<8x8xf32> -> vector<8x8xf32>
    %cst_39 = arith.constant dense<0xFF800000> : vector<8xf32>
    %96 = vector.multi_reduction <maximumf>, %95, %cst_39 [1] : vector<8x8xf32> to vector<8xf32>
    %97 = vector.shape_cast %96 : vector<8xf32> to vector<8x1xf32>
    %98 = vector.broadcast %97 : vector<8x1xf32> to vector<8x8xf32>
    %99 = arith.subf %95, %98 : vector<8x8xf32>
    %100 = math.exp %99 : vector<8x8xf32>
    %cst_40 = arith.constant dense<0.000000e+00> : vector<8xf32>
    %101 = vector.multi_reduction <add>, %100, %cst_40 [1] : vector<8x8xf32> to vector<8xf32>
    %102 = vector.shape_cast %101 : vector<8xf32> to vector<8x1xf32>
    %103 = vector.broadcast %102 : vector<8x1xf32> to vector<8x8xf32>
    %104 = arith.divf %100, %103 : vector<8x8xf32>
    %105 = vector.extract_strided_slice %23 {offsets = [0, 24], sizes = [8, 8], strides = [1, 1]} : vector<8x32xf32> to vector<8x8xf32>
    %106 = arith.truncf %104 : vector<8x8xf32> to vector<8x8xbf16>
    %107 = arith.truncf %105 : vector<8x8xf32> to vector<8x8xbf16>
    %cst_41 = arith.constant dense<0.000000e+00> : vector<8x8xf32>
    %108 = tpu.matmul %106, %107, %cst_41 {dimension_numbers = #tpu.dot_dimension_numbers<[1], [0], [0], [1], [0, 0, 1, 1], [], []>} : vector<8x8xbf16>, vector<8x8xbf16>, vector<8x8xf32> -> vector<8x8xf32>
    %c0_42 = arith.constant 0 : index
    %c24 = arith.constant 24 : index
    %109 = vector.load %arg32[%c0_42, %c24] : memref<8x32xf32, #tpu.memory_space<vmem>>, vector<8x8xf32>
    tpu.vector_store %arg32[%c0_42, %c24], %108 {strides = array<i32>} : memref<8x32xf32, #tpu.memory_space<vmem>>, vector<8x8xf32>,
    %c0_43 = arith.constant 0 : index
    %c0_44 = arith.constant 0 : index
    %110 = vector.load %arg32[%c0_43, %c0_44] : memref<8x32xf32, #tpu.memory_space<vmem>>, vector<8x32xf32>
    %c0_45 = arith.constant 0 : index
    %c0_46 = arith.constant 0 : index
    %c0_47 = arith.constant 0 : index
    %111 = vector.load %arg12[%c0_45, %c0_46, %c0_47] : memref<1x32x32xbf16, #tpu.memory_space<vmem>>, vector<1x32x32xbf16>
    %112 = vector.shape_cast %111 : vector<1x32x32xbf16> to vector<32x32xbf16>
    %113 = arith.truncf %110 : vector<8x32xf32> to vector<8x32xbf16>
    %cst_48 = arith.constant dense<0.000000e+00> : vector<8x32xf32>
    %114 = tpu.matmul %113, %112, %cst_48 {dimension_numbers = #tpu.dot_dimension_numbers<[1], [0], [0], [1], [0, 0, 1, 1], [], []>} : vector<8x32xbf16>, vector<32x32xbf16>, vector<8x32xf32> -> vector<8x32xf32>
    %c0_49 = arith.constant 0 : index
    %c0_50 = arith.constant 0 : index
    %c0_51 = arith.constant 0 : index
    %115 = vector.load %arg13[%c0_49, %c0_50, %c0_51] : memref<1x1x32xf32, #tpu.memory_space<vmem>>, vector<1x1x32xf32>
    %116 = vector.shape_cast %115 : vector<1x1x32xf32> to vector<1x32xf32>
    %117 = vector.broadcast %116 : vector<1x32xf32> to vector<8x32xf32>
    %118 = arith.addf %114, %117 : vector<8x32xf32>
    %119 = arith.addf %3, %118 : vector<8x32xf32>
    %c0_52 = arith.constant 0 : index
    %c0_53 = arith.constant 0 : index
    %c0_54 = arith.constant 0 : index
    %120 = vector.load %arg14[%c0_52, %c0_53, %c0_54] : memref<1x1x32xf32, #tpu.memory_space<vmem>>, vector<1x1x32xf32>
    %121 = vector.shape_cast %120 : vector<1x1x32xf32> to vector<1x32xf32>
    %c0_55 = arith.constant 0 : index
    %c0_56 = arith.constant 0 : index
    %c0_57 = arith.constant 0 : index
    %122 = vector.load %arg15[%c0_55, %c0_56, %c0_57] : memref<1x1x32xf32, #tpu.memory_space<vmem>>, vector<1x1x32xf32>
    %123 = vector.shape_cast %122 : vector<1x1x32xf32> to vector<1x32xf32>
    %cst_58 = arith.constant dense<0.000000e+00> : vector<8xf32>
    %124 = vector.multi_reduction <add>, %119, %cst_58 [1] : vector<8x32xf32> to vector<8xf32>
    %125 = vector.shape_cast %124 : vector<8xf32> to vector<8x1xf32>
    %cst_59 = arith.constant 3.200000e+01 : f32
    %126 = vector.broadcast %cst_59 : f32 to vector<8x1xf32>
    %127 = arith.divf %125, %126 : vector<8x1xf32>
    %128 = vector.broadcast %127 : vector<8x1xf32> to vector<8x32xf32>
    %129 = arith.subf %119, %128 : vector<8x32xf32>
    %130 = arith.mulf %129, %129 : vector<8x32xf32>
    %cst_60 = arith.constant dense<0.000000e+00> : vector<8xf32>
    %131 = vector.multi_reduction <add>, %130, %cst_60 [1] : vector<8x32xf32> to vector<8xf32>
    %132 = vector.shape_cast %131 : vector<8xf32> to vector<8x1xf32>
    %cst_61 = arith.constant 3.200000e+01 : f32
    %133 = vector.broadcast %cst_61 : f32 to vector<8x1xf32>
    %134 = arith.divf %132, %133 : vector<8x1xf32>
    %135 = vector.broadcast %127 : vector<8x1xf32> to vector<8x32xf32>
    %136 = arith.subf %119, %135 : vector<8x32xf32>
    %cst_62 = arith.constant 9.99999974E-6 : f32
    %137 = vector.broadcast %cst_62 : f32 to vector<8x1xf32>
    %138 = arith.addf %134, %137 : vector<8x1xf32>
    %139 = math.rsqrt %138 : vector<8x1xf32>
    %140 = vector.broadcast %139 : vector<8x1xf32> to vector<8x32xf32>
    %141 = arith.mulf %136, %140 : vector<8x32xf32>
    %142 = vector.broadcast %121 : vector<1x32xf32> to vector<8x32xf32>
    %143 = arith.mulf %141, %142 : vector<8x32xf32>
    %144 = vector.broadcast %123 : vector<1x32xf32> to vector<8x32xf32>
    %145 = arith.addf %143, %144 : vector<8x32xf32>
    %146 = arith.addf %145, %6 : vector<8x32xf32>
    %c0_63 = arith.constant 0 : index
    %c0_64 = arith.constant 0 : index
    %c0_65 = arith.constant 0 : index
    %147 = vector.load %arg4[%c0_63, %c0_64, %c0_65] : memref<1x80x32xbf16, #tpu.memory_space<vmem>>, vector<1x80x32xbf16>
    %148 = vector.shape_cast %147 : vector<1x80x32xbf16> to vector<80x32xbf16>
    %c0_66 = arith.constant 0 : index
    %c0_67 = arith.constant 0 : index
    %c0_68 = arith.constant 0 : index
    %149 = vector.load %arg16[%c0_66, %c0_67, %c0_68] : memref<1x32x32xbf16, #tpu.memory_space<vmem>>, vector<1x32x32xbf16>
    %150 = vector.shape_cast %149 : vector<1x32x32xbf16> to vector<32x32xbf16>
    %cst_69 = arith.constant dense<0.000000e+00> : vector<80x32xf32>
    %151 = tpu.matmul %148, %150, %cst_69 {dimension_numbers = #tpu.dot_dimension_numbers<[1], [0], [0], [1], [0, 0, 1, 1], [], []>} : vector<80x32xbf16>, vector<32x32xbf16>, vector<80x32xf32> -> vector<80x32xf32>
    %c0_70 = arith.constant 0 : index
    %c0_71 = arith.constant 0 : index
    %c0_72 = arith.constant 0 : index
    %152 = vector.load %arg17[%c0_70, %c0_71, %c0_72] : memref<1x1x32xf32, #tpu.memory_space<vmem>>, vector<1x1x32xf32>
    %153 = vector.shape_cast %152 : vector<1x1x32xf32> to vector<1x32xf32>
    %154 = vector.broadcast %153 : vector<1x32xf32> to vector<80x32xf32>
    %155 = arith.addf %151, %154 : vector<80x32xf32>
    %c0_73 = arith.constant 0 : index
    %c0_74 = arith.constant 0 : index
    %c0_75 = arith.constant 0 : index
    %156 = vector.load %arg5[%c0_73, %c0_74, %c0_75] : memref<1x80x1xf32, #tpu.memory_space<vmem>>, vector<1x80x1xf32>
    %157 = vector.shape_cast %156 : vector<1x80x1xf32> to vector<80x1xf32>
    %158 = vector.broadcast %157 : vector<80x1xf32> to vector<80x32xf32>
    %159 = arith.mulf %155, %158 : vector<80x32xf32>
    %c0_76 = arith.constant 0 : index
    %c0_77 = arith.constant 0 : index
    %c0_78 = arith.constant 0 : index
    %160 = vector.load %arg18[%c0_76, %c0_77, %c0_78] : memref<1x32x48xf32, #tpu.memory_space<vmem>>, vector<1x32x48xf32>
    %161 = vector.shape_cast %160 : vector<1x32x48xf32> to vector<32x48xf32>
    %cst_79 = arith.constant dense<0.000000e+00> : vector<8x48xf32>
    %162 = tpu.matmul %146, %161, %cst_79 {dimension_numbers = #tpu.dot_dimension_numbers<[1], [0], [0], [1], [0, 0, 1, 1], [], []>} : vector<8x32xf32>, vector<32x48xf32>, vector<8x48xf32> -> vector<8x48xf32>
    %c0_80 = arith.constant 0 : index
    %c0_81 = arith.constant 0 : index
    %c0_82 = arith.constant 0 : index
    %163 = vector.load %arg19[%c0_80, %c0_81, %c0_82] : memref<1x1x48xf32, #tpu.memory_space<vmem>>, vector<1x1x48xf32>
    %164 = vector.shape_cast %163 : vector<1x1x48xf32> to vector<1x48xf32>
    %165 = vector.broadcast %164 : vector<1x48xf32> to vector<8x48xf32>
    %166 = arith.addf %162, %165 : vector<8x48xf32>
    %167 = vector.extract_strided_slice %166 {offsets = [0, 32], sizes = [8, 16], strides = [1, 1]} : vector<8x48xf32> to vector<8x16xf32>
    %cst_83 = arith.constant dense<0xFF800000> : vector<8xf32>
    %168 = vector.multi_reduction <maximumf>, %167, %cst_83 [1] : vector<8x16xf32> to vector<8xf32>
    %169 = vector.shape_cast %168 : vector<8xf32> to vector<8x1xf32>
    %170 = vector.broadcast %169 : vector<8x1xf32> to vector<8x16xf32>
    %171 = arith.subf %167, %170 : vector<8x16xf32>
    %172 = math.exp %171 : vector<8x16xf32>
    %173 = vector.extract_strided_slice %172 {offsets = [0, 0], sizes = [8, 4], strides = [1, 1]} : vector<8x16xf32> to vector<8x4xf32>
    %cst_84 = arith.constant dense<0.000000e+00> : vector<8xf32>
    %174 = vector.multi_reduction <add>, %173, %cst_84 [1] : vector<8x4xf32> to vector<8xf32>
    %175 = vector.shape_cast %174 : vector<8xf32> to vector<8x1xf32>
    %176 = vector.broadcast %175 : vector<8x1xf32> to vector<8x4xf32>
    %177 = arith.divf %173, %176 : vector<8x4xf32>
    %178 = vector.extract_strided_slice %172 {offsets = [0, 4], sizes = [8, 4], strides = [1, 1]} : vector<8x16xf32> to vector<8x4xf32>
    %cst_85 = arith.constant dense<0.000000e+00> : vector<8xf32>
    %179 = vector.multi_reduction <add>, %178, %cst_85 [1] : vector<8x4xf32> to vector<8xf32>
    %180 = vector.shape_cast %179 : vector<8xf32> to vector<8x1xf32>
    %181 = vector.broadcast %180 : vector<8x1xf32> to vector<8x4xf32>
    %182 = arith.divf %178, %181 : vector<8x4xf32>
    %183 = vector.extract_strided_slice %172 {offsets = [0, 8], sizes = [8, 4], strides = [1, 1]} : vector<8x16xf32> to vector<8x4xf32>
    %cst_86 = arith.constant dense<0.000000e+00> : vector<8xf32>
    %184 = vector.multi_reduction <add>, %183, %cst_86 [1] : vector<8x4xf32> to vector<8xf32>
    %185 = vector.shape_cast %184 : vector<8xf32> to vector<8x1xf32>
    %186 = vector.broadcast %185 : vector<8x1xf32> to vector<8x4xf32>
    %187 = arith.divf %183, %186 : vector<8x4xf32>
    %188 = vector.extract_strided_slice %172 {offsets = [0, 12], sizes = [8, 4], strides = [1, 1]} : vector<8x16xf32> to vector<8x4xf32>
    %cst_87 = arith.constant dense<0.000000e+00> : vector<8xf32>
    %189 = vector.multi_reduction <add>, %188, %cst_87 [1] : vector<8x4xf32> to vector<8xf32>
    %190 = vector.shape_cast %189 : vector<8xf32> to vector<8x1xf32>
    %191 = vector.broadcast %190 : vector<8x1xf32> to vector<8x4xf32>
    %192 = arith.divf %188, %191 : vector<8x4xf32>
    %c0_88 = arith.constant 0 : index
    %c0_89 = arith.constant 0 : index
    %c0_90 = arith.constant 0 : index
    %193 = vector.load %arg6[%c0_88, %c0_89, %c0_90] : memref<1x8x4xf32, #tpu.memory_space<vmem>>, vector<1x8x4xf32>
    %194 = vector.shape_cast %193 : vector<1x8x4xf32> to vector<8x4xf32>
    %c0_91 = arith.constant 0 : index
    %c0_92 = arith.constant 0 : index
    %195 = vector.load %arg7[%c0_91, %c0_92] : memref<2x80xf32, #tpu.memory_space<vmem>>, vector<2x80xf32>
    %cst_93 = arith.constant 0.000000e+00 : f32
    %196 = vector.broadcast %cst_93 : f32 to vector<8x8xf32>
    %cst_94 = arith.constant 0.000000e+00 : f32
    %197 = vector.broadcast %cst_94 : f32 to vector<8x8xf32>
    %cst_95 = arith.constant 0.000000e+00 : f32
    %198 = vector.broadcast %cst_95 : f32 to vector<8x8xf32>
    %cst_96 = arith.constant 0.000000e+00 : f32
    %199 = vector.broadcast %cst_96 : f32 to vector<8x8xf32>
    %200 = vector.extract_strided_slice %195 {offsets = [0, 0], sizes = [1, 64], strides = [1, 1]} : vector<2x80xf32> to vector<1x64xf32>
    %201 = vector.extract_strided_slice %195 {offsets = [1, 0], sizes = [1, 64], strides = [1, 1]} : vector<2x80xf32> to vector<1x64xf32>
    %202 = vector.extract_strided_slice %194 {offsets = [0, 0], sizes = [8, 1], strides = [1, 1]} : vector<8x4xf32> to vector<8x1xf32>
    %cst_97 = arith.constant 8.000000e+00 : f32
    %203 = vector.broadcast %cst_97 : f32 to vector<8x1xf32>
    %204 = arith.mulf %202, %203 : vector<8x1xf32>
    %cst_98 = arith.constant 5.000000e-01 : f32
    %205 = vector.broadcast %cst_98 : f32 to vector<8x1xf32>
    %206 = arith.subf %204, %205 : vector<8x1xf32>
    %207 = vector.extract_strided_slice %194 {offsets = [0, 1], sizes = [8, 1], strides = [1, 1]} : vector<8x4xf32> to vector<8x1xf32>
    %cst_99 = arith.constant 8.000000e+00 : f32
    %208 = vector.broadcast %cst_99 : f32 to vector<8x1xf32>
    %209 = arith.mulf %207, %208 : vector<8x1xf32>
    %cst_100 = arith.constant 5.000000e-01 : f32
    %210 = vector.broadcast %cst_100 : f32 to vector<8x1xf32>
    %211 = arith.subf %209, %210 : vector<8x1xf32>
    %212 = vector.extract_strided_slice %159 {offsets = [0, 0], sizes = [64, 32], strides = [1, 1]} : vector<80x32xf32> to vector<64x32xf32>
    %cst_101 = arith.constant 0.000000e+00 : f32
    %213 = vector.broadcast %cst_101 : f32 to vector<8x64xf32>
    %214 = vector.extract_strided_slice %166 {offsets = [0, 0], sizes = [8, 1], strides = [1, 1]} : vector<8x48xf32> to vector<8x1xf32>
    %215 = arith.addf %206, %214 : vector<8x1xf32>
    %216 = vector.extract_strided_slice %166 {offsets = [0, 1], sizes = [8, 1], strides = [1, 1]} : vector<8x48xf32> to vector<8x1xf32>
    %217 = arith.addf %211, %216 : vector<8x1xf32>
    %218 = vector.broadcast %215 : vector<8x1xf32> to vector<8x64xf32>
    %219 = vector.broadcast %200 : vector<1x64xf32> to vector<8x64xf32>
    %220 = arith.subf %218, %219 : vector<8x64xf32>
    %221 = math.absf %220 : vector<8x64xf32>
    %cst_102 = arith.constant 1.000000e+00 : f32
    %222 = vector.broadcast %cst_102 : f32 to vector<8x64xf32>
    %223 = arith.subf %222, %221 : vector<8x64xf32>
    %cst_103 = arith.constant 0.000000e+00 : f32
    %224 = vector.broadcast %cst_103 : f32 to vector<8x64xf32>
    %225 = arith.maximumf %223, %224 : vector<8x64xf32>
    %226 = vector.broadcast %217 : vector<8x1xf32> to vector<8x64xf32>
    %227 = vector.broadcast %201 : vector<1x64xf32> to vector<8x64xf32>
    %228 = arith.subf %226, %227 : vector<8x64xf32>
    %229 = math.absf %228 : vector<8x64xf32>
    %cst_104 = arith.constant 1.000000e+00 : f32
    %230 = vector.broadcast %cst_104 : f32 to vector<8x64xf32>
    %231 = arith.subf %230, %229 : vector<8x64xf32>
    %cst_105 = arith.constant 0.000000e+00 : f32
    %232 = vector.broadcast %cst_105 : f32 to vector<8x64xf32>
    %233 = arith.maximumf %231, %232 : vector<8x64xf32>
    %234 = arith.mulf %225, %233 : vector<8x64xf32>
    %235 = vector.extract_strided_slice %177 {offsets = [0, 0], sizes = [8, 1], strides = [1, 1]} : vector<8x4xf32> to vector<8x1xf32>
    %236 = vector.broadcast %235 : vector<8x1xf32> to vector<8x64xf32>
    %237 = arith.mulf %236, %234 : vector<8x64xf32>
    %238 = arith.addf %213, %237 : vector<8x64xf32>
    %239 = vector.extract_strided_slice %166 {offsets = [0, 2], sizes = [8, 1], strides = [1, 1]} : vector<8x48xf32> to vector<8x1xf32>
    %240 = arith.addf %206, %239 : vector<8x1xf32>
    %241 = vector.extract_strided_slice %166 {offsets = [0, 3], sizes = [8, 1], strides = [1, 1]} : vector<8x48xf32> to vector<8x1xf32>
    %242 = arith.addf %211, %241 : vector<8x1xf32>
    %243 = vector.broadcast %240 : vector<8x1xf32> to vector<8x64xf32>
    %244 = vector.broadcast %200 : vector<1x64xf32> to vector<8x64xf32>
    %245 = arith.subf %243, %244 : vector<8x64xf32>
    %246 = math.absf %245 : vector<8x64xf32>
    %cst_106 = arith.constant 1.000000e+00 : f32
    %247 = vector.broadcast %cst_106 : f32 to vector<8x64xf32>
    %248 = arith.subf %247, %246 : vector<8x64xf32>
    %cst_107 = arith.constant 0.000000e+00 : f32
    %249 = vector.broadcast %cst_107 : f32 to vector<8x64xf32>
    %250 = arith.maximumf %248, %249 : vector<8x64xf32>
    %251 = vector.broadcast %242 : vector<8x1xf32> to vector<8x64xf32>
    %252 = vector.broadcast %201 : vector<1x64xf32> to vector<8x64xf32>
    %253 = arith.subf %251, %252 : vector<8x64xf32>
    %254 = math.absf %253 : vector<8x64xf32>
    %cst_108 = arith.constant 1.000000e+00 : f32
    %255 = vector.broadcast %cst_108 : f32 to vector<8x64xf32>
    %256 = arith.subf %255, %254 : vector<8x64xf32>
    %cst_109 = arith.constant 0.000000e+00 : f32
    %257 = vector.broadcast %cst_109 : f32 to vector<8x64xf32>
    %258 = arith.maximumf %256, %257 : vector<8x64xf32>
    %259 = arith.mulf %250, %258 : vector<8x64xf32>
    %260 = vector.extract_strided_slice %177 {offsets = [0, 1], sizes = [8, 1], strides = [1, 1]} : vector<8x4xf32> to vector<8x1xf32>
    %261 = vector.broadcast %260 : vector<8x1xf32> to vector<8x64xf32>
    %262 = arith.mulf %261, %259 : vector<8x64xf32>
    %263 = arith.addf %238, %262 : vector<8x64xf32>
    %264 = vector.extract_strided_slice %212 {offsets = [0, 0], sizes = [64, 8], strides = [1, 1]} : vector<64x32xf32> to vector<64x8xf32>
    %265 = arith.truncf %263 : vector<8x64xf32> to vector<8x64xbf16>
    %266 = arith.truncf %264 : vector<64x8xf32> to vector<64x8xbf16>
    %cst_110 = arith.constant dense<0.000000e+00> : vector<8x8xf32>
    %267 = tpu.matmul %265, %266, %cst_110 {dimension_numbers = #tpu.dot_dimension_numbers<[1], [0], [0], [1], [0, 0, 1, 1], [], []>} : vector<8x64xbf16>, vector<64x8xbf16>, vector<8x8xf32> -> vector<8x8xf32>
    %268 = arith.addf %196, %267 : vector<8x8xf32>
    %cst_111 = arith.constant 0.000000e+00 : f32
    %269 = vector.broadcast %cst_111 : f32 to vector<8x64xf32>
    %270 = vector.extract_strided_slice %166 {offsets = [0, 8], sizes = [8, 1], strides = [1, 1]} : vector<8x48xf32> to vector<8x1xf32>
    %271 = arith.addf %206, %270 : vector<8x1xf32>
    %272 = vector.extract_strided_slice %166 {offsets = [0, 9], sizes = [8, 1], strides = [1, 1]} : vector<8x48xf32> to vector<8x1xf32>
    %273 = arith.addf %211, %272 : vector<8x1xf32>
    %274 = vector.broadcast %271 : vector<8x1xf32> to vector<8x64xf32>
    %275 = vector.broadcast %200 : vector<1x64xf32> to vector<8x64xf32>
    %276 = arith.subf %274, %275 : vector<8x64xf32>
    %277 = math.absf %276 : vector<8x64xf32>
    %cst_112 = arith.constant 1.000000e+00 : f32
    %278 = vector.broadcast %cst_112 : f32 to vector<8x64xf32>
    %279 = arith.subf %278, %277 : vector<8x64xf32>
    %cst_113 = arith.constant 0.000000e+00 : f32
    %280 = vector.broadcast %cst_113 : f32 to vector<8x64xf32>
    %281 = arith.maximumf %279, %280 : vector<8x64xf32>
    %282 = vector.broadcast %273 : vector<8x1xf32> to vector<8x64xf32>
    %283 = vector.broadcast %201 : vector<1x64xf32> to vector<8x64xf32>
    %284 = arith.subf %282, %283 : vector<8x64xf32>
    %285 = math.absf %284 : vector<8x64xf32>
    %cst_114 = arith.constant 1.000000e+00 : f32
    %286 = vector.broadcast %cst_114 : f32 to vector<8x64xf32>
    %287 = arith.subf %286, %285 : vector<8x64xf32>
    %cst_115 = arith.constant 0.000000e+00 : f32
    %288 = vector.broadcast %cst_115 : f32 to vector<8x64xf32>
    %289 = arith.maximumf %287, %288 : vector<8x64xf32>
    %290 = arith.mulf %281, %289 : vector<8x64xf32>
    %291 = vector.extract_strided_slice %182 {offsets = [0, 0], sizes = [8, 1], strides = [1, 1]} : vector<8x4xf32> to vector<8x1xf32>
    %292 = vector.broadcast %291 : vector<8x1xf32> to vector<8x64xf32>
    %293 = arith.mulf %292, %290 : vector<8x64xf32>
    %294 = arith.addf %269, %293 : vector<8x64xf32>
    %295 = vector.extract_strided_slice %166 {offsets = [0, 10], sizes = [8, 1], strides = [1, 1]} : vector<8x48xf32> to vector<8x1xf32>
    %296 = arith.addf %206, %295 : vector<8x1xf32>
    %297 = vector.extract_strided_slice %166 {offsets = [0, 11], sizes = [8, 1], strides = [1, 1]} : vector<8x48xf32> to vector<8x1xf32>
    %298 = arith.addf %211, %297 : vector<8x1xf32>
    %299 = vector.broadcast %296 : vector<8x1xf32> to vector<8x64xf32>
    %300 = vector.broadcast %200 : vector<1x64xf32> to vector<8x64xf32>
    %301 = arith.subf %299, %300 : vector<8x64xf32>
    %302 = math.absf %301 : vector<8x64xf32>
    %cst_116 = arith.constant 1.000000e+00 : f32
    %303 = vector.broadcast %cst_116 : f32 to vector<8x64xf32>
    %304 = arith.subf %303, %302 : vector<8x64xf32>
    %cst_117 = arith.constant 0.000000e+00 : f32
    %305 = vector.broadcast %cst_117 : f32 to vector<8x64xf32>
    %306 = arith.maximumf %304, %305 : vector<8x64xf32>
    %307 = vector.broadcast %298 : vector<8x1xf32> to vector<8x64xf32>
    %308 = vector.broadcast %201 : vector<1x64xf32> to vector<8x64xf32>
    %309 = arith.subf %307, %308 : vector<8x64xf32>
    %310 = math.absf %309 : vector<8x64xf32>
    %cst_118 = arith.constant 1.000000e+00 : f32
    %311 = vector.broadcast %cst_118 : f32 to vector<8x64xf32>
    %312 = arith.subf %311, %310 : vector<8x64xf32>
    %cst_119 = arith.constant 0.000000e+00 : f32
    %313 = vector.broadcast %cst_119 : f32 to vector<8x64xf32>
    %314 = arith.maximumf %312, %313 : vector<8x64xf32>
    %315 = arith.mulf %306, %314 : vector<8x64xf32>
    %316 = vector.extract_strided_slice %182 {offsets = [0, 1], sizes = [8, 1], strides = [1, 1]} : vector<8x4xf32> to vector<8x1xf32>
    %317 = vector.broadcast %316 : vector<8x1xf32> to vector<8x64xf32>
    %318 = arith.mulf %317, %315 : vector<8x64xf32>
    %319 = arith.addf %294, %318 : vector<8x64xf32>
    %320 = vector.extract_strided_slice %212 {offsets = [0, 8], sizes = [64, 8], strides = [1, 1]} : vector<64x32xf32> to vector<64x8xf32>
    %321 = arith.truncf %319 : vector<8x64xf32> to vector<8x64xbf16>
    %322 = arith.truncf %320 : vector<64x8xf32> to vector<64x8xbf16>
    %cst_120 = arith.constant dense<0.000000e+00> : vector<8x8xf32>
    %323 = tpu.matmul %321, %322, %cst_120 {dimension_numbers = #tpu.dot_dimension_numbers<[1], [0], [0], [1], [0, 0, 1, 1], [], []>} : vector<8x64xbf16>, vector<64x8xbf16>, vector<8x8xf32> -> vector<8x8xf32>
    %324 = arith.addf %197, %323 : vector<8x8xf32>
    %cst_121 = arith.constant 0.000000e+00 : f32
    %325 = vector.broadcast %cst_121 : f32 to vector<8x64xf32>
    %326 = vector.extract_strided_slice %166 {offsets = [0, 16], sizes = [8, 1], strides = [1, 1]} : vector<8x48xf32> to vector<8x1xf32>
    %327 = arith.addf %206, %326 : vector<8x1xf32>
    %328 = vector.extract_strided_slice %166 {offsets = [0, 17], sizes = [8, 1], strides = [1, 1]} : vector<8x48xf32> to vector<8x1xf32>
    %329 = arith.addf %211, %328 : vector<8x1xf32>
    %330 = vector.broadcast %327 : vector<8x1xf32> to vector<8x64xf32>
    %331 = vector.broadcast %200 : vector<1x64xf32> to vector<8x64xf32>
    %332 = arith.subf %330, %331 : vector<8x64xf32>
    %333 = math.absf %332 : vector<8x64xf32>
    %cst_122 = arith.constant 1.000000e+00 : f32
    %334 = vector.broadcast %cst_122 : f32 to vector<8x64xf32>
    %335 = arith.subf %334, %333 : vector<8x64xf32>
    %cst_123 = arith.constant 0.000000e+00 : f32
    %336 = vector.broadcast %cst_123 : f32 to vector<8x64xf32>
    %337 = arith.maximumf %335, %336 : vector<8x64xf32>
    %338 = vector.broadcast %329 : vector<8x1xf32> to vector<8x64xf32>
    %339 = vector.broadcast %201 : vector<1x64xf32> to vector<8x64xf32>
    %340 = arith.subf %338, %339 : vector<8x64xf32>
    %341 = math.absf %340 : vector<8x64xf32>
    %cst_124 = arith.constant 1.000000e+00 : f32
    %342 = vector.broadcast %cst_124 : f32 to vector<8x64xf32>
    %343 = arith.subf %342, %341 : vector<8x64xf32>
    %cst_125 = arith.constant 0.000000e+00 : f32
    %344 = vector.broadcast %cst_125 : f32 to vector<8x64xf32>
    %345 = arith.maximumf %343, %344 : vector<8x64xf32>
    %346 = arith.mulf %337, %345 : vector<8x64xf32>
    %347 = vector.extract_strided_slice %187 {offsets = [0, 0], sizes = [8, 1], strides = [1, 1]} : vector<8x4xf32> to vector<8x1xf32>
    %348 = vector.broadcast %347 : vector<8x1xf32> to vector<8x64xf32>
    %349 = arith.mulf %348, %346 : vector<8x64xf32>
    %350 = arith.addf %325, %349 : vector<8x64xf32>
    %351 = vector.extract_strided_slice %166 {offsets = [0, 18], sizes = [8, 1], strides = [1, 1]} : vector<8x48xf32> to vector<8x1xf32>
    %352 = arith.addf %206, %351 : vector<8x1xf32>
    %353 = vector.extract_strided_slice %166 {offsets = [0, 19], sizes = [8, 1], strides = [1, 1]} : vector<8x48xf32> to vector<8x1xf32>
    %354 = arith.addf %211, %353 : vector<8x1xf32>
    %355 = vector.broadcast %352 : vector<8x1xf32> to vector<8x64xf32>
    %356 = vector.broadcast %200 : vector<1x64xf32> to vector<8x64xf32>
    %357 = arith.subf %355, %356 : vector<8x64xf32>
    %358 = math.absf %357 : vector<8x64xf32>
    %cst_126 = arith.constant 1.000000e+00 : f32
    %359 = vector.broadcast %cst_126 : f32 to vector<8x64xf32>
    %360 = arith.subf %359, %358 : vector<8x64xf32>
    %cst_127 = arith.constant 0.000000e+00 : f32
    %361 = vector.broadcast %cst_127 : f32 to vector<8x64xf32>
    %362 = arith.maximumf %360, %361 : vector<8x64xf32>
    %363 = vector.broadcast %354 : vector<8x1xf32> to vector<8x64xf32>
    %364 = vector.broadcast %201 : vector<1x64xf32> to vector<8x64xf32>
    %365 = arith.subf %363, %364 : vector<8x64xf32>
    %366 = math.absf %365 : vector<8x64xf32>
    %cst_128 = arith.constant 1.000000e+00 : f32
    %367 = vector.broadcast %cst_128 : f32 to vector<8x64xf32>
    %368 = arith.subf %367, %366 : vector<8x64xf32>
    %cst_129 = arith.constant 0.000000e+00 : f32
    %369 = vector.broadcast %cst_129 : f32 to vector<8x64xf32>
    %370 = arith.maximumf %368, %369 : vector<8x64xf32>
    %371 = arith.mulf %362, %370 : vector<8x64xf32>
    %372 = vector.extract_strided_slice %187 {offsets = [0, 1], sizes = [8, 1], strides = [1, 1]} : vector<8x4xf32> to vector<8x1xf32>
    %373 = vector.broadcast %372 : vector<8x1xf32> to vector<8x64xf32>
    %374 = arith.mulf %373, %371 : vector<8x64xf32>
    %375 = arith.addf %350, %374 : vector<8x64xf32>
    %376 = vector.extract_strided_slice %212 {offsets = [0, 16], sizes = [64, 8], strides = [1, 1]} : vector<64x32xf32> to vector<64x8xf32>
    %377 = arith.truncf %375 : vector<8x64xf32> to vector<8x64xbf16>
    %378 = arith.truncf %376 : vector<64x8xf32> to vector<64x8xbf16>
    %cst_130 = arith.constant dense<0.000000e+00> : vector<8x8xf32>
    %379 = tpu.matmul %377, %378, %cst_130 {dimension_numbers = #tpu.dot_dimension_numbers<[1], [0], [0], [1], [0, 0, 1, 1], [], []>} : vector<8x64xbf16>, vector<64x8xbf16>, vector<8x8xf32> -> vector<8x8xf32>
    %380 = arith.addf %198, %379 : vector<8x8xf32>
    %cst_131 = arith.constant 0.000000e+00 : f32
    %381 = vector.broadcast %cst_131 : f32 to vector<8x64xf32>
    %382 = vector.extract_strided_slice %166 {offsets = [0, 24], sizes = [8, 1], strides = [1, 1]} : vector<8x48xf32> to vector<8x1xf32>
    %383 = arith.addf %206, %382 : vector<8x1xf32>
    %384 = vector.extract_strided_slice %166 {offsets = [0, 25], sizes = [8, 1], strides = [1, 1]} : vector<8x48xf32> to vector<8x1xf32>
    %385 = arith.addf %211, %384 : vector<8x1xf32>
    %386 = vector.broadcast %383 : vector<8x1xf32> to vector<8x64xf32>
    %387 = vector.broadcast %200 : vector<1x64xf32> to vector<8x64xf32>
    %388 = arith.subf %386, %387 : vector<8x64xf32>
    %389 = math.absf %388 : vector<8x64xf32>
    %cst_132 = arith.constant 1.000000e+00 : f32
    %390 = vector.broadcast %cst_132 : f32 to vector<8x64xf32>
    %391 = arith.subf %390, %389 : vector<8x64xf32>
    %cst_133 = arith.constant 0.000000e+00 : f32
    %392 = vector.broadcast %cst_133 : f32 to vector<8x64xf32>
    %393 = arith.maximumf %391, %392 : vector<8x64xf32>
    %394 = vector.broadcast %385 : vector<8x1xf32> to vector<8x64xf32>
    %395 = vector.broadcast %201 : vector<1x64xf32> to vector<8x64xf32>
    %396 = arith.subf %394, %395 : vector<8x64xf32>
    %397 = math.absf %396 : vector<8x64xf32>
    %cst_134 = arith.constant 1.000000e+00 : f32
    %398 = vector.broadcast %cst_134 : f32 to vector<8x64xf32>
    %399 = arith.subf %398, %397 : vector<8x64xf32>
    %cst_135 = arith.constant 0.000000e+00 : f32
    %400 = vector.broadcast %cst_135 : f32 to vector<8x64xf32>
    %401 = arith.maximumf %399, %400 : vector<8x64xf32>
    %402 = arith.mulf %393, %401 : vector<8x64xf32>
    %403 = vector.extract_strided_slice %192 {offsets = [0, 0], sizes = [8, 1], strides = [1, 1]} : vector<8x4xf32> to vector<8x1xf32>
    %404 = vector.broadcast %403 : vector<8x1xf32> to vector<8x64xf32>
    %405 = arith.mulf %404, %402 : vector<8x64xf32>
    %406 = arith.addf %381, %405 : vector<8x64xf32>
    %407 = vector.extract_strided_slice %166 {offsets = [0, 26], sizes = [8, 1], strides = [1, 1]} : vector<8x48xf32> to vector<8x1xf32>
    %408 = arith.addf %206, %407 : vector<8x1xf32>
    %409 = vector.extract_strided_slice %166 {offsets = [0, 27], sizes = [8, 1], strides = [1, 1]} : vector<8x48xf32> to vector<8x1xf32>
    %410 = arith.addf %211, %409 : vector<8x1xf32>
    %411 = vector.broadcast %408 : vector<8x1xf32> to vector<8x64xf32>
    %412 = vector.broadcast %200 : vector<1x64xf32> to vector<8x64xf32>
    %413 = arith.subf %411, %412 : vector<8x64xf32>
    %414 = math.absf %413 : vector<8x64xf32>
    %cst_136 = arith.constant 1.000000e+00 : f32
    %415 = vector.broadcast %cst_136 : f32 to vector<8x64xf32>
    %416 = arith.subf %415, %414 : vector<8x64xf32>
    %cst_137 = arith.constant 0.000000e+00 : f32
    %417 = vector.broadcast %cst_137 : f32 to vector<8x64xf32>
    %418 = arith.maximumf %416, %417 : vector<8x64xf32>
    %419 = vector.broadcast %410 : vector<8x1xf32> to vector<8x64xf32>
    %420 = vector.broadcast %201 : vector<1x64xf32> to vector<8x64xf32>
    %421 = arith.subf %419, %420 : vector<8x64xf32>
    %422 = math.absf %421 : vector<8x64xf32>
    %cst_138 = arith.constant 1.000000e+00 : f32
    %423 = vector.broadcast %cst_138 : f32 to vector<8x64xf32>
    %424 = arith.subf %423, %422 : vector<8x64xf32>
    %cst_139 = arith.constant 0.000000e+00 : f32
    %425 = vector.broadcast %cst_139 : f32 to vector<8x64xf32>
    %426 = arith.maximumf %424, %425 : vector<8x64xf32>
    %427 = arith.mulf %418, %426 : vector<8x64xf32>
    %428 = vector.extract_strided_slice %192 {offsets = [0, 1], sizes = [8, 1], strides = [1, 1]} : vector<8x4xf32> to vector<8x1xf32>
    %429 = vector.broadcast %428 : vector<8x1xf32> to vector<8x64xf32>
    %430 = arith.mulf %429, %427 : vector<8x64xf32>
    %431 = arith.addf %406, %430 : vector<8x64xf32>
    %432 = vector.extract_strided_slice %212 {offsets = [0, 24], sizes = [64, 8], strides = [1, 1]} : vector<64x32xf32> to vector<64x8xf32>
    %433 = arith.truncf %431 : vector<8x64xf32> to vector<8x64xbf16>
    %434 = arith.truncf %432 : vector<64x8xf32> to vector<64x8xbf16>
    %cst_140 = arith.constant dense<0.000000e+00> : vector<8x8xf32>
    %435 = tpu.matmul %433, %434, %cst_140 {dimension_numbers = #tpu.dot_dimension_numbers<[1], [0], [0], [1], [0, 0, 1, 1], [], []>} : vector<8x64xbf16>, vector<64x8xbf16>, vector<8x8xf32> -> vector<8x8xf32>
    %436 = arith.addf %199, %435 : vector<8x8xf32>
    %437 = vector.extract_strided_slice %195 {offsets = [0, 64], sizes = [1, 16], strides = [1, 1]} : vector<2x80xf32> to vector<1x16xf32>
    %438 = vector.extract_strided_slice %195 {offsets = [1, 64], sizes = [1, 16], strides = [1, 1]} : vector<2x80xf32> to vector<1x16xf32>
    %439 = vector.extract_strided_slice %194 {offsets = [0, 2], sizes = [8, 1], strides = [1, 1]} : vector<8x4xf32> to vector<8x1xf32>
    %cst_141 = arith.constant 4.000000e+00 : f32
    %440 = vector.broadcast %cst_141 : f32 to vector<8x1xf32>
    %441 = arith.mulf %439, %440 : vector<8x1xf32>
    %cst_142 = arith.constant 5.000000e-01 : f32
    %442 = vector.broadcast %cst_142 : f32 to vector<8x1xf32>
    %443 = arith.subf %441, %442 : vector<8x1xf32>
    %444 = vector.extract_strided_slice %194 {offsets = [0, 3], sizes = [8, 1], strides = [1, 1]} : vector<8x4xf32> to vector<8x1xf32>
    %cst_143 = arith.constant 4.000000e+00 : f32
    %445 = vector.broadcast %cst_143 : f32 to vector<8x1xf32>
    %446 = arith.mulf %444, %445 : vector<8x1xf32>
    %cst_144 = arith.constant 5.000000e-01 : f32
    %447 = vector.broadcast %cst_144 : f32 to vector<8x1xf32>
    %448 = arith.subf %446, %447 : vector<8x1xf32>
    %449 = vector.extract_strided_slice %159 {offsets = [64, 0], sizes = [16, 32], strides = [1, 1]} : vector<80x32xf32> to vector<16x32xf32>
    %cst_145 = arith.constant 0.000000e+00 : f32
    %450 = vector.broadcast %cst_145 : f32 to vector<8x16xf32>
    %451 = vector.extract_strided_slice %166 {offsets = [0, 4], sizes = [8, 1], strides = [1, 1]} : vector<8x48xf32> to vector<8x1xf32>
    %452 = arith.addf %443, %451 : vector<8x1xf32>
    %453 = vector.extract_strided_slice %166 {offsets = [0, 5], sizes = [8, 1], strides = [1, 1]} : vector<8x48xf32> to vector<8x1xf32>
    %454 = arith.addf %448, %453 : vector<8x1xf32>
    %455 = vector.broadcast %452 : vector<8x1xf32> to vector<8x16xf32>
    %456 = vector.broadcast %437 : vector<1x16xf32> to vector<8x16xf32>
    %457 = arith.subf %455, %456 : vector<8x16xf32>
    %458 = math.absf %457 : vector<8x16xf32>
    %cst_146 = arith.constant 1.000000e+00 : f32
    %459 = vector.broadcast %cst_146 : f32 to vector<8x16xf32>
    %460 = arith.subf %459, %458 : vector<8x16xf32>
    %cst_147 = arith.constant 0.000000e+00 : f32
    %461 = vector.broadcast %cst_147 : f32 to vector<8x16xf32>
    %462 = arith.maximumf %460, %461 : vector<8x16xf32>
    %463 = vector.broadcast %454 : vector<8x1xf32> to vector<8x16xf32>
    %464 = vector.broadcast %438 : vector<1x16xf32> to vector<8x16xf32>
    %465 = arith.subf %463, %464 : vector<8x16xf32>
    %466 = math.absf %465 : vector<8x16xf32>
    %cst_148 = arith.constant 1.000000e+00 : f32
    %467 = vector.broadcast %cst_148 : f32 to vector<8x16xf32>
    %468 = arith.subf %467, %466 : vector<8x16xf32>
    %cst_149 = arith.constant 0.000000e+00 : f32
    %469 = vector.broadcast %cst_149 : f32 to vector<8x16xf32>
    %470 = arith.maximumf %468, %469 : vector<8x16xf32>
    %471 = arith.mulf %462, %470 : vector<8x16xf32>
    %472 = vector.extract_strided_slice %177 {offsets = [0, 2], sizes = [8, 1], strides = [1, 1]} : vector<8x4xf32> to vector<8x1xf32>
    %473 = vector.broadcast %472 : vector<8x1xf32> to vector<8x16xf32>
    %474 = arith.mulf %473, %471 : vector<8x16xf32>
    %475 = arith.addf %450, %474 : vector<8x16xf32>
    %476 = vector.extract_strided_slice %166 {offsets = [0, 6], sizes = [8, 1], strides = [1, 1]} : vector<8x48xf32> to vector<8x1xf32>
    %477 = arith.addf %443, %476 : vector<8x1xf32>
    %478 = vector.extract_strided_slice %166 {offsets = [0, 7], sizes = [8, 1], strides = [1, 1]} : vector<8x48xf32> to vector<8x1xf32>
    %479 = arith.addf %448, %478 : vector<8x1xf32>
    %480 = vector.broadcast %477 : vector<8x1xf32> to vector<8x16xf32>
    %481 = vector.broadcast %437 : vector<1x16xf32> to vector<8x16xf32>
    %482 = arith.subf %480, %481 : vector<8x16xf32>
    %483 = math.absf %482 : vector<8x16xf32>
    %cst_150 = arith.constant 1.000000e+00 : f32
    %484 = vector.broadcast %cst_150 : f32 to vector<8x16xf32>
    %485 = arith.subf %484, %483 : vector<8x16xf32>
    %cst_151 = arith.constant 0.000000e+00 : f32
    %486 = vector.broadcast %cst_151 : f32 to vector<8x16xf32>
    %487 = arith.maximumf %485, %486 : vector<8x16xf32>
    %488 = vector.broadcast %479 : vector<8x1xf32> to vector<8x16xf32>
    %489 = vector.broadcast %438 : vector<1x16xf32> to vector<8x16xf32>
    %490 = arith.subf %488, %489 : vector<8x16xf32>
    %491 = math.absf %490 : vector<8x16xf32>
    %cst_152 = arith.constant 1.000000e+00 : f32
    %492 = vector.broadcast %cst_152 : f32 to vector<8x16xf32>
    %493 = arith.subf %492, %491 : vector<8x16xf32>
    %cst_153 = arith.constant 0.000000e+00 : f32
    %494 = vector.broadcast %cst_153 : f32 to vector<8x16xf32>
    %495 = arith.maximumf %493, %494 : vector<8x16xf32>
    %496 = arith.mulf %487, %495 : vector<8x16xf32>
    %497 = vector.extract_strided_slice %177 {offsets = [0, 3], sizes = [8, 1], strides = [1, 1]} : vector<8x4xf32> to vector<8x1xf32>
    %498 = vector.broadcast %497 : vector<8x1xf32> to vector<8x16xf32>
    %499 = arith.mulf %498, %496 : vector<8x16xf32>
    %500 = arith.addf %475, %499 : vector<8x16xf32>
    %501 = vector.extract_strided_slice %449 {offsets = [0, 0], sizes = [16, 8], strides = [1, 1]} : vector<16x32xf32> to vector<16x8xf32>
    %502 = arith.truncf %500 : vector<8x16xf32> to vector<8x16xbf16>
    %503 = arith.truncf %501 : vector<16x8xf32> to vector<16x8xbf16>
    %cst_154 = arith.constant dense<0.000000e+00> : vector<8x8xf32>
    %504 = tpu.matmul %502, %503, %cst_154 {dimension_numbers = #tpu.dot_dimension_numbers<[1], [0], [0], [1], [0, 0, 1, 1], [], []>} : vector<8x16xbf16>, vector<16x8xbf16>, vector<8x8xf32> -> vector<8x8xf32>
    %505 = arith.addf %268, %504 : vector<8x8xf32>
    %cst_155 = arith.constant 0.000000e+00 : f32
    %506 = vector.broadcast %cst_155 : f32 to vector<8x16xf32>
    %507 = vector.extract_strided_slice %166 {offsets = [0, 12], sizes = [8, 1], strides = [1, 1]} : vector<8x48xf32> to vector<8x1xf32>
    %508 = arith.addf %443, %507 : vector<8x1xf32>
    %509 = vector.extract_strided_slice %166 {offsets = [0, 13], sizes = [8, 1], strides = [1, 1]} : vector<8x48xf32> to vector<8x1xf32>
    %510 = arith.addf %448, %509 : vector<8x1xf32>
    %511 = vector.broadcast %508 : vector<8x1xf32> to vector<8x16xf32>
    %512 = vector.broadcast %437 : vector<1x16xf32> to vector<8x16xf32>
    %513 = arith.subf %511, %512 : vector<8x16xf32>
    %514 = math.absf %513 : vector<8x16xf32>
    %cst_156 = arith.constant 1.000000e+00 : f32
    %515 = vector.broadcast %cst_156 : f32 to vector<8x16xf32>
    %516 = arith.subf %515, %514 : vector<8x16xf32>
    %cst_157 = arith.constant 0.000000e+00 : f32
    %517 = vector.broadcast %cst_157 : f32 to vector<8x16xf32>
    %518 = arith.maximumf %516, %517 : vector<8x16xf32>
    %519 = vector.broadcast %510 : vector<8x1xf32> to vector<8x16xf32>
    %520 = vector.broadcast %438 : vector<1x16xf32> to vector<8x16xf32>
    %521 = arith.subf %519, %520 : vector<8x16xf32>
    %522 = math.absf %521 : vector<8x16xf32>
    %cst_158 = arith.constant 1.000000e+00 : f32
    %523 = vector.broadcast %cst_158 : f32 to vector<8x16xf32>
    %524 = arith.subf %523, %522 : vector<8x16xf32>
    %cst_159 = arith.constant 0.000000e+00 : f32
    %525 = vector.broadcast %cst_159 : f32 to vector<8x16xf32>
    %526 = arith.maximumf %524, %525 : vector<8x16xf32>
    %527 = arith.mulf %518, %526 : vector<8x16xf32>
    %528 = vector.extract_strided_slice %182 {offsets = [0, 2], sizes = [8, 1], strides = [1, 1]} : vector<8x4xf32> to vector<8x1xf32>
    %529 = vector.broadcast %528 : vector<8x1xf32> to vector<8x16xf32>
    %530 = arith.mulf %529, %527 : vector<8x16xf32>
    %531 = arith.addf %506, %530 : vector<8x16xf32>
    %532 = vector.extract_strided_slice %166 {offsets = [0, 14], sizes = [8, 1], strides = [1, 1]} : vector<8x48xf32> to vector<8x1xf32>
    %533 = arith.addf %443, %532 : vector<8x1xf32>
    %534 = vector.extract_strided_slice %166 {offsets = [0, 15], sizes = [8, 1], strides = [1, 1]} : vector<8x48xf32> to vector<8x1xf32>
    %535 = arith.addf %448, %534 : vector<8x1xf32>
    %536 = vector.broadcast %533 : vector<8x1xf32> to vector<8x16xf32>
    %537 = vector.broadcast %437 : vector<1x16xf32> to vector<8x16xf32>
    %538 = arith.subf %536, %537 : vector<8x16xf32>
    %539 = math.absf %538 : vector<8x16xf32>
    %cst_160 = arith.constant 1.000000e+00 : f32
    %540 = vector.broadcast %cst_160 : f32 to vector<8x16xf32>
    %541 = arith.subf %540, %539 : vector<8x16xf32>
    %cst_161 = arith.constant 0.000000e+00 : f32
    %542 = vector.broadcast %cst_161 : f32 to vector<8x16xf32>
    %543 = arith.maximumf %541, %542 : vector<8x16xf32>
    %544 = vector.broadcast %535 : vector<8x1xf32> to vector<8x16xf32>
    %545 = vector.broadcast %438 : vector<1x16xf32> to vector<8x16xf32>
    %546 = arith.subf %544, %545 : vector<8x16xf32>
    %547 = math.absf %546 : vector<8x16xf32>
    %cst_162 = arith.constant 1.000000e+00 : f32
    %548 = vector.broadcast %cst_162 : f32 to vector<8x16xf32>
    %549 = arith.subf %548, %547 : vector<8x16xf32>
    %cst_163 = arith.constant 0.000000e+00 : f32
    %550 = vector.broadcast %cst_163 : f32 to vector<8x16xf32>
    %551 = arith.maximumf %549, %550 : vector<8x16xf32>
    %552 = arith.mulf %543, %551 : vector<8x16xf32>
    %553 = vector.extract_strided_slice %182 {offsets = [0, 3], sizes = [8, 1], strides = [1, 1]} : vector<8x4xf32> to vector<8x1xf32>
    %554 = vector.broadcast %553 : vector<8x1xf32> to vector<8x16xf32>
    %555 = arith.mulf %554, %552 : vector<8x16xf32>
    %556 = arith.addf %531, %555 : vector<8x16xf32>
    %557 = vector.extract_strided_slice %449 {offsets = [0, 8], sizes = [16, 8], strides = [1, 1]} : vector<16x32xf32> to vector<16x8xf32>
    %558 = arith.truncf %556 : vector<8x16xf32> to vector<8x16xbf16>
    %559 = arith.truncf %557 : vector<16x8xf32> to vector<16x8xbf16>
    %cst_164 = arith.constant dense<0.000000e+00> : vector<8x8xf32>
    %560 = tpu.matmul %558, %559, %cst_164 {dimension_numbers = #tpu.dot_dimension_numbers<[1], [0], [0], [1], [0, 0, 1, 1], [], []>} : vector<8x16xbf16>, vector<16x8xbf16>, vector<8x8xf32> -> vector<8x8xf32>
    %561 = arith.addf %324, %560 : vector<8x8xf32>
    %cst_165 = arith.constant 0.000000e+00 : f32
    %562 = vector.broadcast %cst_165 : f32 to vector<8x16xf32>
    %563 = vector.extract_strided_slice %166 {offsets = [0, 20], sizes = [8, 1], strides = [1, 1]} : vector<8x48xf32> to vector<8x1xf32>
    %564 = arith.addf %443, %563 : vector<8x1xf32>
    %565 = vector.extract_strided_slice %166 {offsets = [0, 21], sizes = [8, 1], strides = [1, 1]} : vector<8x48xf32> to vector<8x1xf32>
    %566 = arith.addf %448, %565 : vector<8x1xf32>
    %567 = vector.broadcast %564 : vector<8x1xf32> to vector<8x16xf32>
    %568 = vector.broadcast %437 : vector<1x16xf32> to vector<8x16xf32>
    %569 = arith.subf %567, %568 : vector<8x16xf32>
    %570 = math.absf %569 : vector<8x16xf32>
    %cst_166 = arith.constant 1.000000e+00 : f32
    %571 = vector.broadcast %cst_166 : f32 to vector<8x16xf32>
    %572 = arith.subf %571, %570 : vector<8x16xf32>
    %cst_167 = arith.constant 0.000000e+00 : f32
    %573 = vector.broadcast %cst_167 : f32 to vector<8x16xf32>
    %574 = arith.maximumf %572, %573 : vector<8x16xf32>
    %575 = vector.broadcast %566 : vector<8x1xf32> to vector<8x16xf32>
    %576 = vector.broadcast %438 : vector<1x16xf32> to vector<8x16xf32>
    %577 = arith.subf %575, %576 : vector<8x16xf32>
    %578 = math.absf %577 : vector<8x16xf32>
    %cst_168 = arith.constant 1.000000e+00 : f32
    %579 = vector.broadcast %cst_168 : f32 to vector<8x16xf32>
    %580 = arith.subf %579, %578 : vector<8x16xf32>
    %cst_169 = arith.constant 0.000000e+00 : f32
    %581 = vector.broadcast %cst_169 : f32 to vector<8x16xf32>
    %582 = arith.maximumf %580, %581 : vector<8x16xf32>
    %583 = arith.mulf %574, %582 : vector<8x16xf32>
    %584 = vector.extract_strided_slice %187 {offsets = [0, 2], sizes = [8, 1], strides = [1, 1]} : vector<8x4xf32> to vector<8x1xf32>
    %585 = vector.broadcast %584 : vector<8x1xf32> to vector<8x16xf32>
    %586 = arith.mulf %585, %583 : vector<8x16xf32>
    %587 = arith.addf %562, %586 : vector<8x16xf32>
    %588 = vector.extract_strided_slice %166 {offsets = [0, 22], sizes = [8, 1], strides = [1, 1]} : vector<8x48xf32> to vector<8x1xf32>
    %589 = arith.addf %443, %588 : vector<8x1xf32>
    %590 = vector.extract_strided_slice %166 {offsets = [0, 23], sizes = [8, 1], strides = [1, 1]} : vector<8x48xf32> to vector<8x1xf32>
    %591 = arith.addf %448, %590 : vector<8x1xf32>
    %592 = vector.broadcast %589 : vector<8x1xf32> to vector<8x16xf32>
    %593 = vector.broadcast %437 : vector<1x16xf32> to vector<8x16xf32>
    %594 = arith.subf %592, %593 : vector<8x16xf32>
    %595 = math.absf %594 : vector<8x16xf32>
    %cst_170 = arith.constant 1.000000e+00 : f32
    %596 = vector.broadcast %cst_170 : f32 to vector<8x16xf32>
    %597 = arith.subf %596, %595 : vector<8x16xf32>
    %cst_171 = arith.constant 0.000000e+00 : f32
    %598 = vector.broadcast %cst_171 : f32 to vector<8x16xf32>
    %599 = arith.maximumf %597, %598 : vector<8x16xf32>
    %600 = vector.broadcast %591 : vector<8x1xf32> to vector<8x16xf32>
    %601 = vector.broadcast %438 : vector<1x16xf32> to vector<8x16xf32>
    %602 = arith.subf %600, %601 : vector<8x16xf32>
    %603 = math.absf %602 : vector<8x16xf32>
    %cst_172 = arith.constant 1.000000e+00 : f32
    %604 = vector.broadcast %cst_172 : f32 to vector<8x16xf32>
    %605 = arith.subf %604, %603 : vector<8x16xf32>
    %cst_173 = arith.constant 0.000000e+00 : f32
    %606 = vector.broadcast %cst_173 : f32 to vector<8x16xf32>
    %607 = arith.maximumf %605, %606 : vector<8x16xf32>
    %608 = arith.mulf %599, %607 : vector<8x16xf32>
    %609 = vector.extract_strided_slice %187 {offsets = [0, 3], sizes = [8, 1], strides = [1, 1]} : vector<8x4xf32> to vector<8x1xf32>
    %610 = vector.broadcast %609 : vector<8x1xf32> to vector<8x16xf32>
    %611 = arith.mulf %610, %608 : vector<8x16xf32>
    %612 = arith.addf %587, %611 : vector<8x16xf32>
    %613 = vector.extract_strided_slice %449 {offsets = [0, 16], sizes = [16, 8], strides = [1, 1]} : vector<16x32xf32> to vector<16x8xf32>
    %614 = arith.truncf %612 : vector<8x16xf32> to vector<8x16xbf16>
    %615 = arith.truncf %613 : vector<16x8xf32> to vector<16x8xbf16>
    %cst_174 = arith.constant dense<0.000000e+00> : vector<8x8xf32>
    %616 = tpu.matmul %614, %615, %cst_174 {dimension_numbers = #tpu.dot_dimension_numbers<[1], [0], [0], [1], [0, 0, 1, 1], [], []>} : vector<8x16xbf16>, vector<16x8xbf16>, vector<8x8xf32> -> vector<8x8xf32>
    %617 = arith.addf %380, %616 : vector<8x8xf32>
    %cst_175 = arith.constant 0.000000e+00 : f32
    %618 = vector.broadcast %cst_175 : f32 to vector<8x16xf32>
    %619 = vector.extract_strided_slice %166 {offsets = [0, 28], sizes = [8, 1], strides = [1, 1]} : vector<8x48xf32> to vector<8x1xf32>
    %620 = arith.addf %443, %619 : vector<8x1xf32>
    %621 = vector.extract_strided_slice %166 {offsets = [0, 29], sizes = [8, 1], strides = [1, 1]} : vector<8x48xf32> to vector<8x1xf32>
    %622 = arith.addf %448, %621 : vector<8x1xf32>
    %623 = vector.broadcast %620 : vector<8x1xf32> to vector<8x16xf32>
    %624 = vector.broadcast %437 : vector<1x16xf32> to vector<8x16xf32>
    %625 = arith.subf %623, %624 : vector<8x16xf32>
    %626 = math.absf %625 : vector<8x16xf32>
    %cst_176 = arith.constant 1.000000e+00 : f32
    %627 = vector.broadcast %cst_176 : f32 to vector<8x16xf32>
    %628 = arith.subf %627, %626 : vector<8x16xf32>
    %cst_177 = arith.constant 0.000000e+00 : f32
    %629 = vector.broadcast %cst_177 : f32 to vector<8x16xf32>
    %630 = arith.maximumf %628, %629 : vector<8x16xf32>
    %631 = vector.broadcast %622 : vector<8x1xf32> to vector<8x16xf32>
    %632 = vector.broadcast %438 : vector<1x16xf32> to vector<8x16xf32>
    %633 = arith.subf %631, %632 : vector<8x16xf32>
    %634 = math.absf %633 : vector<8x16xf32>
    %cst_178 = arith.constant 1.000000e+00 : f32
    %635 = vector.broadcast %cst_178 : f32 to vector<8x16xf32>
    %636 = arith.subf %635, %634 : vector<8x16xf32>
    %cst_179 = arith.constant 0.000000e+00 : f32
    %637 = vector.broadcast %cst_179 : f32 to vector<8x16xf32>
    %638 = arith.maximumf %636, %637 : vector<8x16xf32>
    %639 = arith.mulf %630, %638 : vector<8x16xf32>
    %640 = vector.extract_strided_slice %192 {offsets = [0, 2], sizes = [8, 1], strides = [1, 1]} : vector<8x4xf32> to vector<8x1xf32>
    %641 = vector.broadcast %640 : vector<8x1xf32> to vector<8x16xf32>
    %642 = arith.mulf %641, %639 : vector<8x16xf32>
    %643 = arith.addf %618, %642 : vector<8x16xf32>
    %644 = vector.extract_strided_slice %166 {offsets = [0, 30], sizes = [8, 1], strides = [1, 1]} : vector<8x48xf32> to vector<8x1xf32>
    %645 = arith.addf %443, %644 : vector<8x1xf32>
    %646 = vector.extract_strided_slice %166 {offsets = [0, 31], sizes = [8, 1], strides = [1, 1]} : vector<8x48xf32> to vector<8x1xf32>
    %647 = arith.addf %448, %646 : vector<8x1xf32>
    %648 = vector.broadcast %645 : vector<8x1xf32> to vector<8x16xf32>
    %649 = vector.broadcast %437 : vector<1x16xf32> to vector<8x16xf32>
    %650 = arith.subf %648, %649 : vector<8x16xf32>
    %651 = math.absf %650 : vector<8x16xf32>
    %cst_180 = arith.constant 1.000000e+00 : f32
    %652 = vector.broadcast %cst_180 : f32 to vector<8x16xf32>
    %653 = arith.subf %652, %651 : vector<8x16xf32>
    %cst_181 = arith.constant 0.000000e+00 : f32
    %654 = vector.broadcast %cst_181 : f32 to vector<8x16xf32>
    %655 = arith.maximumf %653, %654 : vector<8x16xf32>
    %656 = vector.broadcast %647 : vector<8x1xf32> to vector<8x16xf32>
    %657 = vector.broadcast %438 : vector<1x16xf32> to vector<8x16xf32>
    %658 = arith.subf %656, %657 : vector<8x16xf32>
    %659 = math.absf %658 : vector<8x16xf32>
    %cst_182 = arith.constant 1.000000e+00 : f32
    %660 = vector.broadcast %cst_182 : f32 to vector<8x16xf32>
    %661 = arith.subf %660, %659 : vector<8x16xf32>
    %cst_183 = arith.constant 0.000000e+00 : f32
    %662 = vector.broadcast %cst_183 : f32 to vector<8x16xf32>
    %663 = arith.maximumf %661, %662 : vector<8x16xf32>
    %664 = arith.mulf %655, %663 : vector<8x16xf32>
    %665 = vector.extract_strided_slice %192 {offsets = [0, 3], sizes = [8, 1], strides = [1, 1]} : vector<8x4xf32> to vector<8x1xf32>
    %666 = vector.broadcast %665 : vector<8x1xf32> to vector<8x16xf32>
    %667 = arith.mulf %666, %664 : vector<8x16xf32>
    %668 = arith.addf %643, %667 : vector<8x16xf32>
    %669 = vector.extract_strided_slice %449 {offsets = [0, 24], sizes = [16, 8], strides = [1, 1]} : vector<16x32xf32> to vector<16x8xf32>
    %670 = arith.truncf %668 : vector<8x16xf32> to vector<8x16xbf16>
    %671 = arith.truncf %669 : vector<16x8xf32> to vector<16x8xbf16>
    %cst_184 = arith.constant dense<0.000000e+00> : vector<8x8xf32>
    %672 = tpu.matmul %670, %671, %cst_184 {dimension_numbers = #tpu.dot_dimension_numbers<[1], [0], [0], [1], [0, 0, 1, 1], [], []>} : vector<8x16xbf16>, vector<16x8xbf16>, vector<8x8xf32> -> vector<8x8xf32>
    %673 = arith.addf %436, %672 : vector<8x8xf32>
    %c0_185 = arith.constant 0 : index
    %c0_186 = arith.constant 0 : index
    %674 = vector.load %arg32[%c0_185, %c0_186] : memref<8x32xf32, #tpu.memory_space<vmem>>, vector<8x8xf32>
    tpu.vector_store %arg32[%c0_185, %c0_186], %505 {strides = array<i32>} : memref<8x32xf32, #tpu.memory_space<vmem>>, vector<8x8xf32>,
    %c0_187 = arith.constant 0 : index
    %c8_188 = arith.constant 8 : index
    %675 = vector.load %arg32[%c0_187, %c8_188] : memref<8x32xf32, #tpu.memory_space<vmem>>, vector<8x8xf32>
    tpu.vector_store %arg32[%c0_187, %c8_188], %561 {strides = array<i32>} : memref<8x32xf32, #tpu.memory_space<vmem>>, vector<8x8xf32>,
    %c0_189 = arith.constant 0 : index
    %c16_190 = arith.constant 16 : index
    %676 = vector.load %arg32[%c0_189, %c16_190] : memref<8x32xf32, #tpu.memory_space<vmem>>, vector<8x8xf32>
    tpu.vector_store %arg32[%c0_189, %c16_190], %617 {strides = array<i32>} : memref<8x32xf32, #tpu.memory_space<vmem>>, vector<8x8xf32>,
    %c0_191 = arith.constant 0 : index
    %c24_192 = arith.constant 24 : index
    %677 = vector.load %arg32[%c0_191, %c24_192] : memref<8x32xf32, #tpu.memory_space<vmem>>, vector<8x8xf32>
    tpu.vector_store %arg32[%c0_191, %c24_192], %673 {strides = array<i32>} : memref<8x32xf32, #tpu.memory_space<vmem>>, vector<8x8xf32>,
    %c0_193 = arith.constant 0 : index
    %c0_194 = arith.constant 0 : index
    %678 = vector.load %arg32[%c0_193, %c0_194] : memref<8x32xf32, #tpu.memory_space<vmem>>, vector<8x32xf32>
    %c0_195 = arith.constant 0 : index
    %c0_196 = arith.constant 0 : index
    %c0_197 = arith.constant 0 : index
    %679 = vector.load %arg20[%c0_195, %c0_196, %c0_197] : memref<1x32x32xbf16, #tpu.memory_space<vmem>>, vector<1x32x32xbf16>
    %680 = vector.shape_cast %679 : vector<1x32x32xbf16> to vector<32x32xbf16>
    %681 = arith.truncf %678 : vector<8x32xf32> to vector<8x32xbf16>
    %cst_198 = arith.constant dense<0.000000e+00> : vector<8x32xf32>
    %682 = tpu.matmul %681, %680, %cst_198 {dimension_numbers = #tpu.dot_dimension_numbers<[1], [0], [0], [1], [0, 0, 1, 1], [], []>} : vector<8x32xbf16>, vector<32x32xbf16>, vector<8x32xf32> -> vector<8x32xf32>
    %c0_199 = arith.constant 0 : index
    %c0_200 = arith.constant 0 : index
    %c0_201 = arith.constant 0 : index
    %683 = vector.load %arg21[%c0_199, %c0_200, %c0_201] : memref<1x1x32xf32, #tpu.memory_space<vmem>>, vector<1x1x32xf32>
    %684 = vector.shape_cast %683 : vector<1x1x32xf32> to vector<1x32xf32>
    %685 = vector.broadcast %684 : vector<1x32xf32> to vector<8x32xf32>
    %686 = arith.addf %682, %685 : vector<8x32xf32>
    %687 = arith.addf %145, %686 : vector<8x32xf32>
    %c0_202 = arith.constant 0 : index
    %c0_203 = arith.constant 0 : index
    %c0_204 = arith.constant 0 : index
    %688 = vector.load %arg22[%c0_202, %c0_203, %c0_204] : memref<1x1x32xf32, #tpu.memory_space<vmem>>, vector<1x1x32xf32>
    %689 = vector.shape_cast %688 : vector<1x1x32xf32> to vector<1x32xf32>
    %c0_205 = arith.constant 0 : index
    %c0_206 = arith.constant 0 : index
    %c0_207 = arith.constant 0 : index
    %690 = vector.load %arg23[%c0_205, %c0_206, %c0_207] : memref<1x1x32xf32, #tpu.memory_space<vmem>>, vector<1x1x32xf32>
    %691 = vector.shape_cast %690 : vector<1x1x32xf32> to vector<1x32xf32>
    %cst_208 = arith.constant dense<0.000000e+00> : vector<8xf32>
    %692 = vector.multi_reduction <add>, %687, %cst_208 [1] : vector<8x32xf32> to vector<8xf32>
    %693 = vector.shape_cast %692 : vector<8xf32> to vector<8x1xf32>
    %cst_209 = arith.constant 3.200000e+01 : f32
    %694 = vector.broadcast %cst_209 : f32 to vector<8x1xf32>
    %695 = arith.divf %693, %694 : vector<8x1xf32>
    %696 = vector.broadcast %695 : vector<8x1xf32> to vector<8x32xf32>
    %697 = arith.subf %687, %696 : vector<8x32xf32>
    %698 = arith.mulf %697, %697 : vector<8x32xf32>
    %cst_210 = arith.constant dense<0.000000e+00> : vector<8xf32>
    %699 = vector.multi_reduction <add>, %698, %cst_210 [1] : vector<8x32xf32> to vector<8xf32>
    %700 = vector.shape_cast %699 : vector<8xf32> to vector<8x1xf32>
    %cst_211 = arith.constant 3.200000e+01 : f32
    %701 = vector.broadcast %cst_211 : f32 to vector<8x1xf32>
    %702 = arith.divf %700, %701 : vector<8x1xf32>
    %703 = vector.broadcast %695 : vector<8x1xf32> to vector<8x32xf32>
    %704 = arith.subf %687, %703 : vector<8x32xf32>
    %cst_212 = arith.constant 9.99999974E-6 : f32
    %705 = vector.broadcast %cst_212 : f32 to vector<8x1xf32>
    %706 = arith.addf %702, %705 : vector<8x1xf32>
    %707 = math.rsqrt %706 : vector<8x1xf32>
    %708 = vector.broadcast %707 : vector<8x1xf32> to vector<8x32xf32>
    %709 = arith.mulf %704, %708 : vector<8x32xf32>
    %710 = vector.broadcast %689 : vector<1x32xf32> to vector<8x32xf32>
    %711 = arith.mulf %709, %710 : vector<8x32xf32>
    %712 = vector.broadcast %691 : vector<1x32xf32> to vector<8x32xf32>
    %713 = arith.addf %711, %712 : vector<8x32xf32>
    %c0_213 = arith.constant 0 : index
    %c0_214 = arith.constant 0 : index
    %c0_215 = arith.constant 0 : index
    %714 = vector.load %arg24[%c0_213, %c0_214, %c0_215] : memref<1x32x64xbf16, #tpu.memory_space<vmem>>, vector<1x32x64xbf16>
    %715 = vector.shape_cast %714 : vector<1x32x64xbf16> to vector<32x64xbf16>
    %716 = arith.truncf %713 : vector<8x32xf32> to vector<8x32xbf16>
    %cst_216 = arith.constant dense<0.000000e+00> : vector<8x64xf32>
    %717 = tpu.matmul %716, %715, %cst_216 {dimension_numbers = #tpu.dot_dimension_numbers<[1], [0], [0], [1], [0, 0, 1, 1], [], []>} : vector<8x32xbf16>, vector<32x64xbf16>, vector<8x64xf32> -> vector<8x64xf32>
    %c0_217 = arith.constant 0 : index
    %c0_218 = arith.constant 0 : index
    %c0_219 = arith.constant 0 : index
    %718 = vector.load %arg25[%c0_217, %c0_218, %c0_219] : memref<1x1x64xf32, #tpu.memory_space<vmem>>, vector<1x1x64xf32>
    %719 = vector.shape_cast %718 : vector<1x1x64xf32> to vector<1x64xf32>
    %720 = vector.broadcast %719 : vector<1x64xf32> to vector<8x64xf32>
    %721 = arith.addf %717, %720 : vector<8x64xf32>
    %cst_220 = arith.constant 0.000000e+00 : f32
    %722 = vector.broadcast %cst_220 : f32 to vector<8x64xf32>
    %723 = arith.maximumf %721, %722 : vector<8x64xf32>
    %c0_221 = arith.constant 0 : index
    %c0_222 = arith.constant 0 : index
    %c0_223 = arith.constant 0 : index
    %724 = vector.load %arg26[%c0_221, %c0_222, %c0_223] : memref<1x64x32xbf16, #tpu.memory_space<vmem>>, vector<1x64x32xbf16>
    %725 = vector.shape_cast %724 : vector<1x64x32xbf16> to vector<64x32xbf16>
    %726 = arith.truncf %723 : vector<8x64xf32> to vector<8x64xbf16>
    %cst_224 = arith.constant dense<0.000000e+00> : vector<8x32xf32>
    %727 = tpu.matmul %726, %725, %cst_224 {dimension_numbers = #tpu.dot_dimension_numbers<[1], [0], [0], [1], [0, 0, 1, 1], [], []>} : vector<8x64xbf16>, vector<64x32xbf16>, vector<8x32xf32> -> vector<8x32xf32>
    %728 = arith.addf %713, %727 : vector<8x32xf32>
    %c0_225 = arith.constant 0 : index
    %c0_226 = arith.constant 0 : index
    %c0_227 = arith.constant 0 : index
    %729 = vector.load %arg27[%c0_225, %c0_226, %c0_227] : memref<1x1x32xf32, #tpu.memory_space<vmem>>, vector<1x1x32xf32>
    %730 = vector.shape_cast %729 : vector<1x1x32xf32> to vector<1x32xf32>
    %731 = vector.broadcast %730 : vector<1x32xf32> to vector<8x32xf32>
    %732 = arith.addf %728, %731 : vector<8x32xf32>
    %c0_228 = arith.constant 0 : index
    %c0_229 = arith.constant 0 : index
    %c0_230 = arith.constant 0 : index
    %733 = vector.load %arg28[%c0_228, %c0_229, %c0_230] : memref<1x1x32xf32, #tpu.memory_space<vmem>>, vector<1x1x32xf32>
    %734 = vector.shape_cast %733 : vector<1x1x32xf32> to vector<1x32xf32>
    %c0_231 = arith.constant 0 : index
    %c0_232 = arith.constant 0 : index
    %c0_233 = arith.constant 0 : index
    %735 = vector.load %arg29[%c0_231, %c0_232, %c0_233] : memref<1x1x32xf32, #tpu.memory_space<vmem>>, vector<1x1x32xf32>
    %736 = vector.shape_cast %735 : vector<1x1x32xf32> to vector<1x32xf32>
    %cst_234 = arith.constant dense<0.000000e+00> : vector<8xf32>
    %737 = vector.multi_reduction <add>, %732, %cst_234 [1] : vector<8x32xf32> to vector<8xf32>
    %738 = vector.shape_cast %737 : vector<8xf32> to vector<8x1xf32>
    %cst_235 = arith.constant 3.200000e+01 : f32
    %739 = vector.broadcast %cst_235 : f32 to vector<8x1xf32>
    %740 = arith.divf %738, %739 : vector<8x1xf32>
    %741 = vector.broadcast %740 : vector<8x1xf32> to vector<8x32xf32>
    %742 = arith.subf %732, %741 : vector<8x32xf32>
    %743 = arith.mulf %742, %742 : vector<8x32xf32>
    %cst_236 = arith.constant dense<0.000000e+00> : vector<8xf32>
    %744 = vector.multi_reduction <add>, %743, %cst_236 [1] : vector<8x32xf32> to vector<8xf32>
    %745 = vector.shape_cast %744 : vector<8xf32> to vector<8x1xf32>
    %cst_237 = arith.constant 3.200000e+01 : f32
    %746 = vector.broadcast %cst_237 : f32 to vector<8x1xf32>
    %747 = arith.divf %745, %746 : vector<8x1xf32>
    %748 = vector.broadcast %740 : vector<8x1xf32> to vector<8x32xf32>
    %749 = arith.subf %732, %748 : vector<8x32xf32>
    %cst_238 = arith.constant 9.99999974E-6 : f32
    %750 = vector.broadcast %cst_238 : f32 to vector<8x1xf32>
    %751 = arith.addf %747, %750 : vector<8x1xf32>
    %752 = math.rsqrt %751 : vector<8x1xf32>
    %753 = vector.broadcast %752 : vector<8x1xf32> to vector<8x32xf32>
    %754 = arith.mulf %749, %753 : vector<8x32xf32>
    %755 = vector.broadcast %734 : vector<1x32xf32> to vector<8x32xf32>
    %756 = arith.mulf %754, %755 : vector<8x32xf32>
    %757 = vector.broadcast %736 : vector<1x32xf32> to vector<8x32xf32>
    %758 = arith.addf %756, %757 : vector<8x32xf32>
    %c0_239 = arith.constant 0 : index
    %c0_240 = arith.constant 0 : index
    %759 = vector.load %arg31[%c0_239, %c0_240] : memref<8x32xf32, #tpu.memory_space<vmem>>, vector<8x32xf32>
    tpu.vector_store %arg31[%c0_239, %c0_240], %758 {strides = array<i32>} : memref<8x32xf32, #tpu.memory_space<vmem>>, vector<8x32xf32>,
    %c0_241 = arith.constant 0 : index
    %c0_242 = arith.constant 0 : index
    %c0_243 = arith.constant 0 : index
    %c0_244 = arith.constant 0 : index
    %760 = vector.load %arg30[%c0_241, %c0_242, %c0_243, %c0_244] : memref<1x1x8x32xf32, #tpu.memory_space<vmem>>, vector<1x1x8x32xf32>
    %761 = vector.shape_cast %760 : vector<1x1x8x32xf32> to vector<8x32xf32>
    %762 = vector.shape_cast %758 : vector<8x32xf32> to vector<1x1x8x32xf32>
    tpu.vector_store %arg30[%c0_241, %c0_242, %c0_243, %c0_244], %762 {strides = array<i32>} : memref<1x1x8x32xf32, #tpu.memory_space<vmem>>, vector<1x1x8x32xf32>,
    return
  }
  func.func @transform_0(%arg0: i32, %arg1: i32) -> (i32, i32, i32) {
    %c0_i32 = arith.constant 0 : i32
    %c0_i32_0 = arith.constant 0 : i32
    %c0_i32_1 = arith.constant 0 : i32
    return %arg0, %c0_i32, %c0_i32_0 : i32, i32, i32
  }
  func.func @transform_1(%arg0: i32, %arg1: i32) -> (i32, i32, i32) {
    %c0_i32 = arith.constant 0 : i32
    %c0_i32_0 = arith.constant 0 : i32
    %c0_i32_1 = arith.constant 0 : i32
    return %arg0, %c0_i32, %c0_i32_0 : i32, i32, i32
  }
  func.func @transform_2(%arg0: i32, %arg1: i32) -> (i32, i32, i32) {
    %c0_i32 = arith.constant 0 : i32
    %c0_i32_0 = arith.constant 0 : i32
    %c0_i32_1 = arith.constant 0 : i32
    return %arg0, %c0_i32, %c0_i32_0 : i32, i32, i32
  }
  func.func @transform_3(%arg0: i32, %arg1: i32) -> (i32, i32, i32) {
    %c0_i32 = arith.constant 0 : i32
    %c0_i32_0 = arith.constant 0 : i32
    %c0_i32_1 = arith.constant 0 : i32
    return %arg0, %c0_i32, %c0_i32_0 : i32, i32, i32
  }
  func.func @transform_4(%arg0: i32, %arg1: i32) -> (i32, i32, i32) {
    %c0_i32 = arith.constant 0 : i32
    %c0_i32_0 = arith.constant 0 : i32
    %c0_i32_1 = arith.constant 0 : i32
    return %arg0, %c0_i32, %c0_i32_0 : i32, i32, i32
  }
  func.func @transform_5(%arg0: i32, %arg1: i32) -> (i32, i32) {
    %c0_i32 = arith.constant 0 : i32
    %c0_i32_0 = arith.constant 0 : i32
    %c0_i32_1 = arith.constant 0 : i32
    return %c0_i32, %c0_i32_0 : i32, i32
  }
  func.func @transform_6(%arg0: i32, %arg1: i32) -> (i32, i32, i32) {
    %c0_i32 = arith.constant 0 : i32
    %c0_i32_0 = arith.constant 0 : i32
    %c0_i32_1 = arith.constant 0 : i32
    return %arg1, %c0_i32, %c0_i32_0 : i32, i32, i32
  }
  func.func @transform_7(%arg0: i32, %arg1: i32) -> (i32, i32, i32) {
    %c0_i32 = arith.constant 0 : i32
    %c0_i32_0 = arith.constant 0 : i32
    %c0_i32_1 = arith.constant 0 : i32
    return %arg1, %c0_i32, %c0_i32_0 : i32, i32, i32
  }
  func.func @transform_8(%arg0: i32, %arg1: i32) -> (i32, i32, i32) {
    %c0_i32 = arith.constant 0 : i32
    %c0_i32_0 = arith.constant 0 : i32
    %c0_i32_1 = arith.constant 0 : i32
    return %arg1, %c0_i32, %c0_i32_0 : i32, i32, i32
  }
  func.func @transform_9(%arg0: i32, %arg1: i32) -> (i32, i32, i32) {
    %c0_i32 = arith.constant 0 : i32
    %c0_i32_0 = arith.constant 0 : i32
    %c0_i32_1 = arith.constant 0 : i32
    return %arg1, %c0_i32, %c0_i32_0 : i32, i32, i32
  }
  func.func @transform_10(%arg0: i32, %arg1: i32) -> (i32, i32, i32) {
    %c0_i32 = arith.constant 0 : i32
    %c0_i32_0 = arith.constant 0 : i32
    %c0_i32_1 = arith.constant 0 : i32
    return %arg1, %c0_i32, %c0_i32_0 : i32, i32, i32
  }
  func.func @transform_11(%arg0: i32, %arg1: i32) -> (i32, i32, i32) {
    %c0_i32 = arith.constant 0 : i32
    %c0_i32_0 = arith.constant 0 : i32
    %c0_i32_1 = arith.constant 0 : i32
    return %arg1, %c0_i32, %c0_i32_0 : i32, i32, i32
  }
  func.func @transform_12(%arg0: i32, %arg1: i32) -> (i32, i32, i32) {
    %c0_i32 = arith.constant 0 : i32
    %c0_i32_0 = arith.constant 0 : i32
    %c0_i32_1 = arith.constant 0 : i32
    return %arg1, %c0_i32, %c0_i32_0 : i32, i32, i32
  }
  func.func @transform_13(%arg0: i32, %arg1: i32) -> (i32, i32, i32) {
    %c0_i32 = arith.constant 0 : i32
    %c0_i32_0 = arith.constant 0 : i32
    %c0_i32_1 = arith.constant 0 : i32
    return %arg1, %c0_i32, %c0_i32_0 : i32, i32, i32
  }
  func.func @transform_14(%arg0: i32, %arg1: i32) -> (i32, i32, i32) {
    %c0_i32 = arith.constant 0 : i32
    %c0_i32_0 = arith.constant 0 : i32
    %c0_i32_1 = arith.constant 0 : i32
    return %arg1, %c0_i32, %c0_i32_0 : i32, i32, i32
  }
  func.func @transform_15(%arg0: i32, %arg1: i32) -> (i32, i32, i32) {
    %c0_i32 = arith.constant 0 : i32
    %c0_i32_0 = arith.constant 0 : i32
    %c0_i32_1 = arith.constant 0 : i32
    return %arg1, %c0_i32, %c0_i32_0 : i32, i32, i32
  }
  func.func @transform_16(%arg0: i32, %arg1: i32) -> (i32, i32, i32) {
    %c0_i32 = arith.constant 0 : i32
    %c0_i32_0 = arith.constant 0 : i32
    %c0_i32_1 = arith.constant 0 : i32
    return %arg1, %c0_i32, %c0_i32_0 : i32, i32, i32
  }
  func.func @transform_17(%arg0: i32, %arg1: i32) -> (i32, i32, i32) {
    %c0_i32 = arith.constant 0 : i32
    %c0_i32_0 = arith.constant 0 : i32
    %c0_i32_1 = arith.constant 0 : i32
    return %arg1, %c0_i32, %c0_i32_0 : i32, i32, i32
  }
  func.func @transform_18(%arg0: i32, %arg1: i32) -> (i32, i32, i32) {
    %c0_i32 = arith.constant 0 : i32
    %c0_i32_0 = arith.constant 0 : i32
    %c0_i32_1 = arith.constant 0 : i32
    return %arg1, %c0_i32, %c0_i32_0 : i32, i32, i32
  }
  func.func @transform_19(%arg0: i32, %arg1: i32) -> (i32, i32, i32) {
    %c0_i32 = arith.constant 0 : i32
    %c0_i32_0 = arith.constant 0 : i32
    %c0_i32_1 = arith.constant 0 : i32
    return %arg1, %c0_i32, %c0_i32_0 : i32, i32, i32
  }
  func.func @transform_20(%arg0: i32, %arg1: i32) -> (i32, i32, i32) {
    %c0_i32 = arith.constant 0 : i32
    %c0_i32_0 = arith.constant 0 : i32
    %c0_i32_1 = arith.constant 0 : i32
    return %arg1, %c0_i32, %c0_i32_0 : i32, i32, i32
  }
  func.func @transform_21(%arg0: i32, %arg1: i32) -> (i32, i32, i32) {
    %c0_i32 = arith.constant 0 : i32
    %c0_i32_0 = arith.constant 0 : i32
    %c0_i32_1 = arith.constant 0 : i32
    return %arg1, %c0_i32, %c0_i32_0 : i32, i32, i32
  }
  func.func @transform_22(%arg0: i32, %arg1: i32) -> (i32, i32, i32) {
    %c0_i32 = arith.constant 0 : i32
    %c0_i32_0 = arith.constant 0 : i32
    %c0_i32_1 = arith.constant 0 : i32
    return %arg1, %c0_i32, %c0_i32_0 : i32, i32, i32
  }
  func.func @transform_23(%arg0: i32, %arg1: i32) -> (i32, i32, i32) {
    %c0_i32 = arith.constant 0 : i32
    %c0_i32_0 = arith.constant 0 : i32
    %c0_i32_1 = arith.constant 0 : i32
    return %arg1, %c0_i32, %c0_i32_0 : i32, i32, i32
  }
  func.func @transform_24(%arg0: i32, %arg1: i32) -> (i32, i32, i32) {
    %c0_i32 = arith.constant 0 : i32
    %c0_i32_0 = arith.constant 0 : i32
    %c0_i32_1 = arith.constant 0 : i32
    return %arg1, %c0_i32, %c0_i32_0 : i32, i32, i32
  }
  func.func @transform_25(%arg0: i32, %arg1: i32) -> (i32, i32, i32) {
    %c0_i32 = arith.constant 0 : i32
    %c0_i32_0 = arith.constant 0 : i32
    %c0_i32_1 = arith.constant 0 : i32
    return %arg1, %c0_i32, %c0_i32_0 : i32, i32, i32
  }
  func.func @transform_26(%arg0: i32, %arg1: i32) -> (i32, i32, i32) {
    %c0_i32 = arith.constant 0 : i32
    %c0_i32_0 = arith.constant 0 : i32
    %c0_i32_1 = arith.constant 0 : i32
    return %arg1, %c0_i32, %c0_i32_0 : i32, i32, i32
  }
  func.func @transform_27(%arg0: i32, %arg1: i32) -> (i32, i32, i32) {
    %c0_i32 = arith.constant 0 : i32
    %c0_i32_0 = arith.constant 0 : i32
    %c0_i32_1 = arith.constant 0 : i32
    return %arg1, %c0_i32, %c0_i32_0 : i32, i32, i32
  }
  func.func @transform_28(%arg0: i32, %arg1: i32) -> (i32, i32, i32, i32) {
    %c0_i32 = arith.constant 0 : i32
    %c0_i32_0 = arith.constant 0 : i32
    %c0_i32_1 = arith.constant 0 : i32
    return %arg1, %arg0, %c0_i32, %c0_i32_0 : i32, i32, i32, i32
  }
}

</mosaic_0001>

<bundles_post_ra>
// kernel: deformable_transformer_decoder.1
= control target key start
LH: loop header
LB: loop body
LE: loop exit
PB: predicated region body
PF: predicated region fallthrough
CT: control target
= control target key end

     0   :  { %s5692_s0 = inlined_call_operand.vmem [shape: f32[2,8,32], index: 0, kind: input, shape index: {}]   ;;  %s5693_s1 = inlined_call_operand.vmem [shape: bf16[2,8,32], index: 1, kind: input, shape index: {}]   ;;  %s5694_s2 = inlined_call_operand.vmem [shape: bf16[2,80,32], index: 2, kind: input, shape index: {}]   ;;  %s5695_s3 = inlined_call_operand.vmem [shape: f32[2,80,1], index: 3, kind: input, shape index: {}]   ;;  %s5696_s4 = inlined_call_operand.vmem [shape: f32[2,8,4], index: 4, kind: input, shape index: {}]   ;;  %s5697_s5 = inlined_call_operand.vmem [shape: f32[2,80], index: 5, kind: input, shape index: {}]   ;;  %s5698_s6 = inlined_call_operand.vmem [shape: bf16[2,32,64], index: 6, kind: input, shape index: {}]   ;;  %s5699_s7 = inlined_call_operand.vmem [shape: f32[2,1,64], index: 7, kind: input, shape index: {}]   ;;  %s5700_s8 = inlined_call_operand.vmem [shape: bf16[2,32,32], index: 8, kind: input, shape index: {}]   ;;  %s5701_s9 = inlined_call_operand.vmem [shape: f32[2,1,32], index: 9, kind: input, shape index: {}]   ;;  %s5702_s10 = inlined_call_operand.vmem [shape: bf16[2,32,32], index: 10, kind: input, shape index: {}]   ;;  %s5703_s11 = inlined_call_operand.vmem [shape: f32[2,1,32], index: 11, kind: input, shape index: {}]   ;;  %s5704_s12 = inlined_call_operand.vmem [shape: f32[2,1,32], index: 12, kind: input, shape index: {}]   ;;  %s5705_s13 = inlined_call_operand.vmem [shape: f32[2,1,32], index: 13, kind: input, shape index: {}]   ;;  %s5706_s14 = inlined_call_operand.vmem [shape: bf16[2,32,32], index: 14, kind: input, shape index: {}]   ;;  %s5707_s15 = inlined_call_operand.vmem [shape: f32[2,1,32], index: 15, kind: input, shape index: {}]   ;;  %s5708_s16 = inlined_call_operand.vmem [shape: f32[2,32,48], index: 16, kind: input, shape index: {}]   ;;  %s5709_s17 = inlined_call_operand.vmem [shape: f32[2,1,48], index: 17, kind: input, shape index: {}]   ;;  %s5710_s18 = inlined_call_operand.vmem [shape: bf16[2,32,32], index: 18, kind: input, shape index: {}]   ;;  %s5711_s19 = inlined_call_operand.vmem [shape: f32[2,1,32], index: 19, kind: input, shape index: {}]   ;;  %s5712_s20 = inlined_call_operand.vmem [shape: f32[2,1,32], index: 20, kind: input, shape index: {}]   ;;  %s5713_s21 = inlined_call_operand.vmem [shape: f32[2,1,32], index: 21, kind: input, shape index: {}]   ;;  %s5714_s22 = inlined_call_operand.vmem [shape: bf16[2,32,64], index: 22, kind: input, shape index: {}]   ;;  %s5715_s23 = inlined_call_operand.vmem [shape: f32[2,1,64], index: 23, kind: input, shape index: {}]   ;;  %s5716_s24 = inlined_call_operand.vmem [shape: bf16[2,64,32], index: 24, kind: input, shape index: {}]   ;;  %s5717_s25 = inlined_call_operand.vmem [shape: f32[2,1,32], index: 25, kind: input, shape index: {}]   ;;  %s5718_s26 = inlined_call_operand.vmem [shape: f32[2,1,32], index: 26, kind: input, shape index: {}]   ;;  %s5719_s27 = inlined_call_operand.vmem [shape: f32[2,1,32], index: 27, kind: input, shape index: {}]   ;;  %s5720_s28 = inlined_call_operand.hbm [shape: f32[2,2,8,32], index: 28, kind: output, shape index: {}]  }
   0x1   :  { %5743 = sst [smem:[#allocation29_spill]] %s5692_s0 }
   0x2   :  { %5744 = sst [smem:[#allocation30_spill]] %s5693_s1 }
   0x3   :  { %5745 = sst [smem:[#allocation31_spill]] %s5694_s2 }
   0x4   :  { %5746 = sst [smem:[#allocation32_spill]] %s5695_s3 }
   0x5   :  { %5747 = sst [smem:[#allocation33_spill]] %s5696_s4 }
   0x6   :  { %5748 = sst [smem:[#allocation34_spill]] %s5697_s5 }
   0x7   :  { %5749 = sst [smem:[#allocation35_spill]] %s5698_s6 }
   0x8   :  { %5750 = sst [smem:[#allocation36_spill]] %s5699_s7 }
   0x9   :  { %5751 = sst [smem:[#allocation37_spill]] %s5700_s8 }
   0xa   :  { %5752 = sst [smem:[#allocation38_spill]] %s5701_s9 }
   0xb   :  { %5753 = sst [smem:[#allocation39_spill]] %s5702_s10 }
   0xc   :  { %5754 = sst [smem:[#allocation40_spill]] %s5703_s11 }
   0xd   :  { %5755 = sst [smem:[#allocation41_spill]] %s5704_s12 }
   0xe   :  { %5756 = sst [smem:[#allocation42_spill]] %s5706_s14 }
   0xf   :  { %5757 = sst [smem:[#allocation43_spill]] %s5708_s16 }
  0x10   :  { %5758 = sst [smem:[#allocation44_spill]] %s5710_s18 }
  0x11   :  { %5759 = sst [smem:[#allocation45_spill]] %s5712_s20 }
  0x12   :  { %5760 = sst [smem:[#allocation46_spill]] %s5713_s21 }
  0x13   :  { %5761 = sst [smem:[#allocation47_spill]] %s5714_s22 }
  0x14   :  { %5762 = sst [smem:[#allocation48_spill]] %s5715_s23 }
  0x15   :  { %5763 = sst [smem:[#allocation49_spill]] %s5716_s24 }
  0x16   :  { %5764 = sst [smem:[#allocation50_spill]] %s5717_s25 }
  0x17   :  { %5765 = sst [smem:[#allocation51_spill]] %s5718_s26 }
  0x18   :  { %5766 = sst [smem:[#allocation52_spill]] %s5719_s27 }
  0x19   :  { %5767 = sst [smem:[#allocation53_spill]] %s5720_s28 }
  0x1a   :  { %33 = vsyncpa [#allocation5], 0 }
  0x1b   :  { %35 = vsyncpa [#allocation5 + $0x1], 0  ;;  %s4801_s8 = smov 0   ;;  %s4803_s5 = smov 0  }
  0x1c   :  { %s4805_s9 = smov 0   ;;  %s4807_s30 = smov 0  }
  0x1d   :  { %s4809_s3 = smov 0   ;;  %s4811_s6 = smov 0  }
  0x1e   :  { %s4813_s10 = smov 0   ;;  %s4815_s0 = smov 0  }
  0x1f LB: > { %5768 = sst [smem:[#allocation7_spill]] %s4583_s8  ;;  %s3896_s11 = sadd.s32 4294967295, %s4611_s0   ;;  %s4611_s0 = sphi %s4815_s0, %s41_s0   ;;  %s4607_s10 = sphi %s4813_s10, %s5861_s10   ;;  %s4603_s6 = sphi %s4811_s6, %s5860_s6   ;;  %s4599_s3 = sphi %s4809_s3, %s5859_s3   ;;  %s4595_s30 = sphi %s4807_s30, %s5858_s30   ;;  %s4591_s9 = sphi %s4805_s9, %s5857_s9   ;;  %s4587_s5 = sphi %s4803_s5, %s5856_s5   ;;  %s4583_s8 = sphi %s4801_s8, %s5855_s8  }
  0x20   : > { %5769 = sst [smem:[#allocation8_spill]] %s4587_s5  ;;  %s3897_s29 = sadd.s32 4294967294, %s4611_s0  }
  0x21   : > { %5770 = sst [smem:[#allocation9_spill]] %s4591_s9  ;;  %s50_s2 = sadd.s32 1, %s4603_s6 }
  0x22   : > { %5771 = sst [smem:[#allocation10_spill]] %s4595_s30  ;;  %p51_p0 = scmp.ge.s32.totalorder %s50_s2, 2 }
  0x23   : > { %5772 = sst [smem:[#allocation11_spill]] %s4599_s3  ;;  %s53_s7 = sadd.s32 1, %s4607_s10 }
  0x24   : > { %5773 = sst [smem:[#allocation12_spill]] %s4603_s6  ;;  %p795_p1 = scmp.ne.s32.totalorder %s4591_s9, %s4587_s5 }
  0x25   : > { %5774 = sst [smem:[#allocation13_spill]] %s4607_s10  ;;  %p796_p2 = scmp.eq.s32.totalorder %s3896_s11, 3 }
  0x26   : > { %5775 = sst [smem:[#allocation14_spill]] %s4611_s0  ;;  %s5863_s2 = smov (%p51_p0, %s50_s2), 0 }
  0x27   : > { %5776 = sst [smem:[#allocation15_spill]] %s5863_s2  ;;  %s5865_s7 = smov (!%p51_p0, %s53_s7), %s4607_s10 }
  0x28   : > { %s780_s12 = ssub.s32 %s4603_s6, %s5863_s2  ;;  %p4852_p3 = por %p796_p2, %p795_p1 }
  0x29   : > { %p55_p4 = scmp.ge.s32.totalorder %s5865_s7, 2  ;;  %p801_p5 = scmp.ne.s32.totalorder %s4587_s5, %s4583_s8 }
  0x2a   : > { %s5777_s1 = scalar_select %p4852_p3, 1, 0 }
  0x2b   : > { %p802_p6 = scmp.eq.s32.totalorder %s3897_s29, 3  ;;  %p3900_p7 = scmp.ge.s32.totalorder %s4611_s0, 1 }
  0x2c   : > { %5778 = sst [smem:[#allocation16_spill]] %s5777_s1  ;;  %s5867_s7 = smov (%p55_p4, %s5865_s7), 0 }
  0x2d   : > { %5779 = sst [smem:[#allocation17_spill]] %s5867_s7  ;;  %p4861_p8 = por %p802_p6, %p801_p5 }
  0x2e   : > { %p1008_p9 = scmp.lt.s32.totalorder %s4611_s0, 5  ;;  %s781_s11 = ssub.s32 %s4607_s10, %s5867_s7 }
  0x2f   : > { %s5780_s4 = scalar_select %p4861_p8, 1, 0 }
  0x30   : > { %s785_s28 = sadd.s32 1, %s4591_s9  ;;  %s782_s27 = sor.u32 %s781_s11, %s780_s12 }
  0x31   : > { %5781 = sst [smem:[#allocation18_spill]] %s5780_s4  ;;  %p1009_p10 = pnand %p3900_p7, %p1008_p9 }
  0x32   : > { %p783_p11 = scmp.eq.s32.totalorder %s782_s27, 0 }
  0x33   : > { %1012 = sbr.rel (%p1009_p10) target bundleno = 4690 (0x1252), region = 132 }
  0x34   : > { %s4870_s2 = scalar_select %p783_p11, %s4591_s9, %s785_s28  }
  0x36   : > { %5782 = sst [smem:[#allocation19_spill]] %s4870_s2 }
  0x3a   : > { %s5728_s29 = sand.u32 1, %s4587_s5   ;;  %p1181_p12 = scmp.lt.s32.totalorder %s4599_s3, 1 }
  0x3b   : > { %s4876_s6 = sshll.u32 %s5728_s29, 3  ;;  %p1203_p13 = scmp.lt.s32.totalorder %s4595_s30, 1 }
  0x3c   : > { %s1182_s7 = scalar_select %p1181_p12, %s4599_s3, 1 }
  0x3d   : > { %s4881_s10 = scalar_select %p1203_p13, %s4595_s30, 1 }
  0x3e   : > { %s3902_s27 = sshll.u32 %s1182_s7, 3  ;;  %s3903_s28 = sshll.u32 %s1182_s7, 2 }
  0x3f   : > { %s5783_s2 = sld [smem:[#allocation29_spill]]  ;;  %s5785_s8 = sld [smem:[#allocation30_spill]] }
  0x40   : > { %s4307_s1 = smul.u32 40, %s1182_s7  ;;  %s5787_s30 = sld [smem:[#allocation33_spill]] }
  0x41   : > { %s4308_s25 = smul.u32 80, %s1182_s7  ;;  %s3994_s24 = sshll.u32 %s4881_s10, 4 }
  0x42   : > { %s5793_s5 = sld [smem:[#allocation32_spill]]  ;;  %s5796_s11 = sld [smem:[#allocation37_spill]] }
  0x43   : > { %s5802_s14 = sld [smem:[#allocation42_spill]]  ;;  %s5803_s16 = sld [smem:[#allocation43_spill]] }
  0x44   : > { %s5804_s18 = sld [smem:[#allocation44_spill]]  ;;  %s5808_s22 = sld [smem:[#allocation47_spill]] }
  0x45   : > { %s4886_s9 = scalar_lea.vmem %s5783_s2, %s3902_s27  ;;  %s4891_s0 = scalar_lea.vmem %s5785_s8, %s3903_s28 }
  0x46   : > { %5784 = sst [smem:[#allocation20_spill]] %s4886_s9  ;;  %s4896_s26 = scalar_lea.vmem %s5787_s30, %s3902_s27 }
  0x47   : > { %5786 = sst [smem:[#allocation21_spill]] %s4891_s0  ;;  %s5789_s2 = sld [smem:[#allocation31_spill]] }
  0x48   : > { %5788 = sst [smem:[#allocation22_spill]] %s4896_s26  ;;  %s5791_s8 = sld [smem:[#allocation35_spill]] }
  0x49   : > { %s4912_s30 = scalar_lea.vmem %s5793_s5, %s4308_s25  ;;  %s5799_s28 = sld [smem:[#allocation39_spill]] }
  0x4a   : > { %5794 = sst [smem:[#allocation25_spill]] %s4912_s30  ;;  %s3998_s5 = sshll.u32 %s4881_s10, 5 }
  0x4b   : > { %s4966_s4 = scalar_lea.vmem %s5804_s18, %s3994_s24  ;;  %s5813_s27 = sld [smem:[#allocation51_spill]] }
  0x4c   : > { %5805 = sst [smem:[#allocation27_spill]] %s4966_s4  ;;  %s5814_s12 = sld [smem:[#allocation52_spill]] }
  0x4d   : > { %s4902_s9 = scalar_lea.vmem %s5789_s2, %s4307_s1  ;;  %s4921_s2 = scalar_lea.vmem %s5796_s11, %s3994_s24 }
  0x4e   : > { %5790 = sst [smem:[#allocation23_spill]] %s4902_s9  ;;  %s4907_s29 = scalar_lea.vmem %s5791_s8, %s3994_s24 }
  0x4f   : > { %5792 = sst [smem:[#allocation24_spill]] %s4907_s29  ;;  %s4930_s25 = scalar_lea.vmem %s5799_s28, %s3994_s24 }
  0x50   : > { %5797 = sst [smem:[#allocation26_spill]] %s4921_s2  ;;  %s4947_s29 = scalar_lea.vmem %s5802_s14, %s3994_s24 }
  0x51   : > { %s4961_s2 = scalar_lea.vmem %s5803_s16, %s3998_s5  ;;  %s4983_s14 = scalar_lea.vmem %s5808_s22, %s3994_s24 }
  0x52   : > { %5809 = sst [smem:[#allocation28_spill]] %s4983_s14  ;;  %s5810_s16 = sld [smem:[#allocation48_spill]] }
  0x53   : > { %s5811_s8 = sld [smem:[#allocation49_spill]]  ;;  %s5812_s9 = sld [smem:[#allocation50_spill]] }
  0x54   : > { %s1281_s21 = scalar_lea.vmem %s5813_s27, %s4881_s10  ;;  %s1284_s22 = scalar_lea.vmem %s5814_s12, %s4881_s10 }
  0x55   : > { %s1180_s14 = scalar_lea.vmem [#allocation4], %s4876_s6  ;;  %s5815_s23 = sld [smem:[#allocation10_spill]] }
  0x58   : > { %s1270_s18 = scalar_lea.vmem %s5810_s16, %s4881_s10 }
  0x59   : > { %s4992_s0 = scalar_lea.vmem %s5811_s8, %s3998_s5  ;;  %s1278_s20 = scalar_lea.vmem %s5812_s9, %s4881_s10 }
  0x5b   : > { %p3923_p0 = scmp.ne.s32.totalorder %s5815_s23, 0 }
  0x5c   : > { %s5816_s16 = sld [smem:[#allocation20_spill]] (!%p3923_p0)  ;;  %vm1291_vm0 = vcmask (!%p3923_p0), 261120  }
  0x5d   : > { %1289 = sbr.rel (%p3923_p0) target bundleno = 100 (0x64), region = 136 }
  0x62   : > { %v1290_v0 = vld [vmem:[%s5816_s16] sm:$0xff] (!%p3923_p0) }
  0x63   : > { %1292 = vst.msk [vmem:[#allocation2] sm:$0xff] (!%p3923_p0), %vm1291_vm0, %v1290_v0 }
  0x64 PF: > { %s5817_s5 = sld [smem:[#allocation24_spill]]  ;;  %s5818_s9 = sld [smem:[#allocation21_spill]]  ;;  %v4613_v2 = vmov 0.0   ;;  %vm4614_vm1 = vmmov 0   ;;  %vm1321_vm2 = vcmask 261120   ;;  %vm1475_vm3 = vcmask 1043456  }
  0x65   : > { %4078 = vmatprep.subr.bf16.mxu0 %v4613_v2  ;;  %4100 = vmatprep.subr.bf16.mxu1 %v4613_v2  ;;  %s5819_s27 = sld [smem:[#allocation26_spill]]  ;;  %s5820_s7 = sld [smem:[#allocation36_spill]]  ;;  %vm1471_vm4 = vcmask 64512   ;;  %vm1694_vm5 = vcmask 130112   ;;  %vm1809_vm6 = vcmask 195712   ;;  %vm1924_vm7 = vcmask 261312  }
  0x66   : > { %4082 = vmatprep.mubr.msk.bf16.mxu0 %vm4614_vm1, %v4613_v2  ;;  %4102 = vmatprep.mubr.msk.bf16.mxu1 %vm4614_vm1, %v4613_v2  ;;  %s4615_s28 = smov 96   ;;  %s4616_s30 = smov 112   ;;  %vm2326_vm8 = vcmask 392448   ;;  %vm2337_vm9 = vcmask 31744   ;;  %vm2673_vm10 = vcmask 130048   ;;  %vm2717_vm11 = vcmask 523264  }
  0x67   : > { %s4617_s3 = smov 120   ;;  %s4618_s26 = smov 104  }
  0x68   : > { %s5822_s12 = sld [smem:[#allocation38_spill]]  ;;  %s4619_s16 = smov 8  }
  0x69   : > { %s5824_s4 = sld [smem:[#allocation40_spill]]  ;;  %s4629_s24 = smov 124  }
  0x6a   : > { %v4464_v1 = vld [vmem:[%s5817_s5] sm:$0xff]   ;;  %v4465_v3 = vld [vmem:[%s5817_s5 + $0x8] sm:$0xff]   ;;  %s4620_s5 = smov 16  }
  0x6b   : > { %4079 = vmatpush3.bf16.msra.mxu0 %v4464_v1  ;;  %v5015_v4 = vld [vmem:[#allocation2] sm:$0xff]  ;;  %s5821_s8 = scalar_lea.vmem %s5820_s7, %s4881_s10  ;;  %v4467_v11 = vld [vmem:[%s5819_s27 + $0x8] sm:$0xff]   ;;  %s5826_s7 = sld [smem:[#allocation23_spill]] }
  0x6c   : > { %v5018_v5 = vld [vmem:[%s5818_s9] sm:$0xf]  ;;  %4080 = vmatprep.subr.bf16.mxu0 %v4613_v2  ;;  %v1369_v16 = vpack.c.bf16 %v5015_v4, %v5015_v4  ;;  %s4621_s9 = smov 24  }
  0x6d   : > { %v1295_v6 = vunpack.c.l.bf16 %v5018_v5  ;;  %v4466_v9 = vld [vmem:[%s5819_s27] sm:$0xff]   ;;  %s4635_s27 = smov 84  }
  0x6e   : > { %v3924_v10 = vld [vmem:[%s5821_s8] ss:$0 sm:$0xff]  ;;  %s5823_s23 = scalar_lea.vmem %s5822_s12, %s4881_s10  ;;  %s5827_s8 = sld [smem:[#allocation41_spill]] }
  0x6f   : > { %v1296_v7 = vadd.f32 %v1295_v6, %v5015_v4  ;;  %4081 = vmatpush3.bf16.msra.mxu0 %v4465_v3  ;;  %v3928_v40 = vld [vmem:[%s5823_s23] ss:$0 sm:$0xff]  ;;  %s5825_s11 = scalar_lea.vmem %s5824_s4, %s4881_s10  ;;  %s5829_s23 = scalar_lea.vmem %s5705_s13, %s4881_s10 }
  0x70   : > { %4086 = vmatprep.subr.bf16.mxu0 %v4613_v2  ;;  %s5830_s4 = scalar_lea.vmem %s5709_s17, %s4881_s10  ;;  %s4630_s12 = smov 116  }
  0x71   : > { %v1301_v8 = vpack.c.bf16 %v1296_v7, %v1296_v7  ;;  %v3959_v5 = vld [vmem:[%s5830_s4] ss:$0 sm:$0xff]  ;;  %s4636_s4 = smov 92  }
  0x73   : > { %4083 = vmatmul.mubr.msk.bf16.vlgmr.msra.gmra.mrb[0].mxu0 %vm1321_vm2, %v1301_v8 }
  0x74   : > { %4090 = vmatprep.mubr.msk.bf16.mxu0 %vm4614_vm1, %v4613_v2  ;;  %4087 = vmatpush3.bf16.msra.mxu0 %v4466_v9  ;;  %s5828_s1 = scalar_lea.vmem %s5827_s8, %s4881_s10  ;;  %s4626_s8 = smov 100  }
  0x75   : > { %4088 = vmatprep.subr.bf16.mxu0 %v4613_v2 }
  0x78   : > { %4089 = vmatpush3.bf16.msra.mxu0 %v4467_v11 }
  0x79   : > { %4094 = vmatprep.subr.bf16.mxu0 %v4613_v2 }
  0x7b   : > { %4091 = vmatmul.mubr.msk.bf16.vlgmr.msra.gmra.mrb[4].mxu0 %vm1321_vm2, %v1369_v16 }
  0x7c   : > { %4096 = vmatprep.mubr.msk.bf16.mxu0 %vm4614_vm1, %v4613_v2 }
 0x146   : > { %v1359_v12 = vpop.f32.mrb[0].mxu0 }
 0x147   : > { %v1360_v13 = vadd.f32 %v3924_v10, %v1359_v12  ;;  %v4084_v14 = vpop.f32.mrb[1].mxu0 }
 0x148   : > { %v1362_v15 = vpop.f32.mrb[2].mxu0 }
 0x149   : > { %v1468_v17 = vmul.f32 0.35355338, %v1360_v13  ;;  %1433 = vrot.lane.b32.xlu0 %v1360_v13, %s4615_s28  ;;  %v4085_v18 = vpop.f32.mrb[3].mxu0 }
 0x14b   : > { %v1469_v19 = vpack.c.bf16 %v1468_v17, %v1468_v17 }
 0x14d   : > { %1697 = vrot.lane.b32.xlu1 %v1469_v19, %s4616_s30  ;;  %1581 = vrot.lane.b32.xlu0 %v1469_v19, %s4617_s3 }
 0x14e   : > { %v1426_v21 = vpop.f32.mrb[4].mxu0 }
 0x14f   : > { %v4092_v22 = vpop.f32.mrb[5].mxu0  ;;  %v1427_v41 = vadd.f32 %v3928_v40, %v1426_v21 }
 0x150   : > { %v1429_v23 = vpop.f32.mrb[6].mxu0 }
 0x151   : > { %1812 = vrot.lane.b32.xlu0 %v1469_v19, %s4618_s26  ;;  %v4093_v24 = vpop.f32.mrb[7].mxu0  ;;  %v1531_v42 = vpack.c.bf16 %v1427_v41, %v1427_v41 }
 0x153   : > { %v1536_v43 = vsel %vm1475_vm3, %v1531_v42, 0 }
 0x154   : > { %4101 = vmatpush3.bf16.msra.mxu1 %v1536_v43 }
 0x155   : > { %4112 = vmatprep.subr.bf16.mxu1 %v4613_v2 }
 0x1bb   : > { %v1434_v20 = vpop.permute.xlu0 %1433 }
 0x1bc   : > { %1436 = vxpose.xlu1.b32.start.end [1/1] (short) (narrow) %v1434_v20, 32 }
 0x1bf   : > { %v1698_v25 = vpop.permute.xlu1 %1697  ;;  %v1582_v35 = vpop.permute.xlu0 %1581 }
 0x1c3   : > { %v1813_v39 = vpop.permute.xlu0 %1812 }
 0x23c   : > { %v1452_v26 = vpop.trf.xlu1 }
 0x23d   : > { %v1470_v27 = vpack.c.bf16 %v1452_v26, %v1452_v26 }
 0x23f   : > { %v1477_v28 = vsel %vm1475_vm3, %v1470_v27, 0 }
 0x240   : > { %4095 = vmatpush3.bf16.msra.mxu0 %v1477_v28  ;;  %v1453_v29 = vpop.trf.xlu1 }
 0x241   : > { %v1579_v30 = vpack.c.bf16 %v1453_v29, %v1453_v29  ;;  %4106 = vmatprep.subr.bf16.mxu0 %v4613_v2 }
 0x243   : > { %4097 = vmatmul.mubr.msk.bf16.vlgmr.msra.gmra.mrb[8].mxu0 %vm1471_vm4, %v1469_v19  ;;  %v1587_v31 = vsel %vm1475_vm3, %v1579_v30, 0 }
 0x244   : > { %4107 = vmatpush3.bf16.msra.mxu0 %v1587_v31  ;;  %4108 = vmatprep.mubr.msk.bf16.mxu0 %vm4614_vm1, %v4613_v2  ;;  %v1454_v32 = vpop.trf.xlu1 }
 0x245   : > { %v1696_v33 = vpack.c.bf16 %v1454_v32, %v1454_v32  ;;  %4118 = vmatprep.subr.bf16.mxu0 %v4613_v2 }
 0x247   : > { %v1703_v34 = vsel %vm1475_vm3, %v1696_v33, 0 }
 0x248   : > { %v1455_v36 = vpop.trf.xlu1 }
 0x249   : > { %v1811_v37 = vpack.c.bf16 %v1455_v36, %v1455_v36 }
 0x24b   : > { %4109 = vmatmul.mubr.msk.bf16.vlgmr.msra.gmra.mrb[12].mxu0 %vm1471_vm4, %v1582_v35  ;;  %v1818_v38 = vsel %vm1475_vm3, %v1811_v37, 0 }
 0x24c   : > { %4119 = vmatpush3.bf16.msra.mxu0 %v1703_v34  ;;  %4120 = vmatprep.mubr.msk.bf16.mxu0 %vm4614_vm1, %v4613_v2 }
 0x24d   : > { %4130 = vmatprep.subr.bf16.mxu0 %v4613_v2 }
 0x253   : > { %4121 = vmatmul.mubr.msk.bf16.vlgmr.msra.gmra.mrb[16].mxu0 %vm1471_vm4, %v1698_v25 }
 0x254   : > { %4131 = vmatpush3.bf16.msra.mxu0 %v1818_v38  ;;  %4132 = vmatprep.mubr.msk.bf16.mxu0 %vm4614_vm1, %v4613_v2 }
 0x255   : > { %4142 = vmatprep.subr.bf16.mxu0 %v4613_v2 }
 0x25b   : > { %4133 = vmatmul.mubr.msk.bf16.vlgmr.msra.gmra.mrb[20].mxu0 %vm1471_vm4, %v1813_v39 }
 0x25c   : > { %4146 = vmatprep.mubr.msk.bf16.mxu0 %vm4614_vm1, %v4613_v2 }
 0x316   : > { %v1513_v44 = vpop.f32.mrb[8].mxu0 }
 0x317   : > { %v4098_v45 = vpop.f32.mrb[9].mxu0  ;;  %v1519_v46 = vsel %vm1471_vm4, %v1513_v44, -inf }
 0x318   : > { %1520 = vmax.xlane.f32.xlu0 %v1519_v46  ;;  %v1516_v47 = vpop.f32.mrb[10].mxu0 }
 0x319   : > { %v4099_v48 = vpop.f32.mrb[11].mxu0 }
 0x31e   : > { %v1623_v49 = vpop.f32.mrb[12].mxu0 }
 0x31f   : > { %v4110_v50 = vpop.f32.mrb[13].mxu0  ;;  %v1629_v51 = vsel %vm1471_vm4, %v1623_v49, -inf }
 0x320   : > { %1630 = vmax.xlane.f32.xlu0 %v1629_v51  ;;  %v1626_v52 = vpop.f32.mrb[14].mxu0 }
 0x321   : > { %v4111_v53 = vpop.f32.mrb[15].mxu0 }
 0x326   : > { %v1739_v54 = vpop.f32.mrb[16].mxu0 }
 0x327   : > { %v4122_v55 = vpop.f32.mrb[17].mxu0  ;;  %v1745_v56 = vsel %vm1471_vm4, %v1739_v54, -inf }
 0x328   : > { %1746 = vmax.xlane.f32.xlu1 %v1745_v56  ;;  %v1742_v57 = vpop.f32.mrb[18].mxu0  ;;  %v4469_v55 = vld [vmem:[%s4930_s25 + $0x8] sm:$0xff]  }
 0x329   : > { %v4123_v58 = vpop.f32.mrb[19].mxu0 }
 0x32e   : > { %v1854_v59 = vpop.f32.mrb[20].mxu0 }
 0x32f   : > { %v4134_v60 = vpop.f32.mrb[21].mxu0  ;;  %v1860_v61 = vsel %vm1471_vm4, %v1854_v59, -inf }
 0x330   : > { %1861 = vmax.xlane.f32.xlu0 %v1860_v61  ;;  %v1857_v62 = vpop.f32.mrb[22].mxu0 }
 0x331   : > { %v4135_v63 = vpop.f32.mrb[23].mxu0 }
 0x346   : > { %1642 = vrot.lane.b32.xlu0 %v1531_v42, %s4617_s3 }
 0x3a5   : > { %v1521_v0 = vpop.xlane.xlu0 %1520 }
 0x3a6   : > { %v1522_v1 = vsub.f32 %v1513_v44, %v1521_v0 }
 0x3a8   : > { %v1523_v3 = vmul.f32 1.442695, %v1522_v1 }
 0x3aa   : > { %4485 = vpow2.f32 %v1523_v3 }
 0x3ad   : > { %v1631_v7 = vpop.xlane.xlu0 %1630 }
 0x3ae   : > { %v1632_v8 = vsub.f32 %v1623_v49, %v1631_v7 }
 0x3b0   : > { %v1633_v9 = vmul.f32 1.442695, %v1632_v8 }
 0x3b2   : > { %4487 = vpow2.f32 %v1633_v9  ;;  %v3940_v9 = vld [vmem:[%s5825_s11] ss:$0 sm:$0xff]  ;;  %s4623_s11 = smov 118  }
 0x3b4   : > { %v4486_v10 = vpop.eup %4485 }
 0x3b5   : > { %v1525_v11 = vsel %vm1471_vm4, %v4486_v10, 0.0  ;;  %v1747_v14 = vpop.xlane.xlu1 %1746 }
 0x3b6   : > { %1526 = vadd.xlane.f32.xlu0 %v1525_v11  ;;  %v1748_v15 = vsub.f32 %v1739_v54, %v1747_v14  ;;  %v4468_v54 = vld [vmem:[%s4930_s25] sm:$0xff]   ;;  %s5832_s25 = sld [smem:[#allocation25_spill]] }
 0x3b7   : > { %4143 = vmatpush3.bf16.msra.mxu0 %v4468_v54 }
 0x3b8   : > { %v1749_v17 = vmul.f32 1.442695, %v1748_v15  ;;  %4144 = vmatprep.subr.bf16.mxu0 %v4613_v2 }
 0x3ba   : > { %4489 = vpow2.f32 %v1749_v17  ;;  %v4470_v17 = vld [vmem:[%s4947_s29] sm:$0xff]  }
 0x3bb   : > { %4145 = vmatpush3.bf16.msra.mxu0 %v4469_v55 }
 0x3bc   : > { %v4488_v12 = vpop.eup %4487  ;;  %4185 = vmatprep.subr.bf16.mxu0 %v4613_v2 }
 0x3bd   : > { %v1635_v13 = vsel %vm1471_vm4, %v4488_v12, 0.0  ;;  %v1862_v16 = vpop.xlane.xlu0 %1861 }
 0x3be   : > { %1636 = vadd.xlane.f32.xlu0 %v1635_v13  ;;  %v1863_v18 = vsub.f32 %v1854_v59, %v1862_v16 }
 0x3c0   : > { %v1864_v19 = vmul.f32 1.442695, %v1863_v18  ;;  %v4471_v18 = vld [vmem:[%s4947_s29 + $0x8] sm:$0xff]   ;;  %s4625_s29 = smov 102  }
 0x3c1   : > { %v1643_v24 = vpop.permute.xlu0 %1642 }
 0x3c2   : > { %4491 = vpow2.f32 %v1864_v19  ;;  %v1648_v30 = vsel %vm1475_vm3, %v1643_v24, 0  ;;  %v2242_v19 = vld [vmem:[%s4961_s2] sm:$0xff]  ;;  %v4474_v24 = vld [vmem:[%s5826_s7 + $0x10] sm:$0xff]  }
 0x3c4   : > { %v4490_v20 = vpop.eup %4489 }
 0x3c5   : > { %v1751_v21 = vsel %vm1471_vm4, %v4490_v20, 0.0 }
 0x3cc   : > { %v4492_v22 = vpop.eup %4491 }
 0x3cd   : > { %v1866_v23 = vsel %vm1471_vm4, %v4492_v22, 0.0 }
 0x3d4   : > { %1757 = vrot.lane.b32.xlu0 %v1531_v42, %s4616_s30 }
 0x3f3   : > { %1752 = vadd.xlane.f32.xlu0 %v1751_v21  ;;  %v4472_v21 = vld [vmem:[%s5826_s7] sm:$0xff]  }
 0x3f7   : > { %1867 = vadd.xlane.f32.xlu0 %v1866_v23  ;;  %v4622_v23 = vmov 0.0|0.0  }
 0x40d   : > { %1872 = vrot.lane.b32.xlu0 %v1531_v42, %s4618_s26 }
 0x443   : > { %v1527_v25 = vpop.xlane.xlu0 %1526 }
 0x444   : > { %4493 = vrcp.f32 %v1527_v25 }
 0x44b   : > { %v1637_v26 = vpop.xlane.xlu0 %1636 }
 0x44c   : > { %4495 = vrcp.f32 %v1637_v26 }
 0x44e   : > { %v4494_v27 = vpop.eup %4493 }
 0x44f   : > { %v1529_v28 = vmul.f32 %v4494_v27, %v4486_v10  ;;  %v1758_v33 = vpop.permute.xlu0 %1757 }
 0x450   : > { %v1763_v35 = vsel %vm1475_vm3, %v1758_v33, 0  ;;  %v2245_v33 = vld [vmem:[%s4961_s2 + $0x18] sm:$0xff] }
 0x451   : > { %v1530_v29 = vpack.c.bf16 %v1529_v28, %v1529_v28 }
 0x453   : > { %4103 = vmatmul.mubr.msk.bf16.vlgmr.msra.gmra.mrb[0].mxu1 %vm1471_vm4, %v1530_v29 }
 0x454   : > { %4113 = vmatpush3.bf16.msra.mxu1 %v1648_v30  ;;  %4114 = vmatprep.mubr.msk.bf16.mxu1 %vm4614_vm1, %v4613_v2  ;;  %v4475_v30 = vld [vmem:[%s5826_s7 + $0x18] sm:$0xff]  }
 0x455   : > { %4124 = vmatprep.subr.bf16.mxu1 %v4613_v2 }
 0x456   : > { %v4496_v31 = vpop.eup %4495 }
 0x457   : > { %v1639_v32 = vmul.f32 %v4496_v31, %v4488_v12  ;;  %v4476_v31 = vld [vmem:[%s5826_s7 + $0x20] sm:$0xff]  }
 0x459   : > { %v1640_v34 = vpack.c.bf16 %v1639_v32, %v1639_v32  ;;  %v2244_v32 = vld [vmem:[%s4961_s2 + $0x10] sm:$0xff] }
 0x45b   : > { %4115 = vmatmul.mubr.msk.bf16.vlgmr.msra.gmra.mrb[4].mxu1 %vm1471_vm4, %v1640_v34  ;;  %v4289_v34 = vpack.c.bf16 %v2245_v33, %v2244_v32  ;;  %v2176_v32 = vld [vmem:[%s5832_s25 + $0x20] sm:$0xff]  ;;  %v2177_v33 = vld [vmem:[%s5832_s25 + $0x28] sm:$0xff] }
 0x45c   : > { %4125 = vmatpush3.bf16.msra.mxu1 %v1763_v35  ;;  %4126 = vmatprep.mubr.msk.bf16.mxu1 %vm4614_vm1, %v4613_v2 }
 0x45d   : > { %4136 = vmatprep.subr.bf16.mxu1 %v4613_v2 }
 0x480   : > { %v1753_v36 = vpop.xlane.xlu0 %1752 }
 0x481   : > { %4497 = vrcp.f32 %v1753_v36 }
 0x484   : > { %v1868_v37 = vpop.xlane.xlu0 %1867 }
 0x485   : > { %4499 = vrcp.f32 %v1868_v37 }
 0x488   : > { %v1873_v40 = vpop.permute.xlu0 %1872 }
 0x489   : > { %v1878_v43 = vsel %vm1475_vm3, %v1873_v40, 0 }
 0x48b   : > { %v4498_v38 = vpop.eup %4497 }
 0x48c   : > { %v1755_v39 = vmul.f32 %v4498_v38, %v4490_v20  ;;  %v2243_v20 = vld [vmem:[%s4961_s2 + $0x8] sm:$0xff]  ;;  %s5831_s2 = sld [smem:[#allocation22_spill]] }
 0x48e   : > { %v1756_v41 = vpack.c.bf16 %v1755_v39, %v1755_v39 }
 0x48f   : > { %v4500_v42 = vpop.eup %4499 }
 0x490   : > { %4127 = vmatmul.mubr.msk.bf16.vlgmr.msra.gmra.mrb[8].mxu1 %vm1471_vm4, %v1756_v41  ;;  %v1870_v44 = vmul.f32 %v4500_v42, %v4492_v22  ;;  %v4286_v22 = vpack.c.bf16 %v2243_v20, %v2242_v19 }
 0x491   : > { %4137 = vmatpush3.bf16.msra.mxu1 %v1878_v43  ;;  %4138 = vmatprep.mubr.msk.bf16.mxu1 %vm4614_vm1, %v4613_v2 }
 0x492   : > { %4150 = vmatprep.subr.bf16.mxu1 %v4613_v2  ;;  %v1871_v45 = vpack.c.bf16 %v1870_v44, %v1870_v44 }
 0x498   : > { %4139 = vmatmul.mubr.msk.bf16.vlgmr.msra.gmra.mrb[12].mxu1 %vm1471_vm4, %v1871_v45 }
 0x499   : > { %4154 = vmatprep.mubr.msk.bf16.mxu1 %vm4614_vm1, %v4613_v2  ;;  %4151 = vmatpush3.bf16.msra.mxu1 %v4470_v17 }
 0x49a   : > { %4152 = vmatprep.subr.bf16.mxu1 %v4613_v2 }
 0x49d   : > { %4153 = vmatpush3.bf16.msra.mxu1 %v4471_v18 }
 0x49e   : > { %4285 = vmatprep.subr.bf16.mxu1 %v4622_v23 }
 0x4a0   : > { %4155 = vmatmul.mubr.msk.bf16.vlgmr.msra.gmra.mrb[16].mxu1 %vm1321_vm2, %v4472_v21  ;;  %v4633_v21 = vmov 3  }
 0x4a1   : > { %4287 = vmatpush3.bf16.msra.mxu1 %v4286_v22  ;;  %4158 = vmatprep.mubr.msk.bf16.mxu1 %vm4614_vm1, %v4613_v2 }
 0x4a2   : > { %4288 = vmatprep.subr.bf16.mxu1 %v4622_v23  ;;  %v2180_v23 = vld [vmem:[%s5832_s25 + $0x40] sm:$0xff] }
 0x4a5   : > { %4290 = vmatpush3.bf16.msra.mxu1 %v4289_v34 }
 0x4a6   : > { %4221 = vmatprep.subr.bf16.mxu1 %v4613_v2 }
 0x526   : > { %v1572_v46 = vpop.f32.mrb[0].mxu1 }
 0x527   : > { %1578 = vst.msk [vmem:[#allocation3] sm:$0xff] %vm1471_vm4, %v1572_v46  ;;  %v4104_v47 = vpop.f32.mrb[1].mxu1 }
 0x528   : > { %v1575_v48 = vpop.f32.mrb[2].mxu1 }
 0x529   : > { %v4105_v49 = vpop.f32.mrb[3].mxu1 }
 0x52e   : > { %v1684_v50 = vpop.f32.mrb[4].mxu1 }
 0x52f   : > { %1691 = vrot.lane.b32.xlu1 %v1684_v50, %s4619_s16  ;;  %v4116_v51 = vpop.f32.mrb[5].mxu1 }
 0x530   : > { %v1687_v52 = vpop.f32.mrb[6].mxu1  ;;  %v3944_v51 = vld [vmem:[%s5828_s1] ss:$0 sm:$0xff]  ;;  %s4628_s1 = smov 126  }
 0x531   : > { %v4117_v53 = vpop.f32.mrb[7].mxu1 }
 0x532   : > { %v3945_v53 = vld [vmem:[%s5829_s23] ss:$0 sm:$0xff]  ;;  %s4632_s23 = smov 108  }
 0x563   : > { %v1799_v56 = vpop.f32.mrb[8].mxu1 }
 0x564   : > { %1806 = vrot.lane.b32.xlu0 %v1799_v56, %s4620_s5  ;;  %v4128_v57 = vpop.f32.mrb[9].mxu1 }
 0x565   : > { %v1802_v58 = vpop.f32.mrb[10].mxu1 }
 0x566   : > { %v4129_v59 = vpop.f32.mrb[11].mxu1 }
 0x56b   : > { %v1914_v60 = vpop.f32.mrb[12].mxu1 }
 0x56c   : > { %1921 = vrot.lane.b32.xlu0 %v1914_v60, %s4621_s9  ;;  %v4140_v61 = vpop.f32.mrb[13].mxu1 }
 0x56d   : > { %v1917_v62 = vpop.f32.mrb[14].mxu1 }
 0x56e   : > { %v4141_v63 = vpop.f32.mrb[15].mxu1 }
 0x573   : > { %v5155_v35 = vpop.f32.mrb[16].mxu1 }
 0x574   : > { %v4156_v36 = vpop.f32.mrb[17].mxu1 }
 0x575   : > { %v5157_v37 = vpop.f32.mrb[18].mxu1 }
 0x576   : > { %v4157_v38 = vpop.f32.mrb[19].mxu1 }
 0x5a1   : > { %v1692_v0 = vpop.permute.xlu1 %1691 }
 0x5a2   : > { %1695 = vst.msk [vmem:[#allocation3] sm:$0xff] %vm1694_vm5, %v1692_v0 }
 0x5d6   : > { %v1807_v1 = vpop.permute.xlu0 %1806 }
 0x5d7   : > { %1810 = vst.msk [vmem:[#allocation3] sm:$0xff] %vm1809_vm6, %v1807_v1 }
 0x5de   : > { %v1922_v3 = vpop.permute.xlu0 %1921 }
 0x5df   : > { %1925 = vst.msk [vmem:[#allocation3] sm:$0xff] %vm1924_vm7, %v1922_v3 }
 0x5e6   : > { %v1926_v7 = vld [vmem:[#allocation3] sm:$0xff] }
 0x5e7   : > { %v1931_v8 = vpack.c.bf16 %v1926_v7, %v1926_v7 }
 0x5e9   : > { %4147 = vmatmul.mubr.msk.bf16.vlgmr.msra.gmra.mrb[24].mxu0 %vm1321_vm2, %v1931_v8  ;;  %v4627_v8 = vmov 2  }
 0x5ea   : > { %4187 = vmatprep.mubr.msk.bf16.mxu0 %vm4614_vm1, %v4613_v2  ;;  %4422 = vset.pattern.permute.xlu1 %v4627_v8 }
 0x6bc   : > { %v1988_v10 = vpop.f32.mrb[24].mxu0 }
 0x6bd   : > { %v1989_v11 = vadd.f32 %v3940_v9, %v1988_v10  ;;  %v4148_v12 = vpop.f32.mrb[25].mxu0  ;;  %v4631_v9 = vmov 0   ;;  %v5212_v10 = vld [vmem:[%s5831_s2] sm:$0xff]  ;;  %s4655_s2 = smov [#allocation4]  }
 0x6be   : > { %v1991_v13 = vpop.f32.mrb[26].mxu0  ;;  %4426 = vset.pattern.permute.xlu0 %v4631_v9 }
 0x6bf   : > { %v4149_v14 = vpop.f32.mrb[27].mxu0  ;;  %v1994_v15 = vadd.f32 %v1989_v11, %v5015_v4  ;;  %v4473_v4 = vld [vmem:[%s5826_s7 + $0x8] sm:$0xff]   ;;  %s4624_s7 = smov 110   ;;  %v2613_v11 = vmul.f32 4.0, %v5212_v10 }
 0x6c0   : > { %4159 = vmatmul.mubr.msk.bf16.gmra.mrb[20].mxu1 %vm1321_vm2, %v4473_v4 }
 0x6c1   : > { %v1997_v16 = vsel %vm1321_vm2, %v1994_v15, 0.0  ;;  %4162 = vmatprep.mubr.msk.bf16.mxu1 %vm4614_vm1, %v4613_v2  ;;  %v5216_v14 = vadd.f32 -0.5, %v2613_v11 }
 0x6c2   : > { %1998 = vadd.xlane.f32.xlu0 %v1997_v16 }
 0x6c8   : > { %4163 = vmatmul.mubr.msk.bf16.gmra.mrb[24].mxu1 %vm1321_vm2, %v4474_v24 }
 0x6c9   : > { %4166 = vmatprep.mubr.msk.bf16.mxu1 %vm4614_vm1, %v4613_v2 }
 0x6d0   : > { %4167 = vmatmul.mubr.msk.bf16.gmra.mrb[28].mxu1 %vm1321_vm2, %v4475_v30  ;;  %v2173_v30 = vld [vmem:[%s5832_s25 + $0x8] sm:$0xff] }
 0x6d1   : > { %4170 = vmatprep.mubr.msk.bf16.mxu1 %vm4614_vm1, %v4613_v2 }
 0x6d8   : > { %4171 = vmatmul.mubr.msk.bf16.gmra.mrb[32].mxu1 %vm1321_vm2, %v4476_v31  ;;  %v2174_v31 = vld [vmem:[%s5832_s25 + $0x10] sm:$0xff] }
 0x6d9   : > { %4182 = vmatprep.mubr.msk.f32.mxu1 %vm4614_vm1, %v4613_v2 }
 0x74f   : > { %v1999_v25 = vpop.xlane.xlu0 %1998 }
 0x750   : > { %v2001_v26 = vmul.f32 0.03125, %v1999_v25 }
 0x752   : > { %v2002_v27 = vsub.f32 %v1994_v15, %v2001_v26 }
 0x754   : > { %v2003_v28 = vmul.f32 %v2002_v27, %v2002_v27 }
 0x756   : > { %v2004_v29 = vsel %vm1321_vm2, %v2003_v28, 0.0 }
 0x757   : > { %2005 = vadd.xlane.f32.xlu1 %v2004_v29  ;;  %v2172_v29 = vld [vmem:[%s5832_s25] sm:$0xff] }
 0x793   : > { %v5159_v39 = vpop.f32.mrb[20].mxu1 }
 0x794   : > { %v4160_v40 = vpop.f32.mrb[21].mxu1 }
 0x795   : > { %v5161_v41 = vpop.f32.mrb[22].mxu1 }
 0x796   : > { %v4161_v42 = vpop.f32.mrb[23].mxu1 }
 0x79b   : > { %v5163_v43 = vpop.f32.mrb[24].mxu1 }
 0x79c   : > { %v4164_v44 = vpop.f32.mrb[25].mxu1 }
 0x79d   : > { %v5165_v45 = vpop.f32.mrb[26].mxu1 }
 0x79e   : > { %v4165_v46 = vpop.f32.mrb[27].mxu1 }
 0x7a3   : > { %v5185_v57 = vpop.f32.mrb[28].mxu1 }
 0x7a4   : > { %v4168_v58 = vpop.f32.mrb[29].mxu1 }
 0x7a5   : > { %v5187_v59 = vpop.f32.mrb[30].mxu1 }
 0x7a6   : > { %v4169_v60 = vpop.f32.mrb[31].mxu1 }
 0x7ab   : > { %v5189_v61 = vpop.f32.mrb[32].mxu1 }
 0x7ac   : > { %v4172_v62 = vpop.f32.mrb[33].mxu1 }
 0x7ad   : > { %v5191_v63 = vpop.f32.mrb[34].mxu1 }
 0x7ae   : > { %v4173_v0 = vpop.f32.mrb[35].mxu1 }
 0x7e4   : > { %v2006_v47 = vpop.xlane.xlu1 %2005 }
 0x7e5   : > { %v2007_v48 = vmul.f32 0.03125, %v2006_v47 }
 0x7e7   : > { %v2008_v49 = vadd.f32 1e-05, %v2007_v48 }
 0x7e9   : > { %4501 = vrsqrt.f32 %v2008_v49 }
 0x7f3   : > { %v4502_v50 = vpop.eup %4501 }
 0x7f4   : > { %v2010_v52 = vmul.f32 %v4502_v50, %v2002_v27  ;;  %v2181_v27 = vld [vmem:[%s5832_s25 + $0x48] sm:$0xff] }
 0x7f6   : > { %v2017_v54 = vmul.f32 %v3944_v51, %v2010_v52 }
 0x7f8   : > { %v5177_v55 = vadd.f32 %v3945_v53, %v2017_v54 }
 0x7fa   : > { %v2025_v56 = vadd.f32 %v5177_v55, %v1295_v6 }
 0x7fc   : > { %4183 = vmatmul.mubr.msk.f32.vlgmr.msra.gmra.mrb[36].mxu1 %vm1321_vm2, %v2025_v56 }
 0x7fd   : > { %4223 = vmatprep.mubr.msk.bf16.mxu1 %vm4614_vm1, %v4613_v2 }
 0x8cf   : > { %v2322_v6 = vpop.f32.mrb[36].mxu1 }
 0x8d0   : > { %v5198_v1 = vadd.f32 %v3959_v5, %v2322_v6  ;;  %v4184_v3 = vpop.f32.mrb[37].mxu1 }
 0x8d2   : > { %2468 = vrot.lane.b32.xlu1 %v5198_v1, %s4623_s11  ;;  %v2327_v7 = vsel %vm2326_vm8, %v5198_v1, -inf }
 0x8d3   : > { %2328 = vmax.xlane.f32.xlu0 %v2327_v7 }
 0x8d6   : > { %2526 = vrot.lane.b32.xlu1 %v5198_v1, %s4624_s7  ;;  %s5850_s7 = sld [smem:[#allocation53_spill]] }
 0x8da   : > { %2584 = vrot.lane.b32.xlu1 %v5198_v1, %s4625_s29  ;;  %s5833_s29 = scalar_lea.vmem %s5707_s15, %s4881_s10 }
 0x8db   : > { %v5282_v56 = vld [vmem:[%s5833_s29] ss:$0 sm:$0xff] }
 0x8dc   : > { %v2166_v58 = vadd.f32 %v5282_v56, %v5189_v61  ;;  %v2169_v60 = vadd.f32 %v5282_v56, %v5191_v63  ;;  %v2134_v3 = vadd.f32 %v5282_v56, %v5155_v35  ;;  %v2137_v61 = vadd.f32 %v5282_v56, %v5157_v37 }
 0x8dd   : > { %v2153_v37 = vadd.f32 %v5282_v56, %v5165_v45 }
 0x8de   : > { %3107 = vrot.lane.b32.xlu1 %v5198_v1, %s4626_s8  ;;  %s4521_s8 = sshll.u32 %s4655_s2, 4  ;;  %s4522_s8 = int_to_ptr.vmem [resolvable:$false] %s4521_s8 }
 0x8e9   : > { %2406 = vrot.lane.b32.xlu0 %v5198_v1, %s4628_s1  ;;  %s5834_s1 = sld [smem:[#allocation34_spill]] }
 0x8ed   : > { %2640 = vrot.lane.b32.xlu0 %v5198_v1, %s4629_s24  ;;  %s4648_s24 = smov 64  }
 0x8f1   : > { %2786 = vrot.lane.b32.xlu0 %v5198_v1, %s4630_s12 }
 0x8f5   : > { %2949 = vrot.lane.b32.xlu0 %v5198_v1, %s4632_s23  ;;  %s5838_s23 = sld [smem:[#allocation45_spill]] }
 0x944   : > { %v5226_v22 = vpop.permute.xlu1 %2468 }
 0x945   : > { %v2761_v4 = vadd.f32 %v5216_v14, %v5226_v22 }
 0x948   : > { %v5250_v34 = vpop.permute.xlu1 %2526 }
 0x949   : > { %v2924_v36 = vadd.f32 %v5216_v14, %v5250_v34 }
 0x94c   : > { %v5257_v38 = vpop.permute.xlu1 %2584 }
 0x94d   : > { %v3082_v49 = vadd.f32 %v5216_v14, %v5257_v38 }
 0x950   : > { %v3108_v40 = vpop.permute.xlu1 %3107 }
 0x960   : > { %v2329_v12 = vpop.xlane.xlu0 %2328 }
 0x961   : > { %v2330_v13 = vsub.f32 %v5198_v1, %v2329_v12 }
 0x963   : > { %v2331_v15 = vmul.f32 1.442695, %v2330_v13 }
 0x964   : > { %v5218_v16 = vpop.permute.xlu0 %2406 }
 0x965   : > { %4503 = vpow2.f32 %v2331_v15  ;;  %v2615_v17 = vadd.f32 %v5216_v14, %v5218_v16  ;;  %v2142_v15 = vadd.f32 %v5282_v56, %v5159_v39 }
 0x967   : > { %2618 = vperm.xlu1 %4422, %v2615_v17  }
 0x968   : > { %v2641_v18 = vpop.permute.xlu0 %2640 }
 0x969   : > { %v2643_v19 = vadd.f32 %v5216_v14, %v2641_v18 }
 0x96b   : > { %2646 = vperm.xlu1 %4422, %v2643_v19  }
 0x96c   : > { %v2787_v24 = vpop.permute.xlu0 %2786 }
 0x96d   : > { %v2789_v25 = vadd.f32 %v5216_v14, %v2787_v24 }
 0x96f   : > { %v5223_v20 = vpop.eup %4503  ;;  %4423 = vset.pattern.permute.xlu1 %v4633_v21 }
 0x970   : > { %2334 = vrot.lane.b32.xlu0 %v5223_v20, %s4615_s28  ;;  %2654 = vperm.xlu1 %4423, %v2643_v19   ;;  %v2950_v26 = vpop.permute.xlu0 %2949  ;;  %s4634_s28 = smov 88  }
 0x971   : > { %v2952_v28 = vadd.f32 %v5216_v14, %v2950_v26 }
 0x974   : > { %2224 = vperm.xlu0 %4426, %v2180_v23   ;;  %4424 = vset.pattern.permute.xlu1 %v4627_v8  ;;  %v2150_v23 = vadd.f32 %v5282_v56, %v5163_v43 }
 0x975   : > { %2764 = vperm.xlu1 %4424, %v2761_v4  }
 0x978   : > { %4427 = vset.pattern.permute.xlu0 %v4633_v21 }
 0x979   : > { %2626 = vperm.xlu0 %4427, %v2615_v17   ;;  %2792 = vperm.xlu1 %4424, %v2789_v25  }
 0x97d   : > { %2772 = vperm.xlu0 %4427, %v2761_v4   ;;  %4425 = vset.pattern.permute.xlu1 %v4633_v21 }
 0x97e   : > { %2800 = vperm.xlu1 %4425, %v2789_v25  }
 0x981   : > { %2439 = vrot.lane.b32.xlu0 %v5198_v1, %s4617_s3 }
 0x982   : > { %4428 = vset.pattern.permute.xlu1 %v4631_v9 }
 0x983   : > { %2229 = vperm.xlu1 %4428, %v2181_v27  }
 0x985   : > { %2963 = vperm.xlu0 %4427, %v2952_v28  }
 0x987   : > { %2184 = vperm.xlu1 %4428, %v2172_v29  }
 0x989   : > { %2351 = vrot.lane.b32.xlu0 %v5223_v20, %s4634_s28 }
 0x98a   : > { %4431 = vset.pattern.permute.xlu0 %v4627_v8 }
 0x98b   : > { %2189 = vperm.xlu1 %4428, %v2173_v30  }
 0x98d   : > { %2359 = vrot.lane.b32.xlu0 %v5223_v20, %s4635_s27  ;;  %s3554_s27 = sshll.u32 %s1180_s14, 4  ;;  %s5635_s27 = int_to_ptr.vmem [resolvable:$true] %s3554_s27 }
 0x98e   : > { %p4524_p5 = scmp.lt.s32.totalorder %s5635_s27, %s4522_s8 }
 0x98f   : > { %2194 = vperm.xlu1 %4428, %v2174_v31   ;;  %v4637_v31 = vmov 35  }
 0x993   : > { %2204 = vperm.xlu1 %4428, %v2176_v32   ;;  %v3110_v32 = vadd.f32 %v5216_v14, %v3108_v40  ;;  %v2179_v14 = vld [vmem:[%s5832_s25 + $0x38] sm:$0xff]  ;;  %v2178_v40 = vld [vmem:[%s5832_s25 + $0x30] sm:$0xff] }
 0x997   : > { %2209 = vperm.xlu1 %4428, %v2177_v33  }
 0x99b   : > { %2343 = vrot.lane.b32.xlu1 %v5223_v20, %s4636_s4  ;;  %s5840_s4 = sld [smem:[#allocation46_spill]] }
 0x99c   : > { %4429 = vset.pattern.permute.xlu1 %v4633_v21 }
 0x99f   : > { %2935 = vperm.xlu1 %4429, %v2924_v36  }
 0x9a1   : > { %s5841_s11 = scalar_lea.vmem %s5840_s4, %s4881_s10 }
 0x9a3   : > { %4430 = vset.pattern.permute.xlu1 %v4627_v8 }
 0x9a4   : > { %2955 = vperm.xlu1 %4430, %v2952_v28  }
 0x9e2   : > { %v2335_v42 = vpop.permute.xlu0 %2334 }
 0x9e3   : > { %v2338_v44 = vsel %vm2337_vm9, %v2335_v42, 0.0  ;;  %v4638_v42 = vmov 34  }
 0x9e4   : > { %2339 = vadd.xlane.f32.xlu1 %v2338_v44 }
 0x9e6   : > { %v5260_v46 = vpop.permute.xlu1 %2618 }
 0x9ea   : > { %v5262_v47 = vpop.permute.xlu1 %2646 }
 0x9ef   : > { %v5264_v48 = vpop.permute.xlu1 %2654 }
 0x9f3   : > { %v2225_v51 = vpop.permute.xlu0 %2224 }
 0x9f4   : > { %v5268_v50 = vpop.permute.xlu1 %2764  ;;  %v2240_v0 = vmul.f32 %v2225_v51, %v2166_v58  ;;  %v2175_v58 = vld [vmem:[%s5832_s25 + $0x18] sm:$0xff]  ;;  %s5839_s25 = scalar_lea.vmem %s5838_s23, %s4881_s10 }
 0x9f5   : > { %3085 = vperm.xlu1 %4430, %v3082_v49  }
 0x9f8   : > { %v5270_v52 = vpop.permute.xlu1 %2792  ;;  %v5273_v53 = vpop.permute.xlu0 %2626 }
 0x9f9   : > { %4432 = vset.pattern.permute.xlu1 %v4633_v21 }
 0x9fc   : > { %v5288_v5 = vpop.permute.xlu0 %2772 }
 0x9fd   : > { %v5275_v54 = vpop.permute.xlu1 %2800 }
 0xa00   : > { %v5298_v63 = vpop.permute.xlu0 %2439 }
 0xa02   : > { %v2230_v62 = vpop.permute.xlu1 %2229 }
 0xa03   : > { %v2241_v6 = vmul.f32 %v2230_v62, %v2169_v60  ;;  %v4639_v60 = vmov 39   ;;  %v4640_v62 = vmov 38  }
 0xa04   : > { %v5304_v18 = vpop.permute.xlu0 %2963 }
 0xa05   : > { %v5292_v7 = vpack.c.bf16 %v2241_v6, %v2240_v0  ;;  %v2377_v0 = vlaneseq }
 0xa06   : > { %v2185_v8 = vpop.permute.xlu1 %2184 }
 0xa07   : > { %v2232_v11 = vmul.f32 %v2185_v8, %v2134_v3  ;;  %4186 = vmatpush3.bf16.msra.mxu0 %v5292_v7  ;;  %v2378_v6 = vshrl.u32 %v2377_v0, 7  ;;  %v2368_v3 = vld [vmem:[%s5834_s1] sm:$0x3]  ;;  %s4523_s1 = scalar_lea.vmem %s4522_s8, 256 }
 0xa08   : > { %4191 = vmatprep.subr.bf16.mxu0 %v4613_v2  ;;  %v2352_v25 = vpop.permute.xlu0 %2351 }
 0xa09   : > { %v2354_v39 = vsel %vm2337_vm9, %v2352_v25, 0.0 }
 0xa0a   : > { %v2190_v12 = vpop.permute.xlu1 %2189 }
 0xa0b   : > { %v2233_v13 = vmul.f32 %v2190_v12, %v2137_v61  ;;  %v2379_v61 = vsub.s32 0, %v2378_v6 }
 0xa0c   : > { %v2360_v43 = vpop.permute.xlu0 %2359 }
 0xa0d   : > { %v5302_v17 = vpack.c.bf16 %v2233_v13, %v2232_v11  ;;  %v2362_v45 = vsel %vm2337_vm9, %v2360_v43, 0.0  ;;  %v5339_v13 = vrot.slane %v2368_v3, %v2379_v61  ;;  %v4641_v43 = vmov 1  }
 0xa0e   : > { %v2195_v35 = vpop.permute.xlu1 %2194 }
 0xa0f   : > { %v5306_v19 = vmul.f32 %v2195_v35, %v2142_v15 }
 0xa12   : > { %v2205_v4 = vpop.permute.xlu1 %2204 }
 0xa13   : > { %v2236_v24 = vmul.f32 %v2205_v4, %v2150_v23  ;;  %v2369_v23 = vmul.f32 8.0, %v5212_v10 }
 0xa16   : > { %v2210_v26 = vpop.permute.xlu1 %2209 }
 0xa17   : > { %v2237_v27 = vmul.f32 %v2210_v26, %v2153_v37 }
 0xa19   : > { %v5313_v28 = vpack.c.bf16 %v2237_v27, %v2236_v24  ;;  %2355 = vadd.xlane.f32.xlu1 %v2354_v39  ;;  %v5346_v27 = vadd.f32 -0.5, %v2369_v23 }
 0xa1a   : > { %v2344_v29 = vpop.permute.xlu1 %2343 }
 0xa1b   : > { %v2346_v30 = vsel %vm2337_vm9, %v2344_v29, 0.0  ;;  %v2371_v10 = vadd.f32 %v5346_v27, %v5198_v1 }
 0xa1c   : > { %2347 = vadd.xlane.f32.xlu0 %v2346_v30 }
 0xa1e   : > { %v2936_v33 = vpop.permute.xlu1 %2935 }
 0xa23   : > { %v5318_v44 = vpop.permute.xlu1 %2955 }
 0xa2a   : > { %3093 = vperm.xlu1 %4432, %v3082_v49  }
 0xa2e   : > { %4435 = vset.pattern.permute.xlu1 %v4637_v31 }
 0xa32   : > { %2927 = vperm.xlu0 %4431, %v2924_v36  }
 0xa51   : > { %2363 = vadd.xlane.f32.xlu0 %v2362_v45  ;;  %v2409_v45 = vadd.f32 %v5346_v27, %v5218_v16 }
 0xa67   : > { %3113 = vperm.xlu0 %4431, %v3110_v32  }
 0xa6b   : > { %4433 = vset.pattern.permute.xlu0 %v4638_v42  ;;  %v4642_v42 = vmov 46  }
 0xa71   : > { %v2340_v51 = vpop.xlane.xlu1 %2339 }
 0xa72   : > { %4505 = vrcp.f32 %v2340_v51 }
 0xa7c   : > { %v4506_v49 = vpop.eup %4505 }
 0xa7d   : > { %v5321_v36 = vmul.f32 %v4506_v49, %v5223_v20  ;;  %v4643_v49 = vmov 42  }
 0xa7f   : > { %2663 = vperm.xlu1 %4435, %v5321_v36   ;;  %2635 = vperm.xlu0 %4433, %v5321_v36  }
 0xa83   : > { %4436 = vset.pattern.permute.xlu1 %v4633_v21  ;;  %4434 = vset.pattern.permute.xlu0 %v4631_v9  ;;  %v2391_v21 = vsub.s32 1, %v2378_v6  ;;  %v5384_v6 = vadd.f32 %v5346_v27, %v5226_v22 }
 0xa84   : > { %3121 = vperm.xlu1 %4436, %v3110_v32   ;;  %2199 = vperm.xlu0 %4434, %v2175_v58   ;;  %v5360_v32 = vpop.permute.xlu1 %3085  ;;  %v4644_v58 = vmov 43  }
 0xa85   : > { %v5336_v11 = vrot.slane %v2368_v3, %v2391_v21  ;;  %v2621_v21 = vsub.f32 %v5260_v46, %v5339_v13 }
 0xa87   : > { %v2938_v12 = vsub.f32 %v2936_v33, %v5336_v11  ;;  %v2629_v0 = vsub.f32 %v5273_v53, %v5336_v11  ;;  %v4646_v53 = vmov 33  }
 0xa88   : > { %4437 = vset.pattern.permute.xlu1 %v4631_v9  ;;  %2219 = vperm.xlu0 %4434, %v2179_v14   ;;  %v4645_v14 = vmov 47  }
 0xa89   : > { %2214 = vperm.xlu1 %4437, %v2178_v40   ;;  %v2939_v15 = vand.u32 2147483647, %v2938_v12 }
 0xa8b   : > { %v2940_v37 = vsub.f32 1.0, %v2939_v15  ;;  %v4647_v15 = vmov 36  }
 0xa8c   : > { %4439 = vset.pattern.permute.xlu0 %v4639_v60 }
 0xa8d   : > { %2497 = vrot.lane.b32.xlu1 %v5198_v1, %s4616_s30  ;;  %v2941_v29 = vmax.f32 %v2940_v37, 0.0 }
 0xa8e   : > { %4438 = vset.pattern.permute.xlu1 %v4640_v62  ;;  %v2657_v62 = vsub.f32 %v5264_v48, %v5336_v11  ;;  %v2630_v48 = vand.u32 2147483647, %v2629_v0 }
 0xa90   : > { %v2658_v3 = vand.u32 2147483647, %v2657_v62  ;;  %v2631_v46 = vsub.f32 1.0, %v2630_v48 }
 0xa92   : > { %v2659_v61 = vsub.f32 1.0, %v2658_v3  ;;  %v2632_v23 = vmax.f32 %v2631_v46, 0.0 }
 0xaa6   : > { %v2356_v33 = vpop.xlane.xlu1 %2355 }
 0xaa9   : > { %v2348_v8 = vpop.xlane.xlu0 %2347 }
 0xaaa   : > { %4507 = vrcp.f32 %v2348_v8  ;;  %v2622_v8 = vand.u32 2147483647, %v2621_v21  ;;  %v2161_v21 = vadd.f32 %v5282_v56, %v5187_v59 }
 0xaab   : > { %4509 = vrcp.f32 %v2356_v33 }
 0xab1   : > { %v2928_v35 = vpop.permute.xlu0 %2927 }
 0xab2   : > { %v2930_v4 = vsub.f32 %v2928_v35, %v5339_v13  ;;  %v2660_v35 = vmax.f32 %v2659_v61, 0.0 }
 0xab4   : > { %v4508_v24 = vpop.eup %4507  ;;  %v2931_v25 = vand.u32 2147483647, %v2930_v4  ;;  %v5400_v4 = vpop.permute.xlu1 %3093 }
 0xab5   : > { %v5344_v26 = vmul.f32 %v4508_v24, %v5223_v20  ;;  %v4510_v16 = vpop.eup %4509 }
 0xab6   : > { %v2932_v39 = vsub.f32 1.0, %v2931_v25  ;;  %v5368_v51 = vmul.f32 %v4510_v16, %v5223_v20  ;;  %v2145_v16 = vadd.f32 %v5282_v56, %v5161_v41  ;;  %v2158_v41 = vadd.f32 %v5282_v56, %v5185_v57 }
 0xab7   : > { %2809 = vperm.xlu0 %4439, %v5344_v26   ;;  %2781 = vperm.xlu1 %4438, %v5344_v26   ;;  %v4650_v56 = vmov 37  }
 0xab8   : > { %v2933_v30 = vmax.f32 %v2932_v39, 0.0 }
 0xaba   : > { %v5352_v31 = vmul.f32 %v2941_v29, %v2933_v30 }
 0xabb   : > { %2555 = vrot.lane.b32.xlu0 %v5198_v1, %s4618_s26  ;;  %4440 = vset.pattern.permute.xlu1 %v4631_v9  ;;  %v2442_v1 = vadd.f32 %v5346_v27, %v5298_v63 }
 0xabc   : > { %2374 = vperm.xlu1 %4440, %v2371_v10   ;;  %4441 = vset.pattern.permute.xlu0 %v4641_v43 }
 0xabf   : > { %2386 = vperm.xlu0 %4441, %v2371_v10  }
 0xac0   : > { %2412 = vperm.xlu1 %4440, %v2409_v45  }
 0xac3   : > { %4447 = vset.pattern.permute.xlu0 %v4642_v42 }
 0xac4   : > { %4442 = vset.pattern.permute.xlu1 %v4641_v43 }
 0xac5   : > { %2420 = vperm.xlu1 %4442, %v2409_v45  }
 0xac9   : > { %4443 = vset.pattern.permute.xlu1 %v4631_v9 }
 0xaca   : > { %2445 = vperm.xlu1 %4443, %v2442_v1  }
 0xace   : > { %4444 = vset.pattern.permute.xlu1 %v4641_v43 }
 0xacf   : > { %2453 = vperm.xlu1 %4444, %v2442_v1  }
 0xad3   : > { %4445 = vset.pattern.permute.xlu1 %v4643_v49 }
 0xad4   : > { %2944 = vperm.xlu1 %4445, %v5368_v51  }
 0xad8   : > { %4446 = vset.pattern.permute.xlu1 %v4644_v58 }
 0xad9   : > { %2972 = vperm.xlu1 %4446, %v5368_v51  }
 0xadd   : > { %4448 = vset.pattern.permute.xlu1 %v4645_v14 }
 0xade   : > { %v2364_v63 = vpop.xlane.xlu0 %2363 }
 0xadf   : > { %4511 = vrcp.f32 %v2364_v63 }
 0xae6   : > { %v3114_v24 = vpop.permute.xlu0 %3113 }
 0xae7   : > { %v3116_v30 = vsub.f32 %v3114_v24, %v5339_v13  ;;  %v2767_v24 = vsub.f32 %v5268_v50, %v5339_v13 }
 0xae9   : > { %v4512_v40 = vpop.eup %4511  ;;  %v3117_v49 = vand.u32 2147483647, %v3116_v30 }
 0xaea   : > { %v5374_v60 = vmul.f32 %v4512_v40, %v5223_v20  ;;  %v2649_v20 = vsub.f32 %v5262_v47, %v5339_v13  ;;  %v2623_v47 = vsub.f32 1.0, %v2622_v8 }
 0xaec   : > { %3130 = vperm.xlu1 %4448, %v5374_v60   ;;  %3102 = vperm.xlu0 %4447, %v5374_v60   ;;  %v2650_v22 = vand.u32 2147483647, %v2649_v20  ;;  %v2624_v37 = vmax.f32 %v2623_v47, 0.0  ;;  %v3118_v20 = vsub.f32 1.0, %v3117_v49 }
 0xaee   : > { %v2651_v12 = vsub.f32 1.0, %v2650_v22  ;;  %v2633_v29 = vmul.f32 %v2632_v23, %v2624_v37  ;;  %v3119_v59 = vmax.f32 %v3118_v20, 0.0  ;;  %v2803_v23 = vsub.f32 %v5275_v54, %v5336_v11 }
 0xaf0   : > { %4449 = vset.pattern.permute.xlu1 %v4641_v43  ;;  %2873 = vrot.lane.b32.xlu0 %v5313_v28, %s4617_s3  ;;  %v2652_v25 = vmax.f32 %v2651_v12, 0.0 }
 0xaf1   : > { %2482 = vperm.xlu1 %4449, %v5384_v6   ;;  %4452 = vset.pattern.permute.xlu0 %v4646_v53  ;;  %v2529_v53 = vadd.f32 %v5346_v27, %v5250_v34  ;;  %v4649_v34 = vmov 32  }
 0xaf2   : > { %v2661_v39 = vmul.f32 %v2660_v35, %v2652_v25  ;;  %v2804_v25 = vand.u32 2147483647, %v2803_v23 }
 0xaf4   : > { %2429 = vperm.xlu0 %4452, %v5321_v36  }
 0xaf5   : > { %2819 = vrot.lane.b32.xlu1 %v5292_v7, %s4617_s3 }
 0xaf8   : > { %4453 = vset.pattern.permute.xlu0 %v4647_v15 }
 0xaf9   : > { %2869 = vrot.lane.b32.xlu1 %v5302_v17, %s4617_s3  ;;  %2463 = vperm.xlu0 %4453, %v5344_v26  }
 0xafd   : > { %4455 = vset.pattern.permute.xlu0 %v4641_v43 }
 0xafe   : > { %v2664_v10 = vpop.permute.xlu1 %2663  ;;  %v2636_v45 = vpop.permute.xlu0 %2635 }
 0xaff   : > { %v2666_v33 = vmul.f32 %v2664_v10, %v2661_v39  ;;  %v2638_v42 = vmul.f32 %v2636_v45, %v2633_v29  ;;  %v2768_v39 = vand.u32 2147483647, %v2767_v24 }
 0xb01   : > { %v2667_v1 = vadd.f32 %v2666_v33, %v2638_v42  ;;  %v2769_v10 = vsub.f32 1.0, %v2768_v39 }
 0xb03   : > { %v2668_v58 = vpack.c.bf16 %v2667_v1, %v2667_v1  ;;  %v3122_v63 = vpop.permute.xlu1 %3121  ;;  %v2200_v40 = vpop.permute.xlu0 %2199 }
 0xb04   : > { %v3124_v62 = vsub.f32 %v3122_v63, %v5336_v11  ;;  %v2235_v0 = vmul.f32 %v2200_v40, %v2145_v16 }
 0xb05   : > { %2671 = vrot.lane.b32.xlu0 %v2668_v58, %s4648_s24 }
 0xb06   : > { %v3125_v3 = vand.u32 2147483647, %v3124_v62  ;;  %v5411_v48 = vpack.c.bf16 %v2235_v0, %v5306_v19 }
 0xb07   : > { %v2220_v8 = vpop.permute.xlu0 %2219 }
 0xb08   : > { %v3126_v22 = vsub.f32 1.0, %v3125_v3  ;;  %v2239_v61 = vmul.f32 %v2220_v8, %v2161_v21  ;;  %v2215_v46 = vpop.permute.xlu1 %2214  ;;  %2871 = vrot.lane.b32.xlu1 %v5411_v48, %s4617_s3  ;;  %v2587_v21 = vadd.f32 %v5346_v27, %v5257_v38  ;;  %v2958_v38 = vsub.f32 %v5318_v44, %v5339_v13 }
 0xb09   : > { %v2238_v47 = vmul.f32 %v2215_v46, %v2158_v41  ;;  %2540 = vperm.xlu0 %4455, %v2529_v53   ;;  %v2966_v46 = vsub.f32 %v5304_v18, %v5336_v11 }
 0xb0a   : > { %v3127_v12 = vmax.f32 %v3126_v22, 0.0  ;;  %v4651_v22 = vmov 41  }
 0xb0b   : > { %v5419_v15 = vpack.c.bf16 %v2239_v61, %v2238_v47  ;;  %v2967_v44 = vand.u32 2147483647, %v2966_v46 }
 0xb0c   : > { %v2498_v19 = vpop.permute.xlu1 %2497  ;;  %v5421_v35 = vmul.f32 %v3127_v12, %v3119_v59  ;;  %v2959_v12 = vand.u32 2147483647, %v2958_v38 }
 0xb0d   : > { %4456 = vset.pattern.permute.xlu0 %v4631_v9  ;;  %2875 = vrot.lane.b32.xlu1 %v5419_v15, %s4617_s3  ;;  %v2500_v57 = vadd.f32 %v5346_v27, %v2498_v19 }
 0xb0e   : > { %2474 = vperm.xlu0 %4456, %v5384_v6   ;;  %v2775_v6 = vsub.f32 %v5288_v5, %v5336_v11  ;;  %v2770_v5 = vmax.f32 %v2769_v10, 0.0  ;;  %v2960_v23 = vsub.f32 1.0, %v2959_v12 }
 0xb10   : > { %v2776_v37 = vand.u32 2147483647, %v2775_v6  ;;  %v2961_v39 = vmax.f32 %v2960_v23, 0.0 }
 0xb11   : > { %2511 = vperm.xlu1 %4449, %v2500_v57  }
 0xb12   : > { %2503 = vperm.xlu0 %4456, %v2500_v57   ;;  %v2777_v30 = vsub.f32 1.0, %v2776_v37 }
 0xb14   : > { %v2778_v45 = vmax.f32 %v2777_v30, 0.0 }
 0xb15   : > { %4450 = vset.pattern.permute.xlu1 %v4649_v34  ;;  %v4652_v34 = vmov 40  }
 0xb16   : > { %2400 = vperm.xlu1 %4450, %v5321_v36   ;;  %v2795_v36 = vsub.f32 %v5270_v52, %v5339_v13  ;;  %v2779_v1 = vmul.f32 %v2778_v45, %v2770_v5  ;;  %v4654_v45 = vmov 45  }
 0xb18   : > { %v2796_v29 = vand.u32 2147483647, %v2795_v36  ;;  %v2968_v36 = vsub.f32 1.0, %v2967_v44 }
 0xb1a   : > { %4451 = vset.pattern.permute.xlu1 %v4631_v9 }
 0xb1b   : > { %2532 = vperm.xlu1 %4451, %v2529_v53  }
 0xb1f   : > { %4454 = vset.pattern.permute.xlu1 %v4650_v56 }
 0xb20   : > { %2491 = vperm.xlu1 %4454, %v5344_v26   ;;  %v2805_v26 = vsub.f32 1.0, %v2804_v25  ;;  %v4653_v25 = vmov 44  }
 0xb22   : > { %v2806_v33 = vmax.f32 %v2805_v26, 0.0  ;;  %v2969_v26 = vmax.f32 %v2968_v36, 0.0 }
 0xb24   : > { %4457 = vset.pattern.permute.xlu1 %v4631_v9  ;;  %v2797_v9 = vsub.f32 1.0, %v2796_v29 }
 0xb26   : > { %v2798_v42 = vmax.f32 %v2797_v9, 0.0 }
 0xb28   : > { %v2807_v54 = vmul.f32 %v2806_v33, %v2798_v42  ;;  %v2970_v33 = vmul.f32 %v2969_v26, %v2961_v39 }
 0xb36   : > { %v2782_v16 = vpop.permute.xlu1 %2781  ;;  %v2810_v49 = vpop.permute.xlu0 %2809 }
 0xb37   : > { %v2784_v50 = vmul.f32 %v2782_v16, %v2779_v1  ;;  %v2812_v58 = vmul.f32 %v2810_v49, %v2807_v54  ;;  %v3096_v54 = vsub.f32 %v5400_v4, %v5336_v11 }
 0xb39   : > { %v2813_v63 = vadd.f32 %v2812_v58, %v2784_v50  ;;  %v3097_v50 = vand.u32 2147483647, %v3096_v54 }
 0xb3a   : > { %v2556_v52 = vpop.permute.xlu0 %2555 }
 0xb3b   : > { %v2814_v40 = vpack.c.bf16 %v2813_v63, %v2813_v63  ;;  %v2558_v62 = vadd.f32 %v5346_v27, %v2556_v52  ;;  %v5441_v0 = vpop.permute.xlu1 %2374 }
 0xb3d   : > { %2816 = vrot.lane.b32.xlu0 %v2814_v40, %s4648_s24  ;;  %2561 = vperm.xlu1 %4457, %v2558_v62  }
 0xb3e   : > { %v2387_v52 = vpop.permute.xlu0 %2386 }
 0xb3f   : > { %v2413_v20 = vpop.permute.xlu1 %2412 }
 0xb40   : > { %v2415_v3 = vsub.f32 %v2413_v20, %v5339_v13 }
 0xb41   : > { %2590 = vperm.xlu0 %4456, %v2587_v21   ;;  %4458 = vset.pattern.permute.xlu1 %v4641_v43 }
 0xb42   : > { %2569 = vperm.xlu1 %4458, %v2558_v62   ;;  %v2416_v41 = vand.u32 2147483647, %v2415_v3 }
 0xb44   : > { %v2421_v53 = vpop.permute.xlu1 %2420  ;;  %v2417_v27 = vsub.f32 1.0, %v2416_v41 }
 0xb45   : > { %v2423_v8 = vsub.f32 %v2421_v53, %v5336_v11  ;;  %3139 = vrot.lane.b32.xlu0 %v5292_v7, %s4618_s26 }
 0xb46   : > { %2598 = vperm.xlu1 %4458, %v2587_v21   ;;  %4460 = vset.pattern.permute.xlu0 %v4651_v22  ;;  %v2418_v19 = vmax.f32 %v2417_v27, 0.0 }
 0xb47   : > { %v2424_v61 = vand.u32 2147483647, %v2423_v8 }
 0xb49   : > { %v2425_v43 = vsub.f32 1.0, %v2424_v61  ;;  %v2446_v47 = vpop.permute.xlu1 %2445  ;;  %3027 = vrot.lane.b32.xlu0 %v5302_v17, %s4616_s30 }
 0xb4a   : > { %v2448_v59 = vsub.f32 %v2446_v47, %v5339_v13  ;;  %2981 = vrot.lane.b32.xlu1 %v5292_v7, %s4616_s30  ;;  %v2381_v47 = vsub.f32 %v5441_v0, %v5339_v13 }
 0xb4b   : > { %v2426_v57 = vmax.f32 %v2425_v43, 0.0  ;;  %4459 = vset.pattern.permute.xlu1 %v4652_v34  ;;  %v2393_v43 = vsub.f32 %v2387_v52, %v5336_v11 }
 0xb4c   : > { %v2449_v56 = vand.u32 2147483647, %v2448_v59  ;;  %v2382_v12 = vand.u32 2147483647, %v2381_v47 }
 0xb4d   : > { %3185 = vrot.lane.b32.xlu0 %v5302_v17, %s4618_s26  ;;  %v5462_v18 = vmul.f32 %v2426_v57, %v2418_v19 }
 0xb4e   : > { %v2454_v6 = vpop.permute.xlu1 %2453  ;;  %2521 = vperm.xlu1 %4459, %v5368_v51   ;;  %v2450_v7 = vsub.f32 1.0, %v2449_v56  ;;  %v2383_v57 = vsub.f32 1.0, %v2382_v12 }
 0xb4f   : > { %v2456_v24 = vsub.f32 %v2454_v6, %v5336_v11 }
 0xb50   : > { %v2451_v10 = vmax.f32 %v2450_v7, 0.0  ;;  %v2384_v56 = vmax.f32 %v2383_v57, 0.0 }
 0xb51   : > { %v2457_v37 = vand.u32 2147483647, %v2456_v24  ;;  %2549 = vperm.xlu0 %4460, %v5368_v51  }
 0xb52   : > { %4461 = vset.pattern.permute.xlu1 %v4653_v25 }
 0xb53   : > { %v2458_v29 = vsub.f32 1.0, %v2457_v37  ;;  %v2945_v30 = vpop.permute.xlu1 %2944  ;;  %2579 = vperm.xlu1 %4461, %v5374_v60  }
 0xb54   : > { %v2947_v42 = vmul.f32 %v2945_v30, %v5352_v31  ;;  %v3098_v31 = vsub.f32 1.0, %v3097_v50 }
 0xb55   : > { %v2459_v9 = vmax.f32 %v2458_v29, 0.0  ;;  %3029 = vrot.lane.b32.xlu0 %v5411_v48, %s4616_s30 }
 0xb56   : > { %4463 = vset.pattern.permute.xlu0 %v4645_v14  ;;  %v3088_v14 = vsub.f32 %v5360_v32, %v5339_v13  ;;  %v3099_v63 = vmax.f32 %v3098_v31, 0.0 }
 0xb57   : > { %4462 = vset.pattern.permute.xlu1 %v4654_v45  ;;  %v2460_v5 = vmul.f32 %v2459_v9, %v2451_v10 }
 0xb58   : > { %v2973_v51 = vpop.permute.xlu1 %2972  ;;  %2607 = vperm.xlu1 %4462, %v5374_v60   ;;  %v3089_v60 = vand.u32 2147483647, %v3088_v14 }
 0xb59   : > { %v2975_v1 = vmul.f32 %v2973_v51, %v2970_v33  ;;  %3031 = vrot.lane.b32.xlu0 %v5313_v28, %s4616_s30 }
 0xb5a   : > { %v3090_v58 = vsub.f32 1.0, %v3089_v60 }
 0xb5b   : > { %v2976_v16 = vadd.f32 %v2975_v1, %v2947_v42 }
 0xb5c   : > { %v3091_v40 = vmax.f32 %v3090_v58, 0.0 }
 0xb5d   : > { %v2977_v49 = vpack.c.bf16 %v2976_v16, %v2976_v16  ;;  %3033 = vrot.lane.b32.xlu0 %v5419_v15, %s4616_s30  ;;  %s5835_s30 = sld [smem:[#allocation27_spill]] }
 0xb5e   : > { %v3100_v62 = vmul.f32 %v3099_v63, %v3091_v40 }
 0xb5f   : > { %2979 = vrot.lane.b32.xlu1 %v2977_v49, %s4648_s24 }
 0xb6b   : > { %v3131_v21 = vpop.permute.xlu1 %3130  ;;  %v3103_v4 = vpop.permute.xlu0 %3102 }
 0xb6c   : > { %v3133_v20 = vmul.f32 %v3131_v21, %v5421_v35  ;;  %v3105_v3 = vmul.f32 %v3103_v4, %v3100_v62 }
 0xb6e   : > { %v3134_v32 = vadd.f32 %v3133_v20, %v3105_v3 }
 0xb6f   : > { %v5483_v41 = vpop.permute.xlu0 %2873 }
 0xb70   : > { %v3135_v53 = vpack.c.bf16 %v3134_v32, %v3134_v32  ;;  %v2483_v22 = vpop.permute.xlu1 %2482 }
 0xb71   : > { %v2485_v25 = vsub.f32 %v2483_v22, %v5336_v11 }
 0xb72   : > { %3137 = vrot.lane.b32.xlu1 %v3135_v53, %s4648_s24 }
 0xb73   : > { %v2430_v8 = vpop.permute.xlu0 %2429 }
 0xb74   : > { %v2820_v61 = vpop.permute.xlu1 %2819  ;;  %v2432_v23 = vmul.f32 %v2430_v8, %v5462_v18  ;;  %v2486_v18 = vand.u32 2147483647, %v2485_v25 }
 0xb76   : > { %3187 = vrot.lane.b32.xlu1 %v5411_v48, %s4618_s26  ;;  %v2487_v10 = vsub.f32 1.0, %v2486_v18 }
 0xb78   : > { %v2464_v38 = vpop.permute.xlu0 %2463  ;;  %v2870_v46 = vpop.permute.xlu1 %2869  ;;  %v2488_v33 = vmax.f32 %v2487_v10, 0.0 }
 0xb79   : > { %v2466_v27 = vmul.f32 %v2464_v38, %v2460_v5 }
 0xb7a   : > { %3189 = vrot.lane.b32.xlu1 %v5313_v28, %s4618_s26 }
 0xb7c   : > { %v2672_v35 = vpop.permute.xlu0 %2671  ;;  %v2872_v59 = vpop.permute.xlu1 %2871 }
 0xb7d   : > { %4188 = vmatmul.mubr.msk.bf16.vlgmr.msra.gmra.mrb[28].mxu0 %vm2673_vm10, %v2672_v35 }
 0xb7e   : > { %4192 = vmatpush3.bf16.msra.mxu0 %v5302_v17  ;;  %3191 = vrot.lane.b32.xlu1 %v5419_v15, %s4618_s26  ;;  %v2394_v17 = vand.u32 2147483647, %v2393_v43 }
 0xb7f   : > { %4193 = vmatprep.subr.bf16.mxu0 %v4613_v2  ;;  %4199 = vmatprep.mubr.msk.bf16.mxu0 %vm4614_vm1, %v4613_v2 }
 0xb80   : > { %v2395_v19 = vsub.f32 1.0, %v2394_v17 }
 0xb82   : > { %4194 = vmatpush3.bf16.msra.mxu0 %v5411_v48  ;;  %v2876_v48 = vpop.permute.xlu1 %2875  ;;  %v2396_v34 = vmax.f32 %v2395_v19, 0.0 }
 0xb83   : > { %4195 = vmatprep.subr.bf16.mxu0 %v4613_v2 }
 0xb84   : > { %v2397_v6 = vmul.f32 %v2396_v34, %v2384_v56 }
 0xb86   : > { %4196 = vmatpush3.bf16.msra.mxu0 %v5313_v28 }
 0xb87   : > { %4197 = vmatprep.subr.bf16.mxu0 %v4613_v2 }
 0xb88   : > { %v2541_v7 = vpop.permute.xlu0 %2540 }
 0xb89   : > { %v2543_v62 = vsub.f32 %v2541_v7, %v5336_v11 }
 0xb8a   : > { %4198 = vmatpush3.bf16.msra.mxu0 %v5419_v15 }
 0xb8b   : > { %4203 = vmatprep.subr.bf16.mxu0 %v4613_v2  ;;  %v2544_v32 = vand.u32 2147483647, %v2543_v62  ;;  %v4477_v62 = vld [vmem:[%s5835_s30] sm:$0xff]  }
 0xb8d   : > { %v2475_v15 = vpop.permute.xlu0 %2474 }
 0xb8e   : > { %v2477_v37 = vsub.f32 %v2475_v15, %v5339_v13 }
 0xb90   : > { %v5506_v44 = vpop.permute.xlu1 %2511  ;;  %v2478_v39 = vand.u32 2147483647, %v2477_v37 }
 0xb91   : > { %v2504_v29 = vpop.permute.xlu0 %2503  ;;  %v2514_v21 = vsub.f32 %v5506_v44, %v5336_v11 }
 0xb92   : > { %v2479_v30 = vsub.f32 1.0, %v2478_v39  ;;  %v2506_v4 = vsub.f32 %v2504_v29, %v5339_v13 }
 0xb94   : > { %v2480_v45 = vmax.f32 %v2479_v30, 0.0  ;;  %v2507_v53 = vand.u32 2147483647, %v2506_v4 }
 0xb95   : > { %v2401_v0 = vpop.permute.xlu1 %2400 }
 0xb96   : > { %v2403_v28 = vmul.f32 %v2401_v0, %v2397_v6  ;;  %v2489_v51 = vmul.f32 %v2488_v33, %v2480_v45 }
 0xb98   : > { %v2433_v24 = vadd.f32 %v2432_v23, %v2403_v28 }
 0xb9a   : > { %v2434_v36 = vpack.c.bf16 %v2433_v24, %v2433_v24  ;;  %v2533_v26 = vpop.permute.xlu1 %2532 }
 0xb9b   : > { %v2535_v52 = vsub.f32 %v2533_v26, %v5339_v13 }
 0xb9c   : > { %4200 = vmatmul.mubr.msk.bf16.vlgmr.msra.gmra.mrb[28].mxu0 %vm2717_vm11, %v2434_v36 }
 0xb9d   : > { %4204 = vmatpush3.bf16.msra.mxu0 %v2820_v61  ;;  %4205 = vmatprep.mubr.msk.bf16.mxu0 %vm4614_vm1, %v4613_v2  ;;  %v2536_v3 = vand.u32 2147483647, %v2535_v52  ;;  %v2545_v61 = vsub.f32 1.0, %v2544_v32 }
 0xb9e   : > { %4209 = vmatprep.subr.bf16.mxu0 %v4613_v2 }
 0xb9f   : > { %v2492_v5 = vpop.permute.xlu1 %2491  ;;  %v2537_v38 = vsub.f32 1.0, %v2536_v3  ;;  %v2546_v57 = vmax.f32 %v2545_v61, 0.0 }
 0xba0   : > { %v2494_v42 = vmul.f32 %v2492_v5, %v2489_v51 }
 0xba1   : > { %v2538_v17 = vmax.f32 %v2537_v38, 0.0 }
 0xba2   : > { %v2495_v1 = vadd.f32 %v2494_v42, %v2466_v27 }
 0xba4   : > { %v2496_v16 = vpack.c.bf16 %v2495_v1, %v2495_v1 }
 0xbaf   : > { %v2817_v9 = vpop.permute.xlu0 %2816 }
 0xbb0   : > { %4206 = vmatmul.mubr.msk.bf16.vlgmr.msra.gmra.mrb[32].mxu0 %vm2673_vm10, %v2817_v9 }
 0xbb1   : > { %4210 = vmatpush3.bf16.msra.mxu0 %v2870_v46  ;;  %4217 = vmatprep.mubr.msk.bf16.mxu0 %vm4614_vm1, %v4613_v2  ;;  %v2508_v46 = vsub.f32 1.0, %v2507_v53 }
 0xbb2   : > { %4211 = vmatprep.subr.bf16.mxu0 %v4613_v2 }
 0xbb3   : > { %v2509_v44 = vmax.f32 %v2508_v46, 0.0 }
 0xbb5   : > { %4212 = vmatpush3.bf16.msra.mxu0 %v2872_v59 }
 0xbb6   : > { %4213 = vmatprep.subr.bf16.mxu0 %v4613_v2 }
 0xbb9   : > { %4214 = vmatpush3.bf16.msra.mxu0 %v5483_v41  ;;  %v2515_v41 = vand.u32 2147483647, %v2514_v21  ;;  %v4478_v21 = vld [vmem:[%s5835_s30 + $0x8] sm:$0xff]  }
 0xbba   : > { %4215 = vmatprep.subr.bf16.mxu0 %v4613_v2 }
 0xbbb   : > { %v2516_v35 = vsub.f32 1.0, %v2515_v41 }
 0xbbc   : > { %v2562_v54 = vpop.permute.xlu1 %2561 }
 0xbbd   : > { %4216 = vmatpush3.bf16.msra.mxu0 %v2876_v48  ;;  %v2564_v19 = vsub.f32 %v2562_v54, %v5339_v13  ;;  %v2517_v34 = vmax.f32 %v2516_v35, 0.0 }
 0xbbe   : > { %4239 = vmatprep.subr.bf16.mxu0 %v4613_v2 }
 0xbbf   : > { %v2565_v0 = vand.u32 2147483647, %v2564_v19  ;;  %v2518_v28 = vmul.f32 %v2517_v34, %v2509_v44 }
 0xbc0   : > { %4218 = vmatmul.mubr.msk.bf16.vlgmr.msra.gmra.mrb[32].mxu0 %vm2717_vm11, %v2496_v16  ;;  %v2591_v14 = vpop.permute.xlu0 %2590 }
 0xbc1   : > { %v2570_v49 = vpop.permute.xlu1 %2569  ;;  %4241 = vmatprep.mubr.msk.bf16.mxu0 %vm4614_vm1, %v4613_v2  ;;  %v2593_v43 = vsub.f32 %v2591_v14, %v5339_v13  ;;  %v2566_v25 = vsub.f32 1.0, %v2565_v0 }
 0xbc2   : > { %v2572_v47 = vsub.f32 %v2570_v49, %v5336_v11 }
 0xbc3   : > { %v2594_v56 = vand.u32 2147483647, %v2593_v43  ;;  %v2567_v9 = vmax.f32 %v2566_v25, 0.0 }
 0xbc4   : > { %v3140_v50 = vpop.permute.xlu0 %3139  ;;  %v2573_v6 = vand.u32 2147483647, %v2572_v47 }
 0xbc5   : > { %v2599_v60 = vpop.permute.xlu1 %2598  ;;  %4240 = vmatpush3.bf16.msra.mxu0 %v3140_v50  ;;  %v2595_v13 = vsub.f32 1.0, %v2594_v56 }
 0xbc6   : > { %4245 = vmatprep.subr.bf16.mxu0 %v4613_v2  ;;  %v2601_v27 = vsub.f32 %v2599_v60, %v5336_v11  ;;  %v2547_v11 = vmul.f32 %v2546_v57, %v2538_v17  ;;  %v2574_v7 = vsub.f32 1.0, %v2573_v6 }
 0xbc7   : > { %v2596_v29 = vmax.f32 %v2595_v13, 0.0  ;;  %v3975_v13 = vld [vmem:[%s5839_s25] ss:$0 sm:$0xff] }
 0xbc8   : > { %v3028_v58 = vpop.permute.xlu0 %3027  ;;  %v2602_v48 = vand.u32 2147483647, %v2601_v27  ;;  %v2575_v30 = vmax.f32 %v2574_v7, 0.0 }
 0xbc9   : > { %v2982_v31 = vpop.permute.xlu1 %2981 }
 0xbca   : > { %4222 = vmatpush3.bf16.msra.mxu1 %v2982_v31  ;;  %v2603_v23 = vsub.f32 1.0, %v2602_v48  ;;  %v2576_v5 = vmul.f32 %v2575_v30, %v2567_v9  ;;  %v4483_v30 = vld [vmem:[%s4992_s0 + $0x10] sm:$0xff]  }
 0xbcb   : > { %4227 = vmatprep.subr.bf16.mxu1 %v4613_v2 }
 0xbcc   : > { %v3186_v40 = vpop.permute.xlu0 %3185  ;;  %v2604_v39 = vmax.f32 %v2603_v23, 0.0 }
 0xbcd   : > { %v2522_v63 = vpop.permute.xlu1 %2521 }
 0xbce   : > { %v2524_v15 = vmul.f32 %v2522_v63, %v2518_v28  ;;  %v2605_v45 = vmul.f32 %v2604_v39, %v2596_v29  ;;  %v4481_v39 = vld [vmem:[%s4992_s0] sm:$0xff]   ;;  %v4482_v29 = vld [vmem:[%s4992_s0 + $0x8] sm:$0xff]  }
 0xbd0   : > { %v2550_v8 = vpop.permute.xlu0 %2549 }
 0xbd1   : > { %v2552_v24 = vmul.f32 %v2550_v8, %v2547_v11 }
 0xbd2   : > { %v5533_v20 = vpop.permute.xlu1 %2579 }
 0xbd3   : > { %v2553_v18 = vadd.f32 %v2552_v24, %v2524_v15  ;;  %v2582_v1 = vmul.f32 %v5533_v20, %v2576_v5  ;;  %v3976_v15 = vld [vmem:[%s5841_s11] ss:$0 sm:$0xff] }
 0xbd4   : > { %v3030_v12 = vpop.permute.xlu0 %3029 }
 0xbd5   : > { %v2554_v33 = vpack.c.bf16 %v2553_v18, %v2553_v18 }
 0xbd7   : > { %v2608_v22 = vpop.permute.xlu1 %2607 }
 0xbd8   : > { %v3032_v36 = vpop.permute.xlu0 %3031  ;;  %v2610_v51 = vmul.f32 %v2608_v22, %v2605_v45 }
 0xbda   : > { %v2611_v54 = vadd.f32 %v2610_v51, %v2582_v1 }
 0xbdb   : > { %v2980_v59 = vpop.permute.xlu1 %2979 }
 0xbdc   : > { %4224 = vmatmul.mubr.msk.bf16.vlgmr.msra.gmra.mrb[40].mxu1 %vm2673_vm10, %v2980_v59  ;;  %v3034_v26 = vpop.permute.xlu0 %3033  ;;  %v2612_v14 = vpack.c.bf16 %v2611_v54, %v2611_v54 }
 0xbdd   : > { %4228 = vmatpush3.bf16.msra.mxu1 %v3028_v58  ;;  %4235 = vmatprep.mubr.msk.bf16.mxu1 %vm4614_vm1, %v4613_v2 }
 0xbde   : > { %4229 = vmatprep.subr.bf16.mxu1 %v4613_v2 }
 0xbe1   : > { %4230 = vmatpush3.bf16.msra.mxu1 %v3030_v12 }
 0xbe2   : > { %4231 = vmatprep.subr.bf16.mxu1 %v4613_v2 }
 0xbe4   : > { %v3138_v37 = vpop.permute.xlu1 %3137 }
 0xbe5   : > { %4232 = vmatpush3.bf16.msra.mxu1 %v3032_v36  ;;  %4242 = vmatmul.mubr.msk.bf16.vlgmr.msra.gmra.mrb[36].mxu0 %vm2673_vm10, %v3138_v37 }
 0xbe6   : > { %4246 = vmatpush3.bf16.msra.mxu0 %v3186_v40  ;;  %4233 = vmatprep.subr.bf16.mxu1 %v4613_v2 }
 0xbe7   : > { %4247 = vmatprep.subr.bf16.mxu0 %v4613_v2  ;;  %4253 = vmatprep.mubr.msk.bf16.mxu0 %vm4614_vm1, %v4613_v2 }
 0xbe8   : > { %v3188_v10 = vpop.permute.xlu1 %3187 }
 0xbe9   : > { %4234 = vmatpush3.bf16.msra.mxu1 %v3034_v26  ;;  %v4484_v26 = vld [vmem:[%s4992_s0 + $0x18] sm:$0xff]   ;;  %s5844_s0 = sld [smem:[#allocation10_spill]] }
 0xbea   : > { %4248 = vmatpush3.bf16.msra.mxu0 %v3188_v10  ;;  %4257 = vmatprep.subr.bf16.mxu1 %v4613_v2  ;;  %v3977_v10 = vld [vmem:[%s1270_s18] ss:$0 sm:$0xff]  ;;  %s5845_s18 = sld [smem:[#allocation11_spill]] }
 0xbeb   : > { %4249 = vmatprep.subr.bf16.mxu0 %v4613_v2 }
 0xbec   : > { %4236 = vmatmul.mubr.msk.bf16.vlgmr.msra.gmra.mrb[40].mxu1 %vm2717_vm11, %v2554_v33  ;;  %v3190_v42 = vpop.permute.xlu1 %3189 }
 0xbed   : > { %4261 = vmatprep.mubr.msk.bf16.mxu1 %vm4614_vm1, %v4613_v2  ;;  %4258 = vmatpush3.bf16.msra.mxu1 %v4477_v62 }
 0xbee   : > { %4250 = vmatpush3.bf16.msra.mxu0 %v3190_v42  ;;  %4259 = vmatprep.subr.bf16.mxu1 %v4613_v2 }
 0xbef   : > { %4251 = vmatprep.subr.bf16.mxu0 %v4613_v2  ;;  %s3990_s30 = sshll.u32 %s5844_s0, 1 }
 0xbf0   : > { %v3192_v16 = vpop.permute.xlu1 %3191  ;;  %s3550_s3 = sadd.s32 %s5845_s18, %s3990_s30 }
 0xbf1   : > { %4260 = vmatpush3.bf16.msra.mxu1 %v4478_v21  ;;  %s3991_s28 = sshll.u32 %s3550_s3, 7 }
 0xbf2   : > { %4252 = vmatpush3.bf16.msra.mxu0 %v3192_v16  ;;  %4265 = vmatprep.subr.bf16.mxu1 %v4613_v2  ;;  %s5633_s29 = scalar_lea.hbm %s5850_s7, %s3991_s28 }
 0xbf5   : > { %4254 = vmatmul.mubr.msk.bf16.vlgmr.msra.gmra.mrb[36].mxu0 %vm2717_vm11, %v2612_v14 }
 0xc6f   : > { %v2755_v49 = vpop.f32.mrb[28].mxu0 }
 0xc70   : > { %3240 = vst.msk [vmem:[#allocation3] sm:$0xff] %vm1471_vm4, %v2755_v49  ;;  %v4201_v50 = vpop.f32.mrb[29].mxu0 }
 0xc71   : > { %v2758_v60 = vpop.f32.mrb[30].mxu0 }
 0xc72   : > { %v4202_v31 = vpop.f32.mrb[31].mxu0 }
 0xc93   : > { %v2918_v58 = vpop.f32.mrb[32].mxu0 }
 0xc94   : > { %3242 = vrot.lane.b32.xlu0 %v2918_v58, %s4619_s16  ;;  %v4219_v63 = vpop.f32.mrb[33].mxu0  ;;  %s5836_s16 = scalar_lea.vmem %s5711_s19, %s4881_s10  ;;  %s4517_s10 = scalar_lea.vmem %s5635_s27, 128 }
 0xc95   : > { %v2921_v52 = vpop.f32.mrb[34].mxu0  ;;  %v3971_v43 = vld [vmem:[%s5836_s16] ss:$0 sm:$0xff]  ;;  %p4518_p1 = scmp.ne.s32.totalorder %s5635_s27, %s4517_s10  ;;  %p4525_p6 = scmp.lt.s32.totalorder %s4523_s1, %s4517_s10 }
 0xc96   : > { %v4220_v40 = vpop.f32.mrb[35].mxu0 }
 0xc97   : > { %p4519_p2 = pnand %p4518_p1, %p4852_p3  ;;  %p4526_p7 = por %p4525_p6, %p4524_p5 }
 0xc99   : > { %p4520_p4 = pneg %p4519_p2 }
 0xc9b   : > { %p4527_p9 = pnand %p4526_p7, %p4520_p4 }
 0xcbf   : > { %v3076_v4 = vpop.f32.mrb[40].mxu1 }
 0xcc0   : > { %3247 = vrot.lane.b32.xlu1 %v3076_v4, %s4620_s5  ;;  %v4237_v20 = vpop.f32.mrb[41].mxu1  ;;  %s5837_s5 = sld [smem:[#allocation28_spill]] }
 0xcc1   : > { %v3079_v3 = vpop.f32.mrb[42].mxu1 }
 0xcc2   : > { %v4238_v32 = vpop.f32.mrb[43].mxu1 }
 0xcc3   : > { %v3987_v32 = vld [vmem:[%s1281_s21] ss:$0 sm:$0xff] }
 0xcc6   : > { %v4479_v0 = vld [vmem:[%s5837_s5] sm:$0xff]   ;;  %v4480_v23 = vld [vmem:[%s5837_s5 + $0x8] sm:$0xff]  }
 0xcc8   : > { %v3234_v41 = vpop.f32.mrb[36].mxu0 }
 0xcc9   : > { %3252 = vrot.lane.b32.xlu0 %v3234_v41, %s4621_s9  ;;  %v4255_v53 = vpop.f32.mrb[37].mxu0 }
 0xcca   : > { %v3237_v8 = vpop.f32.mrb[38].mxu0  ;;  %v3988_v53 = vld [vmem:[%s1284_s22] ss:$0 sm:$0xff] }
 0xccb   : > { %v4256_v22 = vpop.f32.mrb[39].mxu0 }
 0xd06   : > { %v3243_v38 = vpop.permute.xlu0 %3242 }
 0xd07   : > { %3245 = vst.msk [vmem:[#allocation3] sm:$0xff] %vm1694_vm5, %v3243_v38 }
 0xd32   : > { %v3248_v27 = vpop.permute.xlu1 %3247 }
 0xd33   : > { %3250 = vst.msk [vmem:[#allocation3] sm:$0xff] %vm1809_vm6, %v3248_v27 }
 0xd3b   : > { %v3253_v61 = vpop.permute.xlu0 %3252 }
 0xd3c   : > { %3255 = vst.msk [vmem:[#allocation3] sm:$0xff] %vm1924_vm7, %v3253_v61 }
 0xd43   : > { %v3256_v35 = vld [vmem:[#allocation3] sm:$0xff] }
 0xd44   : > { %v3261_v46 = vpack.c.bf16 %v3256_v35, %v3256_v35 }
 0xd46   : > { %4262 = vmatmul.mubr.msk.bf16.vlgmr.msra.gmra.mrb[44].mxu1 %vm1321_vm2, %v3261_v46 }
 0xd47   : > { %4269 = vmatprep.mubr.msk.bf16.mxu1 %vm4614_vm1, %v4613_v2  ;;  %4266 = vmatpush3.bf16.msra.mxu1 %v4479_v0 }
 0xd48   : > { %4267 = vmatprep.subr.bf16.mxu1 %v4613_v2 }
 0xd4b   : > { %4268 = vmatpush3.bf16.msra.mxu1 %v4480_v23 }
 0xd4c   : > { %4273 = vmatprep.subr.bf16.mxu1 %v4613_v2 }
 0xe19   : > { %v3318_v47 = vpop.f32.mrb[44].mxu1 }
 0xe1a   : > { %v3319_v59 = vadd.f32 %v3971_v43, %v3318_v47  ;;  %v4263_v17 = vpop.f32.mrb[45].mxu1 }
 0xe1b   : > { %v3321_v12 = vpop.f32.mrb[46].mxu1 }
 0xe1c   : > { %v3324_v19 = vadd.f32 %v3319_v59, %v5177_v55  ;;  %v4264_v48 = vpop.f32.mrb[47].mxu1 }
 0xe1e   : > { %v3327_v57 = vsel %vm1321_vm2, %v3324_v19, 0.0 }
 0xe1f   : > { %3328 = vadd.xlane.f32.xlu1 %v3327_v57 }
 0xeac   : > { %v3329_v34 = vpop.xlane.xlu1 %3328 }
 0xead   : > { %v3330_v44 = vmul.f32 0.03125, %v3329_v34 }
 0xeaf   : > { %v3331_v56 = vsub.f32 %v3324_v19, %v3330_v44 }
 0xeb1   : > { %v3332_v6 = vmul.f32 %v3331_v56, %v3331_v56 }
 0xeb3   : > { %v3333_v11 = vsel %vm1321_vm2, %v3332_v6, 0.0 }
 0xeb4   : > { %3334 = vadd.xlane.f32.xlu0 %v3333_v11 }
 0xf41   : > { %v3335_v55 = vpop.xlane.xlu0 %3334 }
 0xf42   : > { %v3336_v28 = vmul.f32 0.03125, %v3335_v55 }
 0xf44   : > { %v3337_v24 = vadd.f32 1e-05, %v3336_v28 }
 0xf46   : > { %4513 = vrsqrt.f32 %v3337_v24 }
 0xf50   : > { %v4514_v36 = vpop.eup %4513 }
 0xf51   : > { %v3339_v7 = vmul.f32 %v4514_v36, %v3331_v56 }
 0xf53   : > { %v3346_v37 = vmul.f32 %v3975_v13, %v3339_v7 }
 0xf55   : > { %v3353_v25 = vadd.f32 %v3976_v15, %v3346_v37 }
 0xf57   : > { %v3358_v18 = vpack.c.bf16 %v3353_v25, %v3353_v25 }
 0xf59   : > { %4270 = vmatmul.mubr.msk.bf16.vlgmr.msra.gmra.mrb[48].mxu1 %vm1321_vm2, %v3358_v18 }
 0xf5a   : > { %4274 = vmatpush3.bf16.msra.mxu1 %v4481_v39  ;;  %4281 = vmatprep.mubr.msk.bf16.mxu1 %vm4614_vm1, %v4613_v2 }
 0xf5b   : > { %4275 = vmatprep.subr.bf16.mxu1 %v4613_v2 }
 0xf5e   : > { %4276 = vmatpush3.bf16.msra.mxu1 %v4482_v29 }
 0xf5f   : > { %4277 = vmatprep.subr.bf16.mxu1 %v4613_v2 }
 0xf62   : > { %4278 = vmatpush3.bf16.msra.mxu1 %v4483_v30 }
 0xf63   : > { %4279 = vmatprep.subr.bf16.mxu1 %v4613_v2  ;;  %v3986_v2 = vld [vmem:[%s1278_s20] ss:$0 sm:$0xff]  ;;  %s5846_s20 = sld [smem:[#allocation8_spill]] }
 0xf66   : > { %4280 = vmatpush3.bf16.msra.mxu1 %v4484_v26 }
 0xf69   : > { %s5851_s21 = sand.u32 1, %s5846_s20  }
 0xf6a   : > { %s3539_s22 = scalar_lea.sflag [#allocation5], %s5851_s21 }
0x102c   : > { %v3415_v9 = vpop.f32.mrb[48].mxu1 }
0x102d   : > { %v3416_v45 = vadd.f32 %v3977_v10, %v3415_v9  ;;  %v4271_v33 = vpop.f32.mrb[49].mxu1 }
0x102e   : > { %v3418_v5 = vpop.f32.mrb[50].mxu1 }
0x102f   : > { %v3421_v51 = vmax.f32 %v3416_v45, 0.0  ;;  %v4272_v42 = vpop.f32.mrb[51].mxu1 }
0x1031   : > { %v3430_v1 = vpack.c.bf16 %v3421_v51, %v3421_v51 }
0x1033   : > { %4282 = vmatmul.mubr.msk.bf16.vlgmr.msra.gmra.mrb[52].mxu1 %vm2717_vm11, %v3430_v1 }
0x1106   : > { %v3492_v54 = vpop.f32.mrb[52].mxu1 }
0x1107   : > { %v3498_v16 = vadd.f32 %v3492_v54, %v3353_v25  ;;  %v4283_v14 = vpop.f32.mrb[53].mxu1 }
0x1108   : > { %v3495_v49 = vpop.f32.mrb[54].mxu1 }
0x1109   : > { %v3506_v50 = vadd.f32 %v3986_v2, %v3498_v16  ;;  %v4284_v60 = vpop.f32.mrb[55].mxu1 }
0x110b   : > { %v3509_v31 = vsel %vm1321_vm2, %v3506_v50, 0.0 }
0x110c   : > { %3510 = vadd.xlane.f32.xlu0 %v3509_v31 }
0x1199   : > { %v3511_v58 = vpop.xlane.xlu0 %3510 }
0x119a   : > { %v3512_v63 = vmul.f32 0.03125, %v3511_v58 }
0x119c   : > { %v3513_v52 = vsub.f32 %v3506_v50, %v3512_v63 }
0x119e   : > { %v3514_v40 = vmul.f32 %v3513_v52, %v3513_v52 }
0x11a0   : > { %v3515_v62 = vsel %vm1321_vm2, %v3514_v40, 0.0 }
0x11a1   : > { %3516 = vadd.xlane.f32.xlu1 %v3515_v62 }
0x122e   : > { %v3517_v21 = vpop.xlane.xlu1 %3516 }
0x122f   : > { %v3518_v4 = vmul.f32 0.03125, %v3517_v21 }
0x1231   : > { %v3519_v20 = vadd.f32 1e-05, %v3518_v4 }
0x1233   : > { %4515 = vrsqrt.f32 %v3519_v20 }
0x123d   : > { %v4516_v3 = vpop.eup %4515 }
0x123e   : > { %v3521_v41 = vmul.f32 %v4516_v3, %v3513_v52 }
0x1240   : > { %v3528_v8 = vmul.f32 %v3987_v32, %v3521_v41 }
0x1242   : > { %v3535_v22 = vadd.f32 %v3988_v53, %v3528_v8 }
0x1244   : > { %3536 = vst.msk [vmem:[#allocation2] sm:$0xff] %vm1321_vm2, %v3535_v22  ;;  %3537 = vst.msk [vmem:[%s1180_s14] sm:$0xff] %vm1321_vm2, %v3535_v22 }
0x1245   : > { %4530 = shalt.err (!%p4527_p9)
}
0x1246   : > { %s4531_s14 = scalar_lea.hbm %s5633_s29, 128  ;;  %s4535_s0 = scalar_lea.hbm %s5850_s7, 512 }
0x1247   : > { %p4532_p10 = scmp.ne.s32.totalorder %s5633_s29, %s4531_s14  ;;  %p4536_p13 = scmp.lt.u32.totalorder %s5633_s29, %s5850_s7 }
0x1248   : > { %p4537_p0 = scmp.lt.u32.totalorder %s4535_s0, %s4531_s14  ;;  %p4539_p2 = scmp.lt.u32.totalorder %s4531_s14, %s5633_s29 }
0x1249   : > { %p4533_p11 = pnand %p4532_p10, %p4852_p3 }
0x124a   : > { %p4538_p1 = por %p4537_p0, %p4536_p13 }
0x124b   : > { %p4534_p12 = pneg %p4533_p11 }
0x124c   : > { %p4540_p4 = por %p4539_p2, %p4538_p1 }
0x124e   : > { %p4541_p5 = pnand %p4540_p4, %p4534_p12 }
0x1250   : > { %4544 = shalt.err (!%p4541_p5)
}
0x1251   : > { %4309 = dma.vmem_to_hbm [thread:$0]  (%p4852_p3), %s5635_s27, 128, %s5633_s29, %s3539_s22  }
0x1252 PF: > { %s5852_s30 = sld [smem:[#allocation14_spill]]  ;;  %s5853_s3 = sld [smem:[#allocation7_spill]] }
0x1258   : > { %p4315_p6 = scmp.ge.s32.totalorder %s5852_s30, 2  ;;  %s3566_s5 = sand.u32 1, %s5853_s3  }
0x1259   : > { %s3567_s9 = scalar_lea.sflag [#allocation5], %s3566_s5 }
0x125a   : > { %p4312_p7 = pnand %p4315_p6, %p4861_p8 }
0x125c   : > { %4578 = dma.done.wait (!%p4312_p7), %s3567_s9, 128  }
0x125d   : > { %4580 = vsyncadd (!%p4312_p7), %s3567_s9, 4294967168  ;;  %s41_s0 = sadd.s32 1, %s5852_s30   ;;  %s5855_s8 = sld [smem:[#allocation8_spill]] }
0x125e   : > { %p38_p9 = scmp.ge.s32.totalorder %s41_s0, 6   ;;  %s5856_s5 = sld [smem:[#allocation9_spill]] }
0x125f   : > { %s5857_s9 = sld [smem:[#allocation19_spill]]  ;;  %s5858_s30 = sld [smem:[#allocation12_spill]] }
0x1260   : > { %s5859_s3 = sld [smem:[#allocation13_spill]]  ;;  %s5860_s6 = sld [smem:[#allocation15_spill]] }
0x1261   : > { %s5861_s10 = sld [smem:[#allocation17_spill]]  ;;  %40 = sbr.rel (!%p38_p9) target bundleno = 31 (0x1f), region = 249 }
0x1268   :  { %3572 = vsyncpa [#allocation5], 1 }
0x1269   :  { %3574 = vsyncpa [#allocation5 + $0x1], 1 }

</bundles_post_ra>
